<compile_context>
chip_gen: v7x
topology: tpu7x:2x2x1
jax: 0.10.0
libtpu: 0.0.40
codegen_flags: <defaults>
</compile_context>

<pallas_src>
import math
import jax
import jax.numpy as jnp
from jax import lax
from jax.experimental import pallas as pl
from jax.experimental.pallas import tpu as pltpu

GROUPS = 32
EPS = 1e-5


# ------------------------------------------------------------------ kernel
def attn_block_kernel(x_ref, gamma_ref, beta_ref, agg_ref, wqkv_ref, bqkv_ref,
                      wproj_ref, bproj_ref, o_ref):
    Bblk, HW, C = x_ref.shape
    inv_hw = 1.0 / HW                                   # compile-time constant

    gamma = gamma_ref[...]                              # (1, C)   f32
    beta = beta_ref[...]                                # (1, C)   f32
    agg = agg_ref[...]                                  # (C, C)   f32
    wqkv = wqkv_ref[...]                                # (C, 3C)  bf16
    bqkv = bqkv_ref[...]                                # (1, 3C)  f32
    wproj = wproj_ref[...]                              # (C, C)   bf16
    bproj = bproj_ref[...]                              # (1, C)   f32

    # Static unroll over images in this block: Bblk == 1 on the v7x
    # grid=(B,) "parallel" path, Bblk == B on the single-TC merged path.
    for b in range(Bblk):
        x = x_ref[b].astype(jnp.float32)                              # (HW, C)

        # ---- GroupNorm(32, C): per-image, per-group stats (f32) ----------
        ch_sum = jnp.sum(x, axis=0, keepdims=True)                    # (1, C)
        mean = jnp.dot(ch_sum, agg,
                       preferred_element_type=jnp.float32) * inv_hw   # (1, C)
        d = x - mean
        ch_ss = jnp.sum(d * d, axis=0, keepdims=True)                 # (1, C)
        var = jnp.dot(ch_ss, agg,
                      preferred_element_type=jnp.float32) * inv_hw    # (1, C)
        inv = lax.rsqrt(var + EPS) * gamma          # fused rsqrt*gamma (1, C)
        hn = d * inv + beta                                           # (HW, C)

        # ---- fused 1x1 q/k/v projections (bf16 operands, f32 accum) ------
        qkv = jnp.dot(hn.astype(jnp.bfloat16), wqkv,
                      preferred_element_type=jnp.float32) + bqkv      # (HW, 3C)
        q = qkv[:, :C].astype(jnp.bfloat16)     # 1/sqrt(C) folded into Wq/bq
        k = qkv[:, C:2 * C].astype(jnp.bfloat16)
        v = qkv[:, 2 * C:].astype(jnp.bfloat16)

        # ---- attention: deferred-normalization softmax --------------------
        # NOTE: contraction on k's last dim; if a k transpose (vxpose) ever
        # shows on the critical path, feed k pre-transposed instead.
        s = lax.dot_general(q, k, (((1,), (1,)), ((), ())),
                            preferred_element_type=jnp.float32)       # (HW, HW)
        m = jnp.max(s, axis=-1, keepdims=True)
        e = jnp.exp(s - m)                               # unnormalized weights
        rs = jnp.sum(e, axis=-1, keepdims=True)                       # (HW, 1)
        h = jnp.dot(e.astype(jnp.bfloat16), v,
                    preferred_element_type=jnp.float32)               # (HW, C)
        h = h * pl.reciprocal(rs, approx=True)   # normalize after the PV matmul

        # ---- output projection + residual ---------------------------------
        h = jnp.dot(h.astype(jnp.bfloat16), wproj,
                    preferred_element_type=jnp.float32) + bproj
        o_ref[b] = (x + h).astype(o_ref.dtype)


# -------------------------------------------------------------- param prep
def prepare_params(params):
    """Input-independent prep, built ONCE (hoisted out of the forward path)."""
    C = params["wq"].shape[0]
    cpg = C // GROUPS

    # Group-mean-over-channels matrix: agg[i, j] = 1/cpg if same group.
    gi = jnp.arange(C)[:, None] // cpg
    gj = jnp.arange(C)[None, :] // cpg
    agg = (gi == gj).astype(jnp.float32) / float(cpg)                 # (C, C)

    # Fuse q/k/v projections; fold the 1/sqrt(C) attention scale into Wq/bq.
    scale = 1.0 / math.sqrt(C)
    wqkv = jnp.concatenate(
        [params["wq"] * scale, params["wk"], params["wv"]], axis=1)
    bqkv = jnp.concatenate(
        [params["bq"] * scale, params["bk"], params["bv"]], axis=1)

    return {
        "gamma": params["gamma"], "beta": params["beta"], "agg": agg,
        "wqkv": wqkv.astype(jnp.bfloat16), "bqkv": bqkv,
        "wproj": params["wproj"].astype(jnp.bfloat16),
        "bproj": params["bproj"],
    }


def _multi_tensorcore():
    """True on chips with >1 TensorCore per chip (v7x)."""
    try:
        return "v7" in jax.devices()[0].device_kind.lower()
    except Exception:
        return False


# ------------------------------------------------------------------ wrapper
def attn_block(x_nchw, prep, batch_parallel=None):
    """AttnBlock.forward. x_nchw: (B, C, H, W) -> (B, C, H, W)."""
    B, C, H, W = x_nchw.shape
    HW = H * W
    assert C % GROUPS == 0
    if batch_parallel is None:
        batch_parallel = _multi_tensorcore()

    # VMEM guard for the O(HW^2) f32 score/exp buffers (plus (HW,C) tensors).
    # TODO(synk): add a KV-tiled online-softmax (flash-style) grid axis once
    # HW exceeds ~1-2K so the kernel scales to larger feature maps.
    per_image = 2 * HW * HW * 4 + 10 * HW * C * 4
    assert per_image * (1 if batch_parallel else B) < 24 * 1024 * 1024, \
        "working set too large for single-block attention; needs KV tiling"

    # Layout plumbing (outside the kernel): NCHW -> channels-last (B, HW, C)
    # so every matmul / store inside the kernel is lane dense.
    x = jnp.transpose(x_nchw, (0, 2, 3, 1)).reshape(B, HW, C)

    w2 = lambda i: (0, 0)
    if batch_parallel:
        # v7x: one image per TensorCore.
        grid = (B,)
        x_spec = pl.BlockSpec((1, HW, C), lambda b: (b, 0, 0))
        o_spec = pl.BlockSpec((1, HW, C), lambda b: (b, 0, 0))
        semantics = ("parallel",)
    else:
        # v5e/v6e (single TC): merge the whole batch into one grid step.
        grid = (1,)
        x_spec = pl.BlockSpec((B, HW, C), lambda i: (0, 0, 0))
        o_spec = pl.BlockSpec((B, HW, C), lambda i: (0, 0, 0))
        semantics = ("arbitrary",)

    out = pl.pallas_call(
        attn_block_kernel,
        out_shape=jax.ShapeDtypeStruct((B, HW, C), x.dtype),
        grid_spec=pltpu.PrefetchScalarGridSpec(
            num_scalar_prefetch=0,
            grid=grid,
            in_specs=[
                x_spec,                                   # x
                pl.BlockSpec((1, C), w2),                 # gamma
                pl.BlockSpec((1, C), w2),                 # beta
                pl.BlockSpec((C, C), w2),                 # agg
                pl.BlockSpec((C, 3 * C), w2),             # Wqkv (bf16)
                pl.BlockSpec((1, 3 * C), w2),             # bqkv
                pl.BlockSpec((C, C), w2),                 # Wproj (bf16)
                pl.BlockSpec((1, C), w2),                 # bproj
            ],
            out_specs=o_spec,
        ),
        compiler_params=pltpu.CompilerParams(dimension_semantics=semantics),
    )(x, prep["gamma"], prep["beta"], prep["agg"], prep["wqkv"], prep["bqkv"],
      prep["wproj"], prep["bproj"])

    return jnp.transpose(out.reshape(B, H, W, C), (0, 3, 1, 2))


# ------------------------------------------------------ params / reference
def init_params(key, C):
    def xavier(k, fan_in, fan_out, gain=1.0):
        bound = gain * math.sqrt(6.0 / (fan_in + fan_out))
        return jax.random.uniform(k, (fan_in, fan_out), jnp.float32,
                                  -bound, bound)

    kq, kk, kv, kp = jax.random.split(key, 4)
    # Weights stored transposed ((Cin, Cout)) so a 1x1 conv is a right-multiply.
    # NOTE: the PyTorch module re-initializes self.proj with xavier gain=1e-5;
    # gain=1.0 is used here so the numeric self-check actually exercises the
    # attention path (init scale does not change forward-pass semantics).
    return {
        "gamma": jnp.ones((1, C), jnp.float32),
        "beta": jnp.zeros((1, C), jnp.float32),
        "wq": xavier(kq, C, C), "bq": jnp.zeros((1, C), jnp.float32),
        "wk": xavier(kk, C, C), "bk": jnp.zeros((1, C), jnp.float32),
        "wv": xavier(kv, C, C), "bv": jnp.zeros((1, C), jnp.float32),
        "wproj": xavier(kp, C, C), "bproj": jnp.zeros((1, C), jnp.float32),
    }


def ref_forward(x_nchw, p):
    """Pure-JAX reference mirroring the PyTorch AttnBlock.forward."""
    with jax.default_matmul_precision("highest"):
        B, C, H, W = x_nchw.shape
        x = jnp.transpose(x_nchw, (0, 2, 3, 1)).reshape(B, H * W, C)
        cpg = C // GROUPS
        xg = x.reshape(B, H * W, GROUPS, cpg)
        mean = xg.mean(axis=(1, 3), keepdims=True)
        var = ((xg - mean) ** 2).mean(axis=(1, 3), keepdims=True)
        hn = ((xg - mean) / jnp.sqrt(var + EPS)).reshape(B, H * W, C)
        hn = hn * p["gamma"] + p["beta"]
        q = hn @ p["wq"] + p["bq"]
        k = hn @ p["wk"] + p["bk"]
        v = hn @ p["wv"] + p["bv"]
        s = jnp.einsum("bqc,bkc->bqk", q, k) / math.sqrt(C)
        w = jax.nn.softmax(s, axis=-1)
        h = jnp.einsum("bqk,bkc->bqc", w, v)
        h = h @ p["wproj"] + p["bproj"]
        out = x + h
        return jnp.transpose(out.reshape(B, H, W, C), (0, 3, 1, 2))


# ------------------------------------------------------------------ main
if __name__ == "__main__":
    B, C, H, W = 2, 128, 16, 16          # GroupNorm(32) requires C % 32 == 0
    key = jax.random.PRNGKey(0)
    kx, kp = jax.random.split(key)

    x = jax.random.normal(kx, (B, C, H, W), jnp.float32)   # NCHW module input
    params = init_params(kp, C)
    prep = prepare_params(params)        # hoisted: input-independent, built once

    out = attn_block(x, prep)
    out = jax.block_until_ready(out)

    ref = ref_forward(x, params)
    err = float(jnp.max(jnp.abs(out - ref)))
    assert out.shape == (B, C, H, W), out.shape
    # bf16 MXU operands (f32 accumulation, f32 GroupNorm/softmax statistics)
    # against an f32-"highest" reference -> allow a slightly looser tolerance.
    assert jnp.allclose(out, ref, atol=2e-2, rtol=2e-2), f"max abs err {err}"
    print("KERNEL_OK")
</pallas_src>

<mosaic_0001>
module attributes {stable_mosaic.version = 11 : i64} {
  func.func @attn_block_kernel(%arg0: i32, %arg1: memref<2x256x128xf32, #tpu.memory_space<vmem>>, %arg2: memref<1x128xf32, #tpu.memory_space<vmem>>, %arg3: memref<1x128xf32, #tpu.memory_space<vmem>>, %arg4: memref<128x128xf32, #tpu.memory_space<vmem>>, %arg5: memref<128x384xbf16, #tpu.memory_space<vmem>>, %arg6: memref<1x384xf32, #tpu.memory_space<vmem>>, %arg7: memref<128x128xbf16, #tpu.memory_space<vmem>>, %arg8: memref<1x128xf32, #tpu.memory_space<vmem>>, %arg9: memref<2x256x128xf32, #tpu.memory_space<vmem>>) attributes {dimension_semantics = [#tpu.dimension_semantics<arbitrary>], iteration_bounds = array<i64: 1>, scalar_prefetch = 0 : i64, scratch_operands = 0 : i64, tpu.core_type = #tpu.core_type<tc>, window_params = [{pipeline_mode = #tpu.pipeline_mode<synchronous>, transform_indices = @transform_0, window_bounds = array<i64: 2, 256, 128>}, {pipeline_mode = #tpu.pipeline_mode<synchronous>, transform_indices = @transform_1, window_bounds = array<i64: 1, 128>}, {pipeline_mode = #tpu.pipeline_mode<synchronous>, transform_indices = @transform_2, window_bounds = array<i64: 1, 128>}, {pipeline_mode = #tpu.pipeline_mode<synchronous>, transform_indices = @transform_3, window_bounds = array<i64: 128, 128>}, {pipeline_mode = #tpu.pipeline_mode<synchronous>, transform_indices = @transform_4, window_bounds = array<i64: 128, 384>}, {pipeline_mode = #tpu.pipeline_mode<synchronous>, transform_indices = @transform_5, window_bounds = array<i64: 1, 384>}, {pipeline_mode = #tpu.pipeline_mode<synchronous>, transform_indices = @transform_6, window_bounds = array<i64: 128, 128>}, {pipeline_mode = #tpu.pipeline_mode<synchronous>, transform_indices = @transform_7, window_bounds = array<i64: 1, 128>}, {pipeline_mode = #tpu.pipeline_mode<synchronous>, transform_indices = @transform_8, window_bounds = array<i64: 2, 256, 128>}]} {
    %c0 = arith.constant 0 : index
    %c0_0 = arith.constant 0 : index
    %0 = vector.load %arg2[%c0, %c0_0] : memref<1x128xf32, #tpu.memory_space<vmem>>, vector<1x128xf32>
    %c0_1 = arith.constant 0 : index
    %c0_2 = arith.constant 0 : index
    %1 = vector.load %arg3[%c0_1, %c0_2] : memref<1x128xf32, #tpu.memory_space<vmem>>, vector<1x128xf32>
    %c0_3 = arith.constant 0 : index
    %c0_4 = arith.constant 0 : index
    %2 = vector.load %arg4[%c0_3, %c0_4] : memref<128x128xf32, #tpu.memory_space<vmem>>, vector<128x128xf32>
    %c0_5 = arith.constant 0 : index
    %c0_6 = arith.constant 0 : index
    %3 = vector.load %arg5[%c0_5, %c0_6] : memref<128x384xbf16, #tpu.memory_space<vmem>>, vector<128x384xbf16>
    %c0_7 = arith.constant 0 : index
    %c0_8 = arith.constant 0 : index
    %4 = vector.load %arg6[%c0_7, %c0_8] : memref<1x384xf32, #tpu.memory_space<vmem>>, vector<1x384xf32>
    %c0_9 = arith.constant 0 : index
    %c0_10 = arith.constant 0 : index
    %5 = vector.load %arg7[%c0_9, %c0_10] : memref<128x128xbf16, #tpu.memory_space<vmem>>, vector<128x128xbf16>
    %c0_11 = arith.constant 0 : index
    %c0_12 = arith.constant 0 : index
    %6 = vector.load %arg8[%c0_11, %c0_12] : memref<1x128xf32, #tpu.memory_space<vmem>>, vector<1x128xf32>
    %c0_13 = arith.constant 0 : index
    %c0_14 = arith.constant 0 : index
    %c0_15 = arith.constant 0 : index
    %7 = vector.load %arg1[%c0_13, %c0_14, %c0_15] : memref<2x256x128xf32, #tpu.memory_space<vmem>>, vector<1x256x128xf32>
    %8 = vector.shape_cast %7 : vector<1x256x128xf32> to vector<256x128xf32>
    %cst = arith.constant dense<0.000000e+00> : vector<128xf32>
    %9 = vector.multi_reduction <add>, %8, %cst [0] : vector<256x128xf32> to vector<128xf32>
    %10 = vector.shape_cast %9 : vector<128xf32> to vector<1x128xf32>
    %cst_16 = arith.constant dense<0.000000e+00> : vector<1x128xf32>
    %11 = tpu.matmul %10, %2, %cst_16 {dimension_numbers = #tpu.dot_dimension_numbers<[1], [0], [0], [1], [0, 0, 1, 1], [], []>} : vector<1x128xf32>, vector<128x128xf32>, vector<1x128xf32> -> vector<1x128xf32>
    %cst_17 = arith.constant 3.906250e-03 : f32
    %12 = vector.broadcast %cst_17 : f32 to vector<1x128xf32>
    %13 = arith.mulf %11, %12 : vector<1x128xf32>
    %14 = vector.broadcast %13 : vector<1x128xf32> to vector<256x128xf32>
    %15 = arith.subf %8, %14 : vector<256x128xf32>
    %16 = arith.mulf %15, %15 : vector<256x128xf32>
    %cst_18 = arith.constant dense<0.000000e+00> : vector<128xf32>
    %17 = vector.multi_reduction <add>, %16, %cst_18 [0] : vector<256x128xf32> to vector<128xf32>
    %18 = vector.shape_cast %17 : vector<128xf32> to vector<1x128xf32>
    %cst_19 = arith.constant dense<0.000000e+00> : vector<1x128xf32>
    %19 = tpu.matmul %18, %2, %cst_19 {dimension_numbers = #tpu.dot_dimension_numbers<[1], [0], [0], [1], [0, 0, 1, 1], [], []>} : vector<1x128xf32>, vector<128x128xf32>, vector<1x128xf32> -> vector<1x128xf32>
    %cst_20 = arith.constant 3.906250e-03 : f32
    %20 = vector.broadcast %cst_20 : f32 to vector<1x128xf32>
    %21 = arith.mulf %19, %20 : vector<1x128xf32>
    %cst_21 = arith.constant 9.99999974E-6 : f32
    %22 = vector.broadcast %cst_21 : f32 to vector<1x128xf32>
    %23 = arith.addf %21, %22 : vector<1x128xf32>
    %24 = math.rsqrt %23 : vector<1x128xf32>
    %25 = arith.mulf %24, %0 : vector<1x128xf32>
    %26 = vector.broadcast %25 : vector<1x128xf32> to vector<256x128xf32>
    %27 = arith.mulf %15, %26 : vector<256x128xf32>
    %28 = vector.broadcast %1 : vector<1x128xf32> to vector<256x128xf32>
    %29 = arith.addf %27, %28 : vector<256x128xf32>
    %30 = arith.truncf %29 : vector<256x128xf32> to vector<256x128xbf16>
    %cst_22 = arith.constant dense<0.000000e+00> : vector<256x384xf32>
    %31 = tpu.matmul %30, %3, %cst_22 {dimension_numbers = #tpu.dot_dimension_numbers<[1], [0], [0], [1], [0, 0, 1, 1], [], []>} : vector<256x128xbf16>, vector<128x384xbf16>, vector<256x384xf32> -> vector<256x384xf32>
    %32 = vector.broadcast %4 : vector<1x384xf32> to vector<256x384xf32>
    %33 = arith.addf %31, %32 : vector<256x384xf32>
    %34 = vector.extract_strided_slice %33 {offsets = [0, 0], sizes = [256, 128], strides = [1, 1]} : vector<256x384xf32> to vector<256x128xf32>
    %35 = arith.truncf %34 : vector<256x128xf32> to vector<256x128xbf16>
    %36 = vector.extract_strided_slice %33 {offsets = [0, 128], sizes = [256, 128], strides = [1, 1]} : vector<256x384xf32> to vector<256x128xf32>
    %37 = arith.truncf %36 : vector<256x128xf32> to vector<256x128xbf16>
    %38 = vector.extract_strided_slice %33 {offsets = [0, 256], sizes = [256, 128], strides = [1, 1]} : vector<256x384xf32> to vector<256x128xf32>
    %39 = arith.truncf %38 : vector<256x128xf32> to vector<256x128xbf16>
    %cst_23 = arith.constant dense<0.000000e+00> : vector<256x256xf32>
    %40 = tpu.matmul %35, %37, %cst_23 {dimension_numbers = #tpu.dot_dimension_numbers<[1], [1], [0], [0], [0, 0, 1, 0], [], []>} : vector<256x128xbf16>, vector<256x128xbf16>, vector<256x256xf32> -> vector<256x256xf32>
    %cst_24 = arith.constant dense<0xFF800000> : vector<256xf32>
    %41 = vector.multi_reduction <maximumf>, %40, %cst_24 [1] : vector<256x256xf32> to vector<256xf32>
    %42 = vector.shape_cast %41 : vector<256xf32> to vector<256x1xf32>
    %43 = vector.broadcast %42 : vector<256x1xf32> to vector<256x256xf32>
    %44 = arith.subf %40, %43 : vector<256x256xf32>
    %45 = math.exp %44 : vector<256x256xf32>
    %cst_25 = arith.constant dense<0.000000e+00> : vector<256xf32>
    %46 = vector.multi_reduction <add>, %45, %cst_25 [1] : vector<256x256xf32> to vector<256xf32>
    %47 = vector.shape_cast %46 : vector<256xf32> to vector<256x1xf32>
    %48 = arith.truncf %45 : vector<256x256xf32> to vector<256x256xbf16>
    %cst_26 = arith.constant dense<0.000000e+00> : vector<256x128xf32>
    %49 = tpu.matmul %48, %39, %cst_26 {dimension_numbers = #tpu.dot_dimension_numbers<[1], [0], [0], [1], [0, 0, 1, 1], [], []>} : vector<256x256xbf16>, vector<256x128xbf16>, vector<256x128xf32> -> vector<256x128xf32>
    %50 = tpu.reciprocal %47 {approx = true} : vector<256x1xf32> -> vector<256x1xf32>
    %51 = vector.broadcast %50 : vector<256x1xf32> to vector<256x128xf32>
    %52 = arith.mulf %49, %51 : vector<256x128xf32>
    %53 = arith.truncf %52 : vector<256x128xf32> to vector<256x128xbf16>
    %cst_27 = arith.constant dense<0.000000e+00> : vector<256x128xf32>
    %54 = tpu.matmul %53, %5, %cst_27 {dimension_numbers = #tpu.dot_dimension_numbers<[1], [0], [0], [1], [0, 0, 1, 1], [], []>} : vector<256x128xbf16>, vector<128x128xbf16>, vector<256x128xf32> -> vector<256x128xf32>
    %55 = vector.broadcast %6 : vector<1x128xf32> to vector<256x128xf32>
    %56 = arith.addf %54, %55 : vector<256x128xf32>
    %57 = arith.addf %8, %56 : vector<256x128xf32>
    %c0_28 = arith.constant 0 : index
    %c0_29 = arith.constant 0 : index
    %c0_30 = arith.constant 0 : index
    %58 = vector.load %arg9[%c0_28, %c0_29, %c0_30] : memref<2x256x128xf32, #tpu.memory_space<vmem>>, vector<1x256x128xf32>
    %59 = vector.shape_cast %58 : vector<1x256x128xf32> to vector<256x128xf32>
    %60 = vector.shape_cast %57 : vector<256x128xf32> to vector<1x256x128xf32>
    tpu.vector_store %arg9[%c0_28, %c0_29, %c0_30], %60 {strides = array<i32>} : memref<2x256x128xf32, #tpu.memory_space<vmem>>, vector<1x256x128xf32>,
    %c1 = arith.constant 1 : index
    %c0_31 = arith.constant 0 : index
    %c0_32 = arith.constant 0 : index
    %61 = vector.load %arg1[%c1, %c0_31, %c0_32] : memref<2x256x128xf32, #tpu.memory_space<vmem>>, vector<1x256x128xf32>
    %62 = vector.shape_cast %61 : vector<1x256x128xf32> to vector<256x128xf32>
    %cst_33 = arith.constant dense<0.000000e+00> : vector<128xf32>
    %63 = vector.multi_reduction <add>, %62, %cst_33 [0] : vector<256x128xf32> to vector<128xf32>
    %64 = vector.shape_cast %63 : vector<128xf32> to vector<1x128xf32>
    %cst_34 = arith.constant dense<0.000000e+00> : vector<1x128xf32>
    %65 = tpu.matmul %64, %2, %cst_34 {dimension_numbers = #tpu.dot_dimension_numbers<[1], [0], [0], [1], [0, 0, 1, 1], [], []>} : vector<1x128xf32>, vector<128x128xf32>, vector<1x128xf32> -> vector<1x128xf32>
    %cst_35 = arith.constant 3.906250e-03 : f32
    %66 = vector.broadcast %cst_35 : f32 to vector<1x128xf32>
    %67 = arith.mulf %65, %66 : vector<1x128xf32>
    %68 = vector.broadcast %67 : vector<1x128xf32> to vector<256x128xf32>
    %69 = arith.subf %62, %68 : vector<256x128xf32>
    %70 = arith.mulf %69, %69 : vector<256x128xf32>
    %cst_36 = arith.constant dense<0.000000e+00> : vector<128xf32>
    %71 = vector.multi_reduction <add>, %70, %cst_36 [0] : vector<256x128xf32> to vector<128xf32>
    %72 = vector.shape_cast %71 : vector<128xf32> to vector<1x128xf32>
    %cst_37 = arith.constant dense<0.000000e+00> : vector<1x128xf32>
    %73 = tpu.matmul %72, %2, %cst_37 {dimension_numbers = #tpu.dot_dimension_numbers<[1], [0], [0], [1], [0, 0, 1, 1], [], []>} : vector<1x128xf32>, vector<128x128xf32>, vector<1x128xf32> -> vector<1x128xf32>
    %cst_38 = arith.constant 3.906250e-03 : f32
    %74 = vector.broadcast %cst_38 : f32 to vector<1x128xf32>
    %75 = arith.mulf %73, %74 : vector<1x128xf32>
    %cst_39 = arith.constant 9.99999974E-6 : f32
    %76 = vector.broadcast %cst_39 : f32 to vector<1x128xf32>
    %77 = arith.addf %75, %76 : vector<1x128xf32>
    %78 = math.rsqrt %77 : vector<1x128xf32>
    %79 = arith.mulf %78, %0 : vector<1x128xf32>
    %80 = vector.broadcast %79 : vector<1x128xf32> to vector<256x128xf32>
    %81 = arith.mulf %69, %80 : vector<256x128xf32>
    %82 = vector.broadcast %1 : vector<1x128xf32> to vector<256x128xf32>
    %83 = arith.addf %81, %82 : vector<256x128xf32>
    %84 = arith.truncf %83 : vector<256x128xf32> to vector<256x128xbf16>
    %cst_40 = arith.constant dense<0.000000e+00> : vector<256x384xf32>
    %85 = tpu.matmul %84, %3, %cst_40 {dimension_numbers = #tpu.dot_dimension_numbers<[1], [0], [0], [1], [0, 0, 1, 1], [], []>} : vector<256x128xbf16>, vector<128x384xbf16>, vector<256x384xf32> -> vector<256x384xf32>
    %86 = vector.broadcast %4 : vector<1x384xf32> to vector<256x384xf32>
    %87 = arith.addf %85, %86 : vector<256x384xf32>
    %88 = vector.extract_strided_slice %87 {offsets = [0, 0], sizes = [256, 128], strides = [1, 1]} : vector<256x384xf32> to vector<256x128xf32>
    %89 = arith.truncf %88 : vector<256x128xf32> to vector<256x128xbf16>
    %90 = vector.extract_strided_slice %87 {offsets = [0, 128], sizes = [256, 128], strides = [1, 1]} : vector<256x384xf32> to vector<256x128xf32>
    %91 = arith.truncf %90 : vector<256x128xf32> to vector<256x128xbf16>
    %92 = vector.extract_strided_slice %87 {offsets = [0, 256], sizes = [256, 128], strides = [1, 1]} : vector<256x384xf32> to vector<256x128xf32>
    %93 = arith.truncf %92 : vector<256x128xf32> to vector<256x128xbf16>
    %cst_41 = arith.constant dense<0.000000e+00> : vector<256x256xf32>
    %94 = tpu.matmul %89, %91, %cst_41 {dimension_numbers = #tpu.dot_dimension_numbers<[1], [1], [0], [0], [0, 0, 1, 0], [], []>} : vector<256x128xbf16>, vector<256x128xbf16>, vector<256x256xf32> -> vector<256x256xf32>
    %cst_42 = arith.constant dense<0xFF800000> : vector<256xf32>
    %95 = vector.multi_reduction <maximumf>, %94, %cst_42 [1] : vector<256x256xf32> to vector<256xf32>
    %96 = vector.shape_cast %95 : vector<256xf32> to vector<256x1xf32>
    %97 = vector.broadcast %96 : vector<256x1xf32> to vector<256x256xf32>
    %98 = arith.subf %94, %97 : vector<256x256xf32>
    %99 = math.exp %98 : vector<256x256xf32>
    %cst_43 = arith.constant dense<0.000000e+00> : vector<256xf32>
    %100 = vector.multi_reduction <add>, %99, %cst_43 [1] : vector<256x256xf32> to vector<256xf32>
    %101 = vector.shape_cast %100 : vector<256xf32> to vector<256x1xf32>
    %102 = arith.truncf %99 : vector<256x256xf32> to vector<256x256xbf16>
    %cst_44 = arith.constant dense<0.000000e+00> : vector<256x128xf32>
    %103 = tpu.matmul %102, %93, %cst_44 {dimension_numbers = #tpu.dot_dimension_numbers<[1], [0], [0], [1], [0, 0, 1, 1], [], []>} : vector<256x256xbf16>, vector<256x128xbf16>, vector<256x128xf32> -> vector<256x128xf32>
    %104 = tpu.reciprocal %101 {approx = true} : vector<256x1xf32> -> vector<256x1xf32>
    %105 = vector.broadcast %104 : vector<256x1xf32> to vector<256x128xf32>
    %106 = arith.mulf %103, %105 : vector<256x128xf32>
    %107 = arith.truncf %106 : vector<256x128xf32> to vector<256x128xbf16>
    %cst_45 = arith.constant dense<0.000000e+00> : vector<256x128xf32>
    %108 = tpu.matmul %107, %5, %cst_45 {dimension_numbers = #tpu.dot_dimension_numbers<[1], [0], [0], [1], [0, 0, 1, 1], [], []>} : vector<256x128xbf16>, vector<128x128xbf16>, vector<256x128xf32> -> vector<256x128xf32>
    %109 = vector.broadcast %6 : vector<1x128xf32> to vector<256x128xf32>
    %110 = arith.addf %108, %109 : vector<256x128xf32>
    %111 = arith.addf %62, %110 : vector<256x128xf32>
    %c1_46 = arith.constant 1 : index
    %c0_47 = arith.constant 0 : index
    %c0_48 = arith.constant 0 : index
    %112 = vector.load %arg9[%c1_46, %c0_47, %c0_48] : memref<2x256x128xf32, #tpu.memory_space<vmem>>, vector<1x256x128xf32>
    %113 = vector.shape_cast %112 : vector<1x256x128xf32> to vector<256x128xf32>
    %114 = vector.shape_cast %111 : vector<256x128xf32> to vector<1x256x128xf32>
    tpu.vector_store %arg9[%c1_46, %c0_47, %c0_48], %114 {strides = array<i32>} : memref<2x256x128xf32, #tpu.memory_space<vmem>>, vector<1x256x128xf32>,
    return
  }
  func.func @transform_0(%arg0: i32) -> (i32, i32, i32) {
    %c0_i32 = arith.constant 0 : i32
    %c0_i32_0 = arith.constant 0 : i32
    %c0_i32_1 = arith.constant 0 : i32
    %c0_i32_2 = arith.constant 0 : i32
    return %c0_i32, %c0_i32_0, %c0_i32_1 : i32, i32, i32
  }
  func.func @transform_1(%arg0: i32) -> (i32, i32) {
    %c0_i32 = arith.constant 0 : i32
    %c0_i32_0 = arith.constant 0 : i32
    %c0_i32_1 = arith.constant 0 : i32
    return %c0_i32, %c0_i32_0 : i32, i32
  }
  func.func @transform_2(%arg0: i32) -> (i32, i32) {
    %c0_i32 = arith.constant 0 : i32
    %c0_i32_0 = arith.constant 0 : i32
    %c0_i32_1 = arith.constant 0 : i32
    return %c0_i32, %c0_i32_0 : i32, i32
  }
  func.func @transform_3(%arg0: i32) -> (i32, i32) {
    %c0_i32 = arith.constant 0 : i32
    %c0_i32_0 = arith.constant 0 : i32
    %c0_i32_1 = arith.constant 0 : i32
    return %c0_i32, %c0_i32_0 : i32, i32
  }
  func.func @transform_4(%arg0: i32) -> (i32, i32) {
    %c0_i32 = arith.constant 0 : i32
    %c0_i32_0 = arith.constant 0 : i32
    %c0_i32_1 = arith.constant 0 : i32
    return %c0_i32, %c0_i32_0 : i32, i32
  }
  func.func @transform_5(%arg0: i32) -> (i32, i32) {
    %c0_i32 = arith.constant 0 : i32
    %c0_i32_0 = arith.constant 0 : i32
    %c0_i32_1 = arith.constant 0 : i32
    return %c0_i32, %c0_i32_0 : i32, i32
  }
  func.func @transform_6(%arg0: i32) -> (i32, i32) {
    %c0_i32 = arith.constant 0 : i32
    %c0_i32_0 = arith.constant 0 : i32
    %c0_i32_1 = arith.constant 0 : i32
    return %c0_i32, %c0_i32_0 : i32, i32
  }
  func.func @transform_7(%arg0: i32) -> (i32, i32) {
    %c0_i32 = arith.constant 0 : i32
    %c0_i32_0 = arith.constant 0 : i32
    %c0_i32_1 = arith.constant 0 : i32
    return %c0_i32, %c0_i32_0 : i32, i32
  }
  func.func @transform_8(%arg0: i32) -> (i32, i32, i32) {
    %c0_i32 = arith.constant 0 : i32
    %c0_i32_0 = arith.constant 0 : i32
    %c0_i32_1 = arith.constant 0 : i32
    %c0_i32_2 = arith.constant 0 : i32
    return %c0_i32, %c0_i32_0, %c0_i32_1 : i32, i32, i32
  }
}

</mosaic_0001>

<bundles_post_ra>
// kernel: tpu_custom_call.1
= control target key start
LH: loop header
LB: loop body
LE: loop exit
PB: predicated region body
PF: predicated region fallthrough
CT: control target
= control target key end

     0   :  { %13 = vsyncpa [#allocation3], 0  ;;  %s7922_s0 = inlined_call_operand.hbm [shape: f32[2,256,128], index: 0, kind: input, shape index: {}]   ;;  %s7923_s1 = inlined_call_operand.vmem [shape: f32[1,128], index: 1, kind: input, shape index: {}]   ;;  %s7924_s2 = inlined_call_operand.vmem [shape: f32[1,128], index: 2, kind: input, shape index: {}]   ;;  %s7925_s3 = inlined_call_operand.hbm [shape: f32[128,128], index: 3, kind: input, shape index: {}]   ;;  %s7926_s4 = inlined_call_operand.hbm [shape: bf16[128,384], index: 4, kind: input, shape index: {}]   ;;  %s7927_s5 = inlined_call_operand.vmem [shape: f32[1,384], index: 5, kind: input, shape index: {}]   ;;  %s7928_s6 = inlined_call_operand.hbm [shape: bf16[128,128], index: 6, kind: input, shape index: {}]   ;;  %s7929_s7 = inlined_call_operand.vmem [shape: f32[1,128], index: 7, kind: input, shape index: {}]   ;;  %s7930_s8 = inlined_call_operand.hbm [shape: f32[2,256,128], index: 8, kind: output, shape index: {}]  }
   0x1   :  { %14 = vsyncpa [#allocation6], 0 }
   0x2   :  { %15 = vsyncpa [#allocation9], 0 }
   0x3   :  { %16 = vsyncpa [#allocation4], 0  ;;  %s5771_s27 = smov [#allocation5]   ;;  %s5772_s29 = smov [#allocation2]  }
   0x4   :  { %s38_s28 = sshll.u32 %s5771_s27, 4  ;;  %s22_s30 = sshll.u32 %s5772_s29, 4  ;;  %s39_s28 = int_to_ptr.vmem [resolvable:$true] %s38_s28  ;;  %s5831_s30 = int_to_ptr.vmem [resolvable:$true] %s22_s30 }
   0x5   :  { %s5653_s11 = scalar_lea.hbm %s7925_s3, 2048 }
   0x6   :  { %p5654_p0 = scmp.ne.s32.totalorder %s7925_s3, %s5653_s11  ;;  %p5657_p1 = scmp.lt.u32.totalorder %s5653_s11, %s7925_s3 }
   0x8   :  { %p5659_p2 = pnand %p5657_p1, %p5654_p0 }
   0xa   :  { %5662 = shalt.err (!%p5659_p2)
}
   0xb   :  { %s5663_s16 = scalar_lea.vmem %s39_s28, 2048  ;;  %p5668_p4 = scmp.lt.s32.totalorder %s39_s28, %s39_s28 }
   0xc   :  { %p5664_p3 = scmp.ne.s32.totalorder %s39_s28, %s5663_s16  ;;  %p5669_p5 = scmp.lt.s32.totalorder %s5663_s16, %s5663_s16 }
   0xe   :  { %p5670_p6 = por %p5669_p5, %p5668_p4 }
  0x10   :  { %p5671_p7 = pnand %p5670_p6, %p5664_p3 }
  0x12   :  { %5674 = shalt.err (!%p5671_p7)
}
  0x13   :  { %s5773_s17 = smov 128   ;;  %s5774_s18 = smov 8  }
  0x14   :  { %44 = dma.hbm_to_vmem [thread:$0]  %s7925_s3, 2048, %s39_s28, [#allocation6], %s5773_s17, %s5773_s17, %s5774_s18  }
  0x15   :  { %s5675_s23 = scalar_lea.hbm %s7922_s0, 8192 }
  0x16   :  { %p5676_p8 = scmp.ne.s32.totalorder %s7922_s0, %s5675_s23  ;;  %p5679_p9 = scmp.lt.u32.totalorder %s5675_s23, %s7922_s0 }
  0x18   :  { %p5681_p10 = pnand %p5679_p9, %p5676_p8 }
  0x1a   :  { %5684 = shalt.err (!%p5681_p10)
}
  0x1b   :  { %s5685_s29 = scalar_lea.vmem %s5831_s30, 8192  ;;  %p5690_p12 = scmp.lt.s32.totalorder %s5831_s30, %s5831_s30 }
  0x1c   :  { %p5686_p11 = scmp.ne.s32.totalorder %s5831_s30, %s5685_s29  ;;  %p5691_p13 = scmp.lt.s32.totalorder %s5685_s29, %s5685_s29 }
  0x1e   :  { %p5692_p0 = por %p5691_p13, %p5690_p12 }
  0x20   :  { %p5693_p1 = pnand %p5692_p0, %p5686_p11 }
  0x22   :  { %5696 = shalt.err (!%p5693_p1)
}
  0x23   :  { %28 = dma.hbm_to_vmem [thread:$0]  %s7922_s0, 8192, %s5831_s30, [#allocation3], %s5773_s17, %s5773_s17, %s5774_s18  }
  0x24   :  { %s5775_s9 = smov [#allocation7]   ;;  %s5697_s13 = scalar_lea.hbm %s7926_s4, 3072 }
  0x25   :  { %s50_s10 = sshll.u32 %s5775_s9, 4  ;;  %p5698_p2 = scmp.ne.s32.totalorder %s7926_s4, %s5697_s13  ;;  %s51_s10 = int_to_ptr.vmem [resolvable:$true] %s50_s10 }
  0x26   :  { %p5701_p3 = scmp.lt.u32.totalorder %s5697_s13, %s7926_s4 }
  0x28   :  { %p5703_p4 = pnand %p5701_p3, %p5698_p2 }
  0x2a   :  { %5706 = shalt.err (!%p5703_p4)
}
  0x2b   :  { %s5707_s20 = scalar_lea.vmem %s51_s10, 3072  ;;  %p5712_p6 = scmp.lt.s32.totalorder %s51_s10, %s51_s10 }
  0x2c   :  { %p5708_p5 = scmp.ne.s32.totalorder %s51_s10, %s5707_s20  ;;  %p5713_p7 = scmp.lt.s32.totalorder %s5707_s20, %s5707_s20 }
  0x2e   :  { %p5714_p8 = por %p5713_p7, %p5712_p6 }
  0x30   :  { %p5715_p9 = pnand %p5714_p8, %p5708_p5 }
  0x32   :  { %5718 = shalt.err (!%p5715_p9)
}
  0x33   :  { %s5776_s0 = smov 192   ;;  %s5777_s30 = smov 12  }
  0x34   :  { %56 = dma.hbm_to_vmem [thread:$0]  %s7926_s4, 3072, %s51_s10, [#allocation6], %s5776_s0, %s5776_s0, %s5777_s30  }
  0x35   :  { %s5778_s23 = smov [#allocation8]   ;;  %s5719_s27 = scalar_lea.hbm %s7928_s6, 1024 }
  0x36   :  { %s64_s24 = sshll.u32 %s5778_s23, 4  ;;  %p5720_p10 = scmp.ne.s32.totalorder %s7928_s6, %s5719_s27  ;;  %s65_s24 = int_to_ptr.vmem [resolvable:$true] %s64_s24 }
  0x37   :  { %p5723_p11 = scmp.lt.u32.totalorder %s5719_s27, %s7928_s6 }
  0x39   :  { %p5725_p12 = pnand %p5723_p11, %p5720_p10 }
  0x3b   :  { %5728 = shalt.err (!%p5725_p12)
}
  0x3c   :  { %s5729_s11 = scalar_lea.vmem %s65_s24, 1024  ;;  %p5734_p0 = scmp.lt.s32.totalorder %s65_s24, %s65_s24 }
  0x3d   :  { %p5730_p13 = scmp.ne.s32.totalorder %s65_s24, %s5729_s11  ;;  %p5735_p1 = scmp.lt.s32.totalorder %s5729_s11, %s5729_s11 }
  0x3f   :  { %p5736_p2 = por %p5735_p1, %p5734_p0 }
  0x41   :  { %p5737_p3 = pnand %p5736_p2, %p5730_p13 }
  0x43   :  { %5740 = shalt.err (!%p5737_p3)
}
  0x44   :  { %s5779_s4 = smov 64   ;;  %s5780_s10 = smov 4  }
  0x45   :  { %70 = dma.hbm_to_vmem [thread:$0]  %s7928_s6, 1024, %s65_s24, [#allocation9], %s5779_s4, %s5779_s4, %s5780_s10  }
  0x46   :  { %5763 = dma.done.wait [#allocation3], 8192  }
  0x47   :  { %5764 = vsyncadd [#allocation3], 4294959104 }
  0x48   :  { %5765 = dma.done.wait [#allocation6], 5120  }
  0x49   :  { %5766 = vsyncadd [#allocation6], 4294962176 }
  0x4a   :  { %5767 = dma.done.wait [#allocation9], 1024  }
  0x4b   :  { %5768 = vsyncadd [#allocation9], 4294966272  ;;  %v7935_v0 = vmov 0.0|0.0   ;;  %vm5782_vm0 = vmmov 0   ;;  %v7933_v1 = vmov 0.0   ;;  %v88_v2 = vld [vmem:[#allocation5] sm:$0xff] }
  0x4c   :  { %4989 = vmatprep.subr.bf16.mxu0 %v7935_v0  ;;  %4689 = vmatprep.mubr.msk.f32.mxu0 %vm5782_vm0, %v7933_v1  ;;  %v89_v3 = vld [vmem:[#allocation5 + $0x8] sm:$0xff]  ;;  %v90_v4 = vld [vmem:[#allocation5 + $0x10] sm:$0xff]  ;;  %v91_v6 = vld [vmem:[#allocation5 + $0x18] sm:$0xff] }
  0x4d   :  { %5013 = vmatprep.subr.bf16.mxu1 %v7935_v0  ;;  %4724 = vmatprep.mubr.msk.f32.mxu1 %vm5782_vm0, %v7933_v1  ;;  %v5898_v5 = vpack.c.bf16 %v89_v3, %v88_v2  ;;  %v5901_v7 = vpack.c.bf16 %v91_v6, %v90_v4  ;;  %v92_v8 = vld [vmem:[#allocation5 + $0x20] sm:$0xff]  ;;  %v93_v9 = vld [vmem:[#allocation5 + $0x28] sm:$0xff]  ;;  %v5910_v12 = vld [vmem:[#allocation2 + $0x10] sm:$0xff] }
  0x4e   :  { %v5906_v10 = vld [vmem:[#allocation2] sm:$0xff]  ;;  %v5908_v11 = vld [vmem:[#allocation2 + $0x8] sm:$0xff]  ;;  %v5915_v14 = vpack.c.bf16 %v93_v9, %v92_v8  ;;  %v5917_v15 = vld [vmem:[#allocation2 + $0x18] sm:$0xff] }
  0x4f   :  { %4991 = vmatpush3.bf16.msra.mxu0 %v5898_v5  ;;  %5015 = vmatpush3.bf16.msra.mxu1 %v5898_v5  ;;  %v186_v13 = vadd.f32 %v5908_v11, %v5906_v10  ;;  %v94_v16 = vld [vmem:[#allocation5 + $0x30] sm:$0xff]  ;;  %v95_v17 = vld [vmem:[#allocation5 + $0x38] sm:$0xff]  ;;  %v5923_v19 = vld [vmem:[#allocation2 + $0x20] sm:$0xff] }
  0x50   :  { %4992 = vmatprep.subr.bf16.mxu0 %v7935_v0  ;;  %5016 = vmatprep.subr.bf16.mxu1 %v7935_v0  ;;  %v5927_v21 = vpack.c.bf16 %v95_v17, %v94_v16  ;;  %v5929_v22 = vld [vmem:[#allocation2 + $0x28] sm:$0xff]  ;;  %v96_v23 = vld [vmem:[#allocation5 + $0x40] sm:$0xff]  ;;  %v5935_v26 = vld [vmem:[#allocation2 + $0x30] sm:$0xff] }
  0x51   :  { %v187_v18 = vadd.f32 %v186_v13, %v5910_v12  ;;  %v97_v24 = vld [vmem:[#allocation5 + $0x48] sm:$0xff]  ;;  %v98_v27 = vld [vmem:[#allocation5 + $0x50] sm:$0xff]  ;;  %v99_v30 = vld [vmem:[#allocation5 + $0x58] sm:$0xff] }
  0x52   :  { %v5939_v29 = vpack.c.bf16 %v97_v24, %v96_v23  ;;  %v5941_v31 = vld [vmem:[#allocation2 + $0x38] sm:$0xff]  ;;  %v5943_v32 = vld [vmem:[#allocation2 + $0x40] sm:$0xff]  ;;  %v5949_v34 = vld [vmem:[#allocation2 + $0x48] sm:$0xff]  ;;  %v5953_v38 = vpack.c.bf16 %v99_v30, %v98_v27 }
  0x53   :  { %4994 = vmatpush3.bf16.msra.mxu0 %v5901_v7  ;;  %5018 = vmatpush3.bf16.msra.mxu1 %v5901_v7  ;;  %v188_v20 = vadd.f32 %v187_v18, %v5917_v15  ;;  %v100_v35 = vld [vmem:[#allocation5 + $0x60] sm:$0xff]  ;;  %v101_v36 = vld [vmem:[#allocation5 + $0x68] sm:$0xff]  ;;  %v5955_v39 = vld [vmem:[#allocation2 + $0x50] sm:$0xff] }
  0x54   :  { %4995 = vmatprep.subr.bf16.mxu0 %v7935_v0  ;;  %5019 = vmatprep.subr.bf16.mxu1 %v7935_v0  ;;  %v5961_v41 = vld [vmem:[#allocation2 + $0x58] sm:$0xff]  ;;  %v102_v42 = vld [vmem:[#allocation5 + $0x70] sm:$0xff]  ;;  %v5965_v45 = vpack.c.bf16 %v101_v36, %v100_v35  ;;  %v5967_v46 = vld [vmem:[#allocation2 + $0x60] sm:$0xff] }
  0x55   :  { %v189_v25 = vadd.f32 %v188_v20, %v5923_v19  ;;  %v103_v43 = vld [vmem:[#allocation5 + $0x78] sm:$0xff]  ;;  %v5973_v48 = vld [vmem:[#allocation2 + $0x68] sm:$0xff]  ;;  %v5979_v51 = vld [vmem:[#allocation2 + $0x70] sm:$0xff] }
  0x56   :  { %v5977_v50 = vpack.c.bf16 %v103_v43, %v102_v42  ;;  %v5985_v53 = vld [vmem:[#allocation2 + $0x78] sm:$0xff]  ;;  %v5991_v56 = vld [vmem:[#allocation2 + $0x80] sm:$0xff]  ;;  %v5994_v58 = vld [vmem:[#allocation2 + $0x88] sm:$0xff] }
  0x57   :  { %4997 = vmatpush3.bf16.msra.mxu0 %v5915_v14  ;;  %5021 = vmatpush3.bf16.msra.mxu1 %v5915_v14  ;;  %v190_v28 = vadd.f32 %v189_v25, %v5929_v22  ;;  %v5997_v60 = vld [vmem:[#allocation2 + $0x90] sm:$0xff]  ;;  %v6000_v62 = vld [vmem:[#allocation2 + $0x98] sm:$0xff]  ;;  %v6003_v2 = vld [vmem:[#allocation2 + $0xa0] sm:$0xff] }
  0x58   :  { %4998 = vmatprep.subr.bf16.mxu0 %v7935_v0  ;;  %5022 = vmatprep.subr.bf16.mxu1 %v7935_v0  ;;  %v6006_v4 = vld [vmem:[#allocation2 + $0xa8] sm:$0xff]  ;;  %v6009_v8 = vld [vmem:[#allocation2 + $0xb0] sm:$0xff]  ;;  %v6012_v13 = vld [vmem:[#allocation2 + $0xb8] sm:$0xff] }
  0x59   :  { %v191_v33 = vadd.f32 %v190_v28, %v5935_v26  ;;  %v6015_v17 = vld [vmem:[#allocation2 + $0xc0] sm:$0xff]  ;;  %v6018_v20 = vld [vmem:[#allocation2 + $0xc8] sm:$0xff]  ;;  %v6021_v24 = vld [vmem:[#allocation2 + $0xd0] sm:$0xff] }
  0x5a   :  { %v6024_v27 = vld [vmem:[#allocation2 + $0xd8] sm:$0xff]  ;;  %v6027_v30 = vld [vmem:[#allocation2 + $0xe0] sm:$0xff]  ;;  %v6030_v35 = vld [vmem:[#allocation2 + $0xe8] sm:$0xff] }
  0x5b   :  { %5000 = vmatpush3.bf16.msra.mxu0 %v5927_v21  ;;  %5024 = vmatpush3.bf16.msra.mxu1 %v5927_v21  ;;  %v192_v37 = vadd.f32 %v191_v33, %v5941_v31  ;;  %v6036_v42 = vld [vmem:[#allocation2 + $0xf8] sm:$0xff] }
  0x5c   :  { %5001 = vmatprep.subr.bf16.mxu0 %v7935_v0  ;;  %5025 = vmatprep.subr.bf16.mxu1 %v7935_v0 }
  0x5d   :  { %v193_v40 = vadd.f32 %v192_v37, %v5943_v32  ;;  %v6033_v37 = vld [vmem:[#allocation2 + $0xf0] sm:$0xff] }
  0x5f   :  { %5003 = vmatpush3.bf16.msra.mxu0 %v5939_v29  ;;  %5027 = vmatpush3.bf16.msra.mxu1 %v5939_v29  ;;  %v194_v44 = vadd.f32 %v193_v40, %v5949_v34 }
  0x60   :  { %5004 = vmatprep.subr.bf16.mxu0 %v7935_v0  ;;  %5028 = vmatprep.subr.bf16.mxu1 %v7935_v0 }
  0x61   :  { %v195_v47 = vadd.f32 %v194_v44, %v5955_v39 }
  0x63   :  { %5006 = vmatpush3.bf16.msra.mxu0 %v5953_v38  ;;  %5030 = vmatpush3.bf16.msra.mxu1 %v5953_v38  ;;  %v196_v49 = vadd.f32 %v195_v47, %v5961_v41 }
  0x64   :  { %5007 = vmatprep.subr.bf16.mxu0 %v7935_v0  ;;  %5031 = vmatprep.subr.bf16.mxu1 %v7935_v0 }
  0x65   :  { %v197_v52 = vadd.f32 %v196_v49, %v5967_v46 }
  0x67   :  { %5009 = vmatpush3.bf16.msra.mxu0 %v5965_v45  ;;  %5033 = vmatpush3.bf16.msra.mxu1 %v5965_v45  ;;  %v198_v54 = vadd.f32 %v197_v52, %v5973_v48 }
  0x68   :  { %5010 = vmatprep.subr.bf16.mxu0 %v7935_v0  ;;  %5034 = vmatprep.subr.bf16.mxu1 %v7935_v0 }
  0x69   :  { %v199_v55 = vadd.f32 %v198_v54, %v5979_v51 }
  0x6b   :  { %5012 = vmatpush3.bf16.msra.mxu0 %v5977_v50  ;;  %5036 = vmatpush3.bf16.msra.mxu1 %v5977_v50  ;;  %v200_v57 = vadd.f32 %v199_v55, %v5985_v53 }
  0x6d   :  { %v201_v59 = vadd.f32 %v200_v57, %v5991_v56 }
  0x6f   :  { %v202_v61 = vadd.f32 %v201_v59, %v5994_v58  ;;  %v5100_v59 = vld [vmem:[#allocation7] ss:$12 sps:$4 sm:$0xff]  }
  0x71   :  { %v203_v63 = vadd.f32 %v202_v61, %v5997_v60  ;;  %v5102_v61 = vld [vmem:[#allocation7 + $0x4] ss:$12 sps:$4 sm:$0xff]  }
  0x72   :  { %707 = vmatprep.subr.bf16.mxu0 %v5102_v61 }
  0x73   :  { %v204_v3 = vadd.f32 %v203_v63, %v6000_v62  ;;  %v6040_v63 = vld [vmem:[#allocation7 + $0x8] ss:$12 sps:$4 sm:$0xff]  }
  0x74   :  { %4727 = vmatprep.subr.bf16.mxu1 %v6040_v63 }
  0x75   :  { %v205_v6 = vadd.f32 %v204_v3, %v6003_v2  ;;  %v5106_v3 = vld [vmem:[#allocation7 + $0x1c] ss:$12 sps:$4 sm:$0xff]  }
  0x77   :  { %v206_v9 = vadd.f32 %v205_v6, %v6006_v4  ;;  %v5104_v6 = vld [vmem:[#allocation7 + $0x18] ss:$12 sps:$4 sm:$0xff]  }
  0x79   :  { %v207_v16 = vadd.f32 %v206_v9, %v6009_v8  ;;  %v294_v9 = vlaneseq }
  0x7b   :  { %v208_v18 = vadd.f32 %v207_v16, %v6012_v13 }
  0x7d   :  { %v209_v23 = vadd.f32 %v208_v18, %v6015_v17  ;;  %v6043_v18 = vshrl.u32 %v294_v9, 7 }
  0x7f   :  { %v210_v25 = vadd.f32 %v209_v23, %v6018_v20 }
  0x81   :  { %v211_v28 = vadd.f32 %v210_v25, %v6021_v24 }
  0x83   :  { %v212_v33 = vadd.f32 %v211_v28, %v6024_v27  ;;  %v6046_v28 = vsub.s32 0, %v6043_v18 }
  0x85   :  { %v213_v36 = vadd.f32 %v212_v33, %v6027_v30  ;;  %7983 = vst [vmem:[#allocation15_spill] sm:$0xff] %v6046_v28 }
  0x87   :  { %v214_v40 = vadd.f32 %v213_v36, %v6030_v35 }
  0x89   :  { %v215_v43 = vadd.f32 %v214_v40, %v6033_v37 }
  0x8b   :  { %v216_v44 = vadd.f32 %v215_v43, %v6036_v42 }
  0x8d   :  { %v217_v47 = vrot.slane %v216_v44, 4 }
  0x8f   :  { %v218_v49 = vadd.f32 %v217_v47, %v216_v44 }
  0x91   :  { %v219_v52 = vrot.slane %v218_v49, 2 }
  0x93   :  { %v220_v54 = vadd.f32 %v219_v52, %v218_v49 }
  0x95   :  { %v221_v55 = vrot.slane %v220_v54, 1 }
  0x97   :  { %v222_v57 = vadd.f32 %v221_v55, %v220_v54 }
  0x99   :  { %4690 = vmatmul.mubr.f32.vlgmr.msra.gmra.mrb[0].mxu0 %v222_v57 }
  0x9a   :  { %708 = vmatpush1.bf16.msra.mxu0 %v5100_v59 }
  0x9b   :  { %709 = vmatprep.subr.bf16.mxu0 %v5106_v3 }
  0x9e   :  { %710 = vmatpush1.bf16.msra.mxu0 %v5104_v6 }
 0x16c   :  { %v289_v16 = vpop.f32.mrb[0].mxu0 }
 0x16d   :  { %v4691_v23 = vpop.f32.mrb[1].mxu0  ;;  %v293_v25 = vmul.f32 0.00390625, %v289_v16 }
 0x16f   :  { %v6049_v33 = vrot.slane %v293_v25, %v6046_v28 }
 0x171   :  { %v6053_v36 = vsub.f32 %v5906_v10, %v6049_v33  ;;  %v6057_v40 = vsub.f32 %v5908_v11, %v6049_v33  ;;  %v6061_v43 = vsub.f32 %v5910_v12, %v6049_v33  ;;  %v6069_v49 = vsub.f32 %v5917_v15, %v6049_v33 }
 0x172   :  { %v6073_v10 = vsub.f32 %v5923_v19, %v6049_v33  ;;  %v6079_v12 = vsub.f32 %v5929_v22, %v6049_v33  ;;  %v6085_v15 = vsub.f32 %v5935_v26, %v6049_v33  ;;  %v6091_v59 = vsub.f32 %v5941_v31, %v6049_v33 }
 0x173   :  { %v330_v44 = vmul.f32 %v6053_v36, %v6053_v36  ;;  %v331_v47 = vmul.f32 %v6057_v40, %v6057_v40  ;;  %v332_v11 = vmul.f32 %v6061_v43, %v6061_v43  ;;  %v333_v54 = vmul.f32 %v6069_v49, %v6069_v49 }
 0x174   :  { %v334_v19 = vmul.f32 %v6073_v10, %v6073_v10  ;;  %v335_v22 = vmul.f32 %v6079_v12, %v6079_v12  ;;  %v6097_v3 = vsub.f32 %v5943_v32, %v6049_v33  ;;  %v336_v26 = vmul.f32 %v6085_v15, %v6085_v15 }
 0x175   :  { %v362_v52 = vadd.f32 %v331_v47, %v330_v44  ;;  %v6103_v9 = vsub.f32 %v5949_v34, %v6049_v33  ;;  %v337_v31 = vmul.f32 %v6091_v59, %v6091_v59  ;;  %v6109_v23 = vsub.f32 %v5955_v39, %v6049_v33 }
 0x176   :  { %v338_v32 = vmul.f32 %v6097_v3, %v6097_v3  ;;  %v6115_v44 = vsub.f32 %v5961_v41, %v6049_v33 }
 0x177   :  { %v363_v55 = vadd.f32 %v362_v52, %v332_v11  ;;  %v339_v34 = vmul.f32 %v6103_v9, %v6103_v9  ;;  %v6121_v11 = vsub.f32 %v5967_v46, %v6049_v33  ;;  %v340_v39 = vmul.f32 %v6109_v23, %v6109_v23 }
 0x178   :  { %v341_v41 = vmul.f32 %v6115_v44, %v6115_v44 }
 0x179   :  { %v364_v57 = vadd.f32 %v363_v55, %v333_v54  ;;  %v6127_v54 = vsub.f32 %v5973_v48, %v6049_v33  ;;  %v342_v46 = vmul.f32 %v6121_v11, %v6121_v11 }
 0x17b   :  { %v365_v61 = vadd.f32 %v364_v57, %v334_v19  ;;  %v6133_v19 = vsub.f32 %v5979_v51, %v6049_v33  ;;  %v343_v48 = vmul.f32 %v6127_v54, %v6127_v54 }
 0x17d   :  { %v366_v6 = vadd.f32 %v365_v61, %v335_v22  ;;  %v6139_v22 = vsub.f32 %v5985_v53, %v6049_v33  ;;  %v344_v51 = vmul.f32 %v6133_v19, %v6133_v19 }
 0x17f   :  { %v367_v16 = vadd.f32 %v366_v6, %v336_v26  ;;  %v6145_v26 = vsub.f32 %v5991_v56, %v6049_v33  ;;  %v345_v53 = vmul.f32 %v6139_v22, %v6139_v22 }
 0x181   :  { %v368_v25 = vadd.f32 %v367_v16, %v337_v31  ;;  %v6151_v31 = vsub.f32 %v5994_v58, %v6049_v33  ;;  %v346_v56 = vmul.f32 %v6145_v26, %v6145_v26 }
 0x183   :  { %v369_v47 = vadd.f32 %v368_v25, %v338_v32  ;;  %v6157_v32 = vsub.f32 %v5997_v60, %v6049_v33  ;;  %v347_v58 = vmul.f32 %v6151_v31, %v6151_v31 }
 0x185   :  { %v370_v52 = vadd.f32 %v369_v47, %v339_v34  ;;  %v6163_v34 = vsub.f32 %v6000_v62, %v6049_v33  ;;  %v348_v60 = vmul.f32 %v6157_v32, %v6157_v32 }
 0x187   :  { %v371_v55 = vadd.f32 %v370_v52, %v340_v39  ;;  %v6169_v39 = vsub.f32 %v6003_v2, %v6049_v33  ;;  %v349_v62 = vmul.f32 %v6163_v34, %v6163_v34 }
 0x189   :  { %v372_v57 = vadd.f32 %v371_v55, %v341_v41  ;;  %v6175_v41 = vsub.f32 %v6006_v4, %v6049_v33  ;;  %v350_v2 = vmul.f32 %v6169_v39, %v6169_v39 }
 0x18b   :  { %v373_v61 = vadd.f32 %v372_v57, %v342_v46  ;;  %v6181_v46 = vsub.f32 %v6009_v8, %v6049_v33  ;;  %v351_v4 = vmul.f32 %v6175_v41, %v6175_v41 }
 0x18d   :  { %v374_v6 = vadd.f32 %v373_v61, %v343_v48  ;;  %v6187_v48 = vsub.f32 %v6012_v13, %v6049_v33  ;;  %v352_v8 = vmul.f32 %v6181_v46, %v6181_v46 }
 0x18f   :  { %v375_v16 = vadd.f32 %v374_v6, %v344_v51  ;;  %v6193_v51 = vsub.f32 %v6015_v17, %v6049_v33  ;;  %v353_v13 = vmul.f32 %v6187_v48, %v6187_v48 }
 0x191   :  { %v376_v25 = vadd.f32 %v375_v16, %v345_v53  ;;  %v6199_v53 = vsub.f32 %v6018_v20, %v6049_v33  ;;  %v354_v17 = vmul.f32 %v6193_v51, %v6193_v51 }
 0x193   :  { %v377_v47 = vadd.f32 %v376_v25, %v346_v56  ;;  %v6205_v56 = vsub.f32 %v6021_v24, %v6049_v33  ;;  %v355_v20 = vmul.f32 %v6199_v53, %v6199_v53 }
 0x195   :  { %v378_v52 = vadd.f32 %v377_v47, %v347_v58  ;;  %v6211_v58 = vsub.f32 %v6024_v27, %v6049_v33  ;;  %v356_v24 = vmul.f32 %v6205_v56, %v6205_v56 }
 0x197   :  { %v379_v55 = vadd.f32 %v378_v52, %v348_v60  ;;  %v6217_v60 = vsub.f32 %v6027_v30, %v6049_v33  ;;  %v357_v27 = vmul.f32 %v6211_v58, %v6211_v58 }
 0x199   :  { %v380_v57 = vadd.f32 %v379_v55, %v349_v62  ;;  %v6223_v62 = vsub.f32 %v6030_v35, %v6049_v33  ;;  %v358_v30 = vmul.f32 %v6217_v60, %v6217_v60 }
 0x19b   :  { %v381_v61 = vadd.f32 %v380_v57, %v350_v2  ;;  %v6229_v2 = vsub.f32 %v6033_v37, %v6049_v33  ;;  %v359_v35 = vmul.f32 %v6223_v62, %v6223_v62 }
 0x19d   :  { %v382_v6 = vadd.f32 %v381_v61, %v351_v4  ;;  %v6235_v4 = vsub.f32 %v6036_v42, %v6049_v33  ;;  %v5107_v33 = vld [vmem:[#allocation7 + $0x20] ss:$12 sps:$4 sm:$0xff]  }
 0x19f   :  { %v383_v16 = vadd.f32 %v382_v6, %v352_v8  ;;  %v360_v8 = vmul.f32 %v6229_v2, %v6229_v2  ;;  %v361_v37 = vmul.f32 %v6235_v4, %v6235_v4 }
 0x1a1   :  { %v384_v25 = vadd.f32 %v383_v16, %v353_v13 }
 0x1a3   :  { %v385_v47 = vadd.f32 %v384_v25, %v354_v17 }
 0x1a5   :  { %v386_v52 = vadd.f32 %v385_v47, %v355_v20 }
 0x1a7   :  { %v387_v55 = vadd.f32 %v386_v52, %v356_v24  ;;  %v5110_v52 = vld [vmem:[#allocation7 + $0x34] ss:$12 sps:$4 sm:$0xff]  }
 0x1a8   :  { %711 = vmatprep.subr.bf16.mxu0 %v5110_v52 }
 0x1a9   :  { %v388_v57 = vadd.f32 %v387_v55, %v357_v27  ;;  %v5108_v27 = vld [vmem:[#allocation7 + $0x30] ss:$12 sps:$4 sm:$0xff]   ;;  %v5111_v55 = vld [vmem:[#allocation7 + $0x38] ss:$12 sps:$4 sm:$0xff]  }
 0x1aa   :  { %712 = vmatpush1.bf16.msra.mxu0 %v5108_v27 }
 0x1ab   :  { %v389_v61 = vadd.f32 %v388_v57, %v358_v30  ;;  %v5114_v30 = vld [vmem:[#allocation7 + $0x4c] ss:$12 sps:$4 sm:$0xff]   ;;  %v5112_v57 = vld [vmem:[#allocation7 + $0x48] ss:$12 sps:$4 sm:$0xff]  }
 0x1ac   :  { %713 = vmatprep.subr.bf16.mxu0 %v5114_v30  ;;  %v86_v30 = vld [vmem:[%s7923_s1] sm:$0x1] }
 0x1ad   :  { %v390_v6 = vadd.f32 %v389_v61, %v359_v35  ;;  %v5115_v35 = vld [vmem:[#allocation7 + $0x50] ss:$12 sps:$4 sm:$0xff]  }
 0x1ae   :  { %714 = vmatpush1.bf16.msra.mxu0 %v5112_v57  ;;  %v5118_v61 = vld [vmem:[#allocation7 + $0x64] ss:$12 sps:$4 sm:$0xff]  }
 0x1af   :  { %v391_v13 = vadd.f32 %v390_v6, %v360_v8  ;;  %v5116_v8 = vld [vmem:[#allocation7 + $0x60] ss:$12 sps:$4 sm:$0xff]   ;;  %v5119_v6 = vld [vmem:[#allocation7 + $0x68] ss:$12 sps:$4 sm:$0xff]   ;;  %715 = vmatprep.subr.bf16.mxu0 %v5118_v61 }
 0x1b1   :  { %v392_v16 = vadd.f32 %v391_v13, %v361_v37  ;;  %v5120_v37 = vld [vmem:[#allocation7 + $0x78] ss:$12 sps:$4 sm:$0xff]   ;;  %v5123_v13 = vld [vmem:[#allocation7 + $0x80] ss:$12 sps:$4 sm:$0xff]  }
 0x1b2   :  { %716 = vmatpush1.bf16.msra.mxu0 %v5116_v8  ;;  %v6254_v8 = vld [vmem:[%s7924_s2] ss:$0 sm:$0xff] }
 0x1b3   :  { %v393_v17 = vrot.slane %v392_v16, 4 }
 0x1b5   :  { %v394_v25 = vadd.f32 %v393_v17, %v392_v16  ;;  %v5126_v16 = vld [vmem:[#allocation7 + $0x94] ss:$12 sps:$4 sm:$0xff]   ;;  %v5124_v17 = vld [vmem:[#allocation7 + $0x90] ss:$12 sps:$4 sm:$0xff]  }
 0x1b7   :  { %v395_v20 = vrot.slane %v394_v25, 2 }
 0x1b9   :  { %v396_v47 = vadd.f32 %v395_v20, %v394_v25  ;;  %v5127_v25 = vld [vmem:[#allocation7 + $0x98] ss:$12 sps:$4 sm:$0xff]  }
 0x1ba   :  { %v5130_v20 = vld [vmem:[#allocation7 + $0xac] ss:$12 sps:$4 sm:$0xff]  }
 0x1bb   :  { %v397_v24 = vrot.slane %v396_v47, 1 }
 0x1bd   :  { %v398_v42 = vadd.f32 %v397_v24, %v396_v47  ;;  %v5131_v47 = vld [vmem:[#allocation7 + $0xb0] ss:$12 sps:$4 sm:$0xff]   ;;  %v5128_v24 = vld [vmem:[#allocation7 + $0xa8] ss:$12 sps:$4 sm:$0xff]  }
 0x1bf   :  { %4725 = vmatmul.mubr.f32.vlgmr.msra.gmra.mrb[0].mxu1 %v398_v42  ;;  %v7931_v42 = vmov 0  }
 0x1c0   :  { %4728 = vmatpush3.bf16.msra.mxu1 %v6040_v63  ;;  %v5122_v63 = vld [vmem:[#allocation7 + $0x7c] ss:$12 sps:$4 sm:$0xff]   ;;  %739 = vmatprep.mubr.bf16.mxu0 %v7931_v42 }
 0x1c1   :  { %4729 = vmatprep.subr.bf16.mxu1 %v5107_v33  ;;  %717 = vmatprep.subr.bf16.mxu0 %v5122_v63 }
 0x1c2   :  { %718 = vmatpush1.bf16.msra.mxu0 %v5120_v37 }
 0x1c3   :  { %719 = vmatprep.subr.bf16.mxu0 %v5126_v16 }
 0x1c4   :  { %4730 = vmatpush3.bf16.msra.mxu1 %v5107_v33 }
 0x1c5   :  { %4731 = vmatprep.subr.bf16.mxu1 %v5111_v55 }
 0x1c6   :  { %720 = vmatpush1.bf16.msra.mxu0 %v5124_v17 }
 0x1c7   :  { %721 = vmatprep.subr.bf16.mxu0 %v5130_v20 }
 0x1c8   :  { %4732 = vmatpush3.bf16.msra.mxu1 %v5111_v55 }
 0x1c9   :  { %4733 = vmatprep.subr.bf16.mxu1 %v5115_v35 }
 0x1ca   :  { %722 = vmatpush1.bf16.msra.mxu0 %v5128_v24 }
 0x1cc   :  { %4734 = vmatpush3.bf16.msra.mxu1 %v5115_v35 }
 0x1cd   :  { %4735 = vmatprep.subr.bf16.mxu1 %v5119_v6 }
 0x1d0   :  { %4736 = vmatpush3.bf16.msra.mxu1 %v5119_v6 }
 0x1d1   :  { %4737 = vmatprep.subr.bf16.mxu1 %v5123_v13 }
 0x1d4   :  { %4738 = vmatpush3.bf16.msra.mxu1 %v5123_v13 }
 0x1d5   :  { %4739 = vmatprep.subr.bf16.mxu1 %v5127_v25 }
 0x1d8   :  { %4740 = vmatpush3.bf16.msra.mxu1 %v5127_v25 }
 0x1d9   :  { %4741 = vmatprep.subr.bf16.mxu1 %v5131_v47 }
 0x1dc   :  { %4742 = vmatpush3.bf16.msra.mxu1 %v5131_v47 }
 0x292   :  { %v465_v33 = vpop.f32.mrb[0].mxu1 }
 0x293   :  { %v469_v52 = vmul.f32 0.00390625, %v465_v33  ;;  %v4726_v27 = vpop.f32.mrb[1].mxu1 }
 0x295   :  { %v470_v55 = vadd.f32 1e-05, %v469_v52 }
 0x297   :  { %5140 = vrsqrt.f32 %v470_v55 }
 0x2a1   :  { %v5141_v57 = vpop.eup %5140 }
 0x2a2   :  { %v472_v35 = vmul.f32 %v5141_v57, %v86_v30 }
 0x2a4   :  { %v6249_v61 = vrot.slane %v472_v35, %v6046_v28 }
 0x2a6   :  { %v477_v6 = vmul.f32 %v6249_v61, %v6053_v36  ;;  %v478_v63 = vmul.f32 %v6249_v61, %v6057_v40  ;;  %v479_v37 = vmul.f32 %v6249_v61, %v6061_v43  ;;  %v480_v13 = vmul.f32 %v6249_v61, %v6069_v49 }
 0x2a7   :  { %v481_v16 = vmul.f32 %v6249_v61, %v6073_v10  ;;  %v482_v17 = vmul.f32 %v6249_v61, %v6079_v12  ;;  %v483_v10 = vmul.f32 %v6249_v61, %v6085_v15  ;;  %v484_v12 = vmul.f32 %v6249_v61, %v6091_v59 }
 0x2a8   :  { %v515_v25 = vadd.f32 %v6254_v8, %v477_v6  ;;  %v516_v20 = vadd.f32 %v6254_v8, %v478_v63  ;;  %v517_v36 = vadd.f32 %v6254_v8, %v479_v37  ;;  %v518_v40 = vadd.f32 %v6254_v8, %v480_v13 }
 0x2a9   :  { %v519_v47 = vadd.f32 %v6254_v8, %v481_v16  ;;  %v520_v43 = vadd.f32 %v6254_v8, %v482_v17  ;;  %v485_v52 = vmul.f32 %v6249_v61, %v6097_v3  ;;  %v486_v27 = vmul.f32 %v6249_v61, %v6103_v9 }
 0x2aa   :  { %v547_v24 = vpack.c.bf16 %v516_v20, %v515_v25  ;;  %v548_v49 = vpack.c.bf16 %v518_v40, %v517_v36  ;;  %v521_v55 = vadd.f32 %v6254_v8, %v483_v10  ;;  %v522_v15 = vadd.f32 %v6254_v8, %v484_v12 }
 0x2ab   :  { %v549_v33 = vpack.c.bf16 %v520_v43, %v519_v47  ;;  %v523_v30 = vadd.f32 %v6254_v8, %v485_v52  ;;  %v524_v59 = vadd.f32 %v6254_v8, %v486_v27  ;;  %v487_v35 = vmul.f32 %v6249_v61, %v6109_v23 }
 0x2ac   :  { %740 = vmatmul.mubr.bf16.vlgmr.msra.gmra.mrb[4].mxu0 %v547_v24  ;;  %4743 = vmatprep.mubr.bf16.mxu1 %v547_v24  ;;  %v550_v57 = vpack.c.bf16 %v522_v15, %v521_v55  ;;  %v488_v3 = vmul.f32 %v6249_v61, %v6115_v44  ;;  %v489_v6 = vmul.f32 %v6249_v61, %v6121_v11 }
 0x2ad   :  { %4744 = vmatmul.mubr.bf16.vlgmr.msra.gmra.mrb[4].mxu1 %v548_v49  ;;  %749 = vmatprep.mubr.bf16.mxu0 %v7931_v42  ;;  %v551_v9 = vpack.c.bf16 %v524_v59, %v523_v30  ;;  %v490_v63 = vmul.f32 %v6249_v61, %v6127_v54  ;;  %v525_v37 = vadd.f32 %v6254_v8, %v487_v35 }
 0x2ae   :  { %4747 = vmatprep.mubr.bf16.mxu1 %v549_v33  ;;  %v526_v13 = vadd.f32 %v6254_v8, %v488_v3  ;;  %v527_v23 = vadd.f32 %v6254_v8, %v489_v6  ;;  %v491_v17 = vmul.f32 %v6249_v61, %v6133_v19  ;;  %v492_v11 = vmul.f32 %v6249_v61, %v6139_v22 }
 0x2af   :  { %v528_v44 = vadd.f32 %v6254_v8, %v490_v63  ;;  %v493_v25 = vmul.f32 %v6249_v61, %v6145_v26  ;;  %v494_v20 = vmul.f32 %v6249_v61, %v6151_v31  ;;  %v495_v43 = vmul.f32 %v6249_v61, %v6157_v32 }
 0x2b0   :  { %v552_v16 = vpack.c.bf16 %v526_v13, %v525_v37  ;;  %v529_v36 = vadd.f32 %v6254_v8, %v491_v17  ;;  %v530_v40 = vadd.f32 %v6254_v8, %v492_v11  ;;  %v496_v26 = vmul.f32 %v6249_v61, %v6163_v34 }
 0x2b1   :  { %v553_v54 = vpack.c.bf16 %v528_v44, %v527_v23  ;;  %v531_v19 = vadd.f32 %v6254_v8, %v493_v25  ;;  %v532_v22 = vadd.f32 %v6254_v8, %v494_v20  ;;  %v497_v24 = vmul.f32 %v6249_v61, %v6169_v39 }
 0x2b2   :  { %v554_v47 = vpack.c.bf16 %v530_v40, %v529_v36  ;;  %v533_v10 = vadd.f32 %v6254_v8, %v495_v43  ;;  %v534_v12 = vadd.f32 %v6254_v8, %v496_v26  ;;  %v499_v52 = vmul.f32 %v6249_v61, %v6181_v46 }
 0x2b3   :  { %v555_v31 = vpack.c.bf16 %v532_v22, %v531_v19  ;;  %v535_v32 = vadd.f32 %v6254_v8, %v497_v24  ;;  %v500_v39 = vmul.f32 %v6249_v61, %v6187_v48  ;;  %v501_v27 = vmul.f32 %v6249_v61, %v6193_v51 }
 0x2b4   :  { %750 = vmatmul.mubr.bf16.gmra.mrb[8].mxu0 %v548_v49  ;;  %v498_v49 = vmul.f32 %v6249_v61, %v6175_v41  ;;  %v502_v55 = vmul.f32 %v6249_v61, %v6199_v53  ;;  %v537_v15 = vadd.f32 %v6254_v8, %v499_v52  ;;  %v504_v51 = vmul.f32 %v6249_v61, %v6211_v58 }
 0x2b5   :  { %4748 = vmatmul.mubr.bf16.gmra.mrb[8].mxu1 %v550_v57  ;;  %759 = vmatprep.mubr.bf16.mxu0 %v7931_v42  ;;  %v538_v30 = vadd.f32 %v6254_v8, %v500_v39  ;;  %v539_v46 = vadd.f32 %v6254_v8, %v501_v27  ;;  %v505_v35 = vmul.f32 %v6249_v61, %v6217_v60 }
 0x2b6   :  { %4751 = vmatprep.mubr.bf16.mxu1 %v551_v9  ;;  %v536_v34 = vadd.f32 %v6254_v8, %v498_v49  ;;  %v540_v48 = vadd.f32 %v6254_v8, %v502_v55  ;;  %v506_v3 = vmul.f32 %v6249_v61, %v6223_v62  ;;  %v542_v6 = vadd.f32 %v6254_v8, %v504_v51 }
 0x2b7   :  { %v558_v59 = vpack.c.bf16 %v538_v30, %v537_v15  ;;  %v507_v37 = vmul.f32 %v6249_v61, %v6229_v2  ;;  %v508_v60 = vmul.f32 %v6249_v61, %v6235_v4  ;;  %v136_v2 = vld [vmem:[%s7927_s5] sm:$0x7]  ;;  %v570_v4 = vsub.s32 1, %v6043_v18 }
 0x2b8   :  { %v557_v41 = vpack.c.bf16 %v536_v34, %v535_v32  ;;  %v559_v53 = vpack.c.bf16 %v540_v48, %v539_v46  ;;  %v544_v58 = vadd.f32 %v6254_v8, %v506_v3 }
 0x2b9   :  { %v545_v13 = vadd.f32 %v6254_v8, %v507_v37  ;;  %v546_v23 = vadd.f32 %v6254_v8, %v508_v60 }
 0x2bb   :  { %v562_v44 = vpack.c.bf16 %v546_v23, %v545_v13 }
 0x2bc   :  { %760 = vmatmul.mubr.bf16.gmra.mrb[12].mxu0 %v549_v33  ;;  %v556_v33 = vpack.c.bf16 %v534_v12, %v533_v10 }
 0x2bd   :  { %4752 = vmatmul.mubr.bf16.gmra.mrb[12].mxu1 %v552_v16  ;;  %769 = vmatprep.mubr.bf16.mxu0 %v7931_v42 }
 0x2be   :  { %4755 = vmatprep.mubr.bf16.mxu1 %v553_v54 }
 0x2c4   :  { %770 = vmatmul.mubr.bf16.gmra.mrb[16].mxu0 %v550_v57  ;;  %v503_v57 = vmul.f32 %v6249_v61, %v6205_v56  ;;  %v543_v56 = vadd.f32 %v6254_v8, %v505_v35  ;;  %v574_v61 = vsub.s32 2, %v6043_v18 }
 0x2c5   :  { %4756 = vmatmul.mubr.bf16.gmra.mrb[16].mxu1 %v554_v47  ;;  %779 = vmatprep.mubr.bf16.mxu0 %v7931_v42 }
 0x2c6   :  { %4759 = vmatprep.mubr.bf16.mxu1 %v555_v31  ;;  %v561_v62 = vpack.c.bf16 %v544_v58, %v543_v56  ;;  %v6377_v17 = vrot.slane %v136_v2, %v574_v61 }
 0x2c8   :  { %7986 = vst [vmem:[#allocation18_spill] sm:$0xff] %v6377_v17 }
 0x2cc   :  { %780 = vmatmul.mubr.bf16.gmra.mrb[20].mxu0 %v551_v9  ;;  %v541_v9 = vadd.f32 %v6254_v8, %v503_v57  ;;  %v6373_v8 = vrot.slane %v136_v2, %v6046_v28 }
 0x2cd   :  { %4760 = vmatmul.mubr.bf16.gmra.mrb[20].mxu1 %v556_v33  ;;  %789 = vmatprep.mubr.bf16.mxu0 %v7931_v42 }
 0x2ce   :  { %4763 = vmatprep.mubr.bf16.mxu1 %v557_v41  ;;  %v560_v63 = vpack.c.bf16 %v542_v6, %v541_v9  ;;  %7984 = vst [vmem:[#allocation16_spill] sm:$0xff] %v6373_v8 }
 0x2d4   :  { %790 = vmatmul.mubr.bf16.gmra.mrb[24].mxu0 %v552_v16  ;;  %v6375_v16 = vrot.slane %v136_v2, %v570_v4 }
 0x2d5   :  { %4764 = vmatmul.mubr.bf16.gmra.mrb[24].mxu1 %v558_v59  ;;  %799 = vmatprep.mubr.bf16.mxu0 %v7931_v42 }
 0x2d6   :  { %4767 = vmatprep.mubr.bf16.mxu1 %v559_v53  ;;  %7985 = vst [vmem:[#allocation17_spill] sm:$0xff] %v6375_v16 }
 0x2dc   :  { %800 = vmatmul.mubr.bf16.gmra.mrb[28].mxu0 %v553_v54 }
 0x2dd   :  { %4768 = vmatmul.mubr.bf16.gmra.mrb[28].mxu1 %v560_v63  ;;  %809 = vmatprep.mubr.bf16.mxu0 %v7931_v42 }
 0x2de   :  { %4771 = vmatprep.mubr.bf16.mxu1 %v561_v62 }
 0x2e4   :  { %810 = vmatmul.mubr.bf16.gmra.mrb[32].mxu0 %v554_v47 }
 0x2e5   :  { %4772 = vmatmul.mubr.bf16.gmra.mrb[32].mxu1 %v562_v44  ;;  %819 = vmatprep.mubr.bf16.mxu0 %v7931_v42 }
 0x2ec   :  { %820 = vmatmul.mubr.bf16.gmra.mrb[36].mxu0 %v555_v31 }
 0x2ed   :  { %829 = vmatprep.mubr.bf16.mxu0 %v7931_v42 }
 0x2f4   :  { %830 = vmatmul.mubr.bf16.gmra.mrb[40].mxu0 %v556_v33 }
 0x2f5   :  { %839 = vmatprep.mubr.bf16.mxu0 %v7931_v42 }
 0x2fc   :  { %840 = vmatmul.mubr.bf16.gmra.mrb[44].mxu0 %v557_v41 }
 0x2fd   :  { %849 = vmatprep.mubr.bf16.mxu0 %v7931_v42 }
 0x304   :  { %850 = vmatmul.mubr.bf16.gmra.mrb[48].mxu0 %v558_v59 }
 0x305   :  { %859 = vmatprep.mubr.bf16.mxu0 %v7931_v42 }
 0x30c   :  { %860 = vmatmul.mubr.bf16.gmra.mrb[52].mxu0 %v559_v53 }
 0x30d   :  { %869 = vmatprep.mubr.bf16.mxu0 %v7931_v42 }
 0x314   :  { %870 = vmatmul.mubr.bf16.gmra.mrb[56].mxu0 %v560_v63 }
 0x315   :  { %879 = vmatprep.mubr.bf16.mxu0 %v7931_v42 }
 0x31c   :  { %880 = vmatmul.mubr.bf16.gmra.mrb[60].mxu0 %v561_v62 }
 0x31d   :  { %889 = vmatprep.mubr.bf16.mxu0 %v7931_v42 }
 0x324   :  { %890 = vmatmul.mubr.bf16.gmra.mrb[64].mxu0 %v562_v44 }
 0x37f   :  { %v741_v11 = vpop.f32.mrb[4].mxu0 }
 0x380   :  { %v743_v54 = vpop.f32.mrb[5].mxu0  ;;  %v4745_v25 = vpop.f32.mrb[4].mxu1  ;;  %v742_v40 = vadd.f32 %v741_v11, %v6373_v8 }
 0x381   :  { %v745_v20 = vpop.f32.mrb[6].mxu0  ;;  %v934_v36 = vpop.f32.mrb[5].mxu1  ;;  %v6382_v18 = vadd.f32 %v743_v54, %v6375_v16  ;;  %v6385_v43 = vadd.f32 %v4745_v25, %v6377_v17 }
 0x382   :  { %v746_v19 = vadd.f32 %v745_v20, %v6373_v8  ;;  %v747_v22 = vpop.f32.mrb[7].mxu0  ;;  %v4746_v47 = vpop.f32.mrb[6].mxu1  ;;  %v6394_v49 = vadd.f32 %v934_v36, %v6377_v17 }
 0x383   :  { %v6388_v26 = vadd.f32 %v747_v22, %v6375_v16  ;;  %v6391_v31 = vadd.f32 %v4746_v47, %v6377_v17  ;;  %v937_v24 = vpop.f32.mrb[7].mxu1 }
 0x384   :  { %v6397_v10 = vadd.f32 %v937_v24, %v6377_v17  ;;  %v6399_v12 = vpack.c.bf16 %v746_v19, %v742_v40 }
 0x385   :  { %v1094_v34 = vpack.c.bf16 %v6391_v31, %v6385_v43 }
 0x386   :  { %v1093_v33 = vpack.c.bf16 %v6397_v10, %v6394_v49  ;;  %4247 = vmatprep.mubr.bf16.mxu1 %v6399_v12 }
 0x387   :  { %v751_v52 = vpop.f32.mrb[8].mxu0 }
 0x388   :  { %v753_v39 = vpop.f32.mrb[9].mxu0  ;;  %v4749_v41 = vpop.f32.mrb[8].mxu1  ;;  %v752_v15 = vadd.f32 %v751_v52, %v6373_v8 }
 0x389   :  { %v755_v27 = vpop.f32.mrb[10].mxu0  ;;  %v950_v55 = vpop.f32.mrb[9].mxu1  ;;  %v6411_v59 = vadd.f32 %v753_v39, %v6375_v16  ;;  %v6414_v57 = vadd.f32 %v4749_v41, %v6377_v17 }
 0x38a   :  { %v756_v30 = vadd.f32 %v755_v27, %v6373_v8  ;;  %v757_v46 = vpop.f32.mrb[11].mxu0  ;;  %v4750_v48 = vpop.f32.mrb[10].mxu1  ;;  %v6425_v9 = vadd.f32 %v950_v55, %v6377_v17 }
 0x38b   :  { %v6417_v51 = vadd.f32 %v757_v46, %v6375_v16  ;;  %v6420_v53 = vadd.f32 %v4750_v48, %v6377_v17  ;;  %v953_v35 = vpop.f32.mrb[11].mxu1 }
 0x38c   :  { %v6422_v3 = vpack.c.bf16 %v756_v30, %v752_v15  ;;  %v6428_v6 = vadd.f32 %v953_v35, %v6377_v17 }
 0x38d   :  { %v1096_v58 = vpack.c.bf16 %v6420_v53, %v6414_v57 }
 0x38e   :  { %v1095_v63 = vpack.c.bf16 %v6428_v6, %v6425_v9 }
 0x38f   :  { %v761_v37 = vpop.f32.mrb[12].mxu0 }
 0x390   :  { %v763_v60 = vpop.f32.mrb[13].mxu0  ;;  %v4753_v62 = vpop.f32.mrb[12].mxu1  ;;  %v762_v44 = vadd.f32 %v761_v37, %v6373_v8 }
 0x391   :  { %v765_v13 = vpop.f32.mrb[14].mxu0  ;;  %v966_v23 = vpop.f32.mrb[13].mxu1  ;;  %v6439_v11 = vadd.f32 %v763_v60, %v6375_v16  ;;  %v6442_v54 = vadd.f32 %v4753_v62, %v6377_v17 }
 0x392   :  { %v766_v2 = vadd.f32 %v765_v13, %v6373_v8  ;;  %v767_v4 = vpop.f32.mrb[15].mxu0  ;;  %v4754_v61 = vpop.f32.mrb[14].mxu1  ;;  %v6453_v19 = vadd.f32 %v966_v23, %v6377_v17 }
 0x393   :  { %v6445_v25 = vadd.f32 %v767_v4, %v6375_v16  ;;  %v6448_v20 = vadd.f32 %v4754_v61, %v6377_v17  ;;  %v969_v36 = vpop.f32.mrb[15].mxu1 }
 0x394   :  { %v6450_v40 = vpack.c.bf16 %v766_v2, %v762_v44  ;;  %v6456_v22 = vadd.f32 %v969_v36, %v6377_v17 }
 0x397   :  { %v771_v39 = vpop.f32.mrb[16].mxu0 }
 0x398   :  { %v773_v41 = vpop.f32.mrb[17].mxu0  ;;  %v4757_v27 = vpop.f32.mrb[16].mxu1  ;;  %v772_v30 = vadd.f32 %v771_v39, %v6373_v8 }
 0x399   :  { %v775_v55 = vpop.f32.mrb[18].mxu0  ;;  %v982_v15 = vpop.f32.mrb[17].mxu1  ;;  %v6467_v37 = vadd.f32 %v773_v41, %v6375_v16  ;;  %v6470_v60 = vadd.f32 %v4757_v27, %v6377_v17 }
 0x39a   :  { %v776_v46 = vadd.f32 %v775_v55, %v6373_v8  ;;  %v777_v48 = vpop.f32.mrb[19].mxu0  ;;  %v4758_v35 = vpop.f32.mrb[18].mxu1  ;;  %v6481_v2 = vadd.f32 %v982_v15, %v6377_v17 }
 0x39b   :  { %v6473_v62 = vadd.f32 %v777_v48, %v6375_v16  ;;  %v6476_v13 = vadd.f32 %v4758_v35, %v6377_v17  ;;  %v985_v23 = vpop.f32.mrb[19].mxu1 }
 0x39c   :  { %v6478_v44 = vpack.c.bf16 %v776_v46, %v772_v30  ;;  %v6484_v4 = vadd.f32 %v985_v23, %v6377_v17 }
 0x39f   :  { %v781_v41 = vpop.f32.mrb[20].mxu0 }
 0x3a0   :  { %v783_v27 = vpop.f32.mrb[21].mxu0  ;;  %v4761_v55 = vpop.f32.mrb[20].mxu1  ;;  %v782_v15 = vadd.f32 %v781_v41, %v6373_v8 }
 0x3a1   :  { %v785_v30 = vpop.f32.mrb[22].mxu0  ;;  %v998_v46 = vpop.f32.mrb[21].mxu1  ;;  %v6495_v42 = vadd.f32 %v783_v27, %v6375_v16  ;;  %v1007_v1 = vadd.f32 %v4761_v55, %v6377_v17 }
 0x3a2   :  { %v786_v48 = vadd.f32 %v785_v30, %v6373_v8  ;;  %v787_v35 = vpop.f32.mrb[23].mxu0  ;;  %v4762_v23 = vpop.f32.mrb[22].mxu1  ;;  %v999_v0 = vadd.f32 %v998_v46, %v6377_v17 }
 0x3a3   :  { %v6499_v61 = vadd.f32 %v787_v35, %v6375_v16  ;;  %v1010_v47 = vadd.f32 %v4762_v23, %v6377_v17  ;;  %v1001_v56 = vpop.f32.mrb[23].mxu1 }
 0x3a4   :  { %v6502_v32 = vpack.c.bf16 %v786_v48, %v782_v15  ;;  %v1002_v41 = vadd.f32 %v1001_v56, %v6377_v17 }
 0x3a5   :  { %v1081_v30 = vpack.c.bf16 %v6499_v61, %v6495_v42  ;;  %v1102_v36 = vpack.c.bf16 %v1010_v47, %v1007_v1 }
 0x3a6   :  { %v1101_v27 = vpack.c.bf16 %v1002_v41, %v999_v0 }
 0x3a7   :  { %v791_v39 = vpop.f32.mrb[24].mxu0 }
 0x3a8   :  { %v793_v24 = vpop.f32.mrb[25].mxu0  ;;  %v4765_v55 = vpop.f32.mrb[24].mxu1  ;;  %4279 = vmatprep.subr.bf16.mxu0 %v1101_v27  ;;  %v792_v15 = vadd.f32 %v791_v39, %v6373_v8 }
 0x3a9   :  { %v795_v35 = vpop.f32.mrb[26].mxu0  ;;  %v1014_v52 = vpop.f32.mrb[25].mxu1  ;;  %4280 = vmatpush3.bf16.msra.mxu0 %v1093_v33  ;;  %v6514_v1 = vadd.f32 %v793_v24, %v6375_v16  ;;  %v1023_v0 = vadd.f32 %v4765_v55, %v6377_v17 }
 0x3aa   :  { %v796_v46 = vadd.f32 %v795_v35, %v6373_v8  ;;  %v797_v56 = vpop.f32.mrb[27].mxu0  ;;  %v4766_v48 = vpop.f32.mrb[26].mxu1  ;;  %4281 = vmatprep.subr.bf16.mxu0 %v1102_v36  ;;  %v1015_v10 = vadd.f32 %v1014_v52, %v6377_v17 }
 0x3ab   :  { %v6518_v47 = vadd.f32 %v797_v56, %v6375_v16  ;;  %v1026_v23 = vadd.f32 %v4766_v48, %v6377_v17  ;;  %v1017_v41 = vpop.f32.mrb[27].mxu1 }
 0x3ac   :  { %v6521_v49 = vpack.c.bf16 %v796_v46, %v792_v15  ;;  %v1018_v33 = vadd.f32 %v1017_v41, %v6377_v17 }
 0x3ad   :  { %v1082_v36 = vpack.c.bf16 %v6518_v47, %v6514_v1  ;;  %v1104_v39 = vpack.c.bf16 %v1026_v23, %v1023_v0  ;;  %4282 = vmatpush3.bf16.msra.mxu0 %v1094_v34 }
 0x3ae   :  { %v1103_v24 = vpack.c.bf16 %v1018_v33, %v1015_v10 }
 0x3af   :  { %v801_v27 = vpop.f32.mrb[28].mxu0 }
 0x3b0   :  { %v803_v55 = vpop.f32.mrb[29].mxu0  ;;  %v4769_v35 = vpop.f32.mrb[28].mxu1  ;;  %4283 = vmatprep.subr.bf16.mxu0 %v1103_v24  ;;  %v802_v52 = vadd.f32 %v801_v27, %v6373_v8 }
 0x3b1   :  { %v805_v56 = vpop.f32.mrb[30].mxu0  ;;  %v1030_v15 = vpop.f32.mrb[29].mxu1  ;;  %4284 = vmatpush3.bf16.msra.mxu0 %v1095_v63  ;;  %v6536_v43 = vadd.f32 %v803_v55, %v6375_v16  ;;  %v1039_v31 = vadd.f32 %v4769_v35, %v6377_v17 }
 0x3b2   :  { %v806_v46 = vadd.f32 %v805_v56, %v6373_v8  ;;  %v807_v48 = vpop.f32.mrb[31].mxu0  ;;  %v4770_v0 = vpop.f32.mrb[30].mxu1  ;;  %4285 = vmatprep.subr.bf16.mxu0 %v1104_v39  ;;  %v1031_v6 = vadd.f32 %v1030_v15, %v6377_v17  ;;  %v7987_v15 = vpack.c.bf16 %v6456_v22, %v6453_v19 }
 0x3b3   :  { %v6540_v34 = vadd.f32 %v807_v48, %v6375_v16  ;;  %v1042_v23 = vadd.f32 %v4770_v0, %v6377_v17  ;;  %v1033_v41 = vpop.f32.mrb[31].mxu1 }
 0x3b4   :  { %v6543_v9 = vpack.c.bf16 %v806_v46, %v802_v52  ;;  %v1034_v63 = vadd.f32 %v1033_v41, %v6377_v17 }
 0x3b5   :  { %v1083_v10 = vpack.c.bf16 %v6540_v34, %v6536_v43  ;;  %v1106_v33 = vpack.c.bf16 %v1042_v23, %v1039_v31  ;;  %4286 = vmatpush3.bf16.msra.mxu0 %v1096_v58 }
 0x3b6   :  { %v1105_v39 = vpack.c.bf16 %v1034_v63, %v1031_v6 }
 0x3b7   :  { %v811_v24 = vpop.f32.mrb[32].mxu0 }
 0x3b8   :  { %v813_v27 = vpop.f32.mrb[33].mxu0  ;;  %v4773_v55 = vpop.f32.mrb[32].mxu1  ;;  %4287 = vmatprep.subr.bf16.mxu0 %v1105_v39  ;;  %v812_v52 = vadd.f32 %v811_v24, %v6373_v8 }
 0x3b9   :  { %v815_v35 = vpop.f32.mrb[34].mxu0  ;;  %v1046_v56 = vpop.f32.mrb[33].mxu1  ;;  %4288 = vmatpush3.bf16.msra.mxu0 %v7987_v15  ;;  %v6558_v57 = vadd.f32 %v813_v27, %v6375_v16  ;;  %v1055_v53 = vadd.f32 %v4773_v55, %v6377_v17 }
 0x3ba   :  { %v816_v46 = vadd.f32 %v815_v35, %v6373_v8  ;;  %v817_v48 = vpop.f32.mrb[35].mxu0  ;;  %v4774_v0 = vpop.f32.mrb[34].mxu1  ;;  %4289 = vmatprep.subr.bf16.mxu0 %v1106_v33  ;;  %v1047_v22 = vadd.f32 %v1046_v56, %v6377_v17  ;;  %v7988_v33 = vpack.c.bf16 %v6448_v20, %v6442_v54  ;;  %v7989_v35 = vpack.c.bf16 %v6484_v4, %v6481_v2 }
 0x3bb   :  { %v6562_v58 = vadd.f32 %v817_v48, %v6375_v16  ;;  %v1058_v31 = vadd.f32 %v4774_v0, %v6377_v17  ;;  %v1049_v23 = vpop.f32.mrb[35].mxu1  ;;  %v7990_v0 = vpack.c.bf16 %v6476_v13, %v6470_v60 }
 0x3bc   :  { %v6565_v19 = vpack.c.bf16 %v816_v46, %v812_v52  ;;  %v1050_v41 = vadd.f32 %v1049_v23, %v6377_v17 }
 0x3bd   :  { %v1084_v6 = vpack.c.bf16 %v6562_v58, %v6558_v57  ;;  %v1108_v63 = vpack.c.bf16 %v1058_v31, %v1055_v53  ;;  %4290 = vmatpush3.bf16.msra.mxu0 %v7988_v33  ;;  %v7991_v53 = vmov 0.0|0.0   ;;  %v7992_v31 = vpack.c.bf16 %v6388_v26, %v6382_v18 }
 0x3be   :  { %v1107_v39 = vpack.c.bf16 %v1050_v41, %v1047_v22  ;;  %v7993_v18 = vpack.c.bf16 %v6417_v51, %v6411_v59  ;;  %v7994_v59 = vpack.c.bf16 %v6445_v25, %v6439_v11  ;;  %v7995_v11 = vpack.c.bf16 %v6473_v62, %v6467_v37 }
 0x3bf   :  { %v821_v24 = vpop.f32.mrb[36].mxu0 }
 0x3c0   :  { %v823_v27 = vpop.f32.mrb[37].mxu0  ;;  %4291 = vmatprep.subr.bf16.mxu0 %v1107_v39  ;;  %v822_v56 = vadd.f32 %v821_v24, %v6373_v8 }
 0x3c1   :  { %v825_v55 = vpop.f32.mrb[38].mxu0  ;;  %4292 = vmatpush3.bf16.msra.mxu0 %v7989_v35  ;;  %v824_v46 = vadd.f32 %v823_v27, %v6375_v16 }
 0x3c2   :  { %v826_v15 = vadd.f32 %v825_v55, %v6373_v8  ;;  %v827_v52 = vpop.f32.mrb[39].mxu0  ;;  %4293 = vmatprep.subr.bf16.mxu0 %v1108_v63 }
 0x3c3   :  { %v828_v54 = vadd.f32 %v827_v52, %v6375_v16 }
 0x3c4   :  { %v6581_v20 = vpack.c.bf16 %v826_v15, %v822_v56 }
 0x3c5   :  { %v1085_v48 = vpack.c.bf16 %v828_v54, %v824_v46  ;;  %4294 = vmatpush3.bf16.msra.mxu0 %v7990_v0 }
 0x3c6   :  { %5037 = vmatprep.subr.bf16.mxu0 %v7991_v53 }
 0x3c7   :  { %v831_v2 = vpop.f32.mrb[40].mxu0  ;;  %4231 = vmatprep.subr.bf16.mxu1 %v1085_v48 }
 0x3c8   :  { %v833_v4 = vpop.f32.mrb[41].mxu0  ;;  %4232 = vmatpush3.bf16.xpose.msra.mxu1 %v7992_v31  ;;  %v832_v22 = vadd.f32 %v831_v2, %v6373_v8 }
 0x3c9   :  { %v835_v23 = vpop.f32.mrb[42].mxu0  ;;  %v834_v33 = vadd.f32 %v833_v4, %v6375_v16 }
 0x3ca   :  { %v836_v41 = vadd.f32 %v835_v23, %v6373_v8  ;;  %v837_v63 = vpop.f32.mrb[43].mxu0 }
 0x3cb   :  { %v838_v60 = vadd.f32 %v837_v63, %v6375_v16 }
 0x3cc   :  { %v6594_v13 = vpack.c.bf16 %v836_v41, %v832_v22 }
 0x3cd   :  { %v1086_v39 = vpack.c.bf16 %v838_v60, %v834_v33 }
 0x3cf   :  { %v841_v24 = vpop.f32.mrb[44].mxu0  ;;  %4233 = vmatprep.subr.bf16.mxu1 %v1086_v39 }
 0x3d0   :  { %v843_v27 = vpop.f32.mrb[45].mxu0  ;;  %4234 = vmatpush3.bf16.xpose.msra.mxu1 %v7993_v18  ;;  %v842_v55 = vadd.f32 %v841_v24, %v6373_v8 }
 0x3d1   :  { %v845_v26 = vpop.f32.mrb[46].mxu0  ;;  %v844_v15 = vadd.f32 %v843_v27, %v6375_v16 }
 0x3d2   :  { %v846_v35 = vadd.f32 %v845_v26, %v6373_v8  ;;  %v847_v56 = vpop.f32.mrb[47].mxu0 }
 0x3d3   :  { %v848_v52 = vadd.f32 %v847_v56, %v6375_v16 }
 0x3d4   :  { %v6603_v46 = vpack.c.bf16 %v846_v35, %v842_v55 }
 0x3d5   :  { %v1087_v54 = vpack.c.bf16 %v848_v52, %v844_v15 }
 0x3d7   :  { %v851_v48 = vpop.f32.mrb[48].mxu0  ;;  %4235 = vmatprep.subr.bf16.mxu1 %v1087_v54 }
 0x3d8   :  { %v853_v0 = vpop.f32.mrb[49].mxu0  ;;  %4236 = vmatpush3.bf16.xpose.msra.mxu1 %v7994_v59  ;;  %v852_v2 = vadd.f32 %v851_v48, %v6373_v8 }
 0x3d9   :  { %v855_v51 = vpop.f32.mrb[50].mxu0  ;;  %v854_v23 = vadd.f32 %v853_v0, %v6375_v16 }
 0x3da   :  { %v856_v4 = vadd.f32 %v855_v51, %v6373_v8  ;;  %v857_v31 = vpop.f32.mrb[51].mxu0 }
 0x3db   :  { %v858_v22 = vadd.f32 %v857_v31, %v6375_v16 }
 0x3dc   :  { %v6612_v41 = vpack.c.bf16 %v856_v4, %v852_v2 }
 0x3dd   :  { %v1088_v63 = vpack.c.bf16 %v858_v22, %v854_v23 }
 0x3df   :  { %v861_v33 = vpop.f32.mrb[52].mxu0  ;;  %4237 = vmatprep.subr.bf16.mxu1 %v1088_v63 }
 0x3e0   :  { %v863_v60 = vpop.f32.mrb[53].mxu0  ;;  %4238 = vmatpush3.bf16.xpose.msra.mxu1 %v7995_v11  ;;  %v862_v39 = vadd.f32 %v861_v33, %v6373_v8 }
 0x3e1   :  { %v865_v25 = vpop.f32.mrb[54].mxu0  ;;  %v864_v18 = vadd.f32 %v863_v60, %v6375_v16 }
 0x3e2   :  { %v866_v24 = vadd.f32 %v865_v25, %v6373_v8  ;;  %v867_v27 = vpop.f32.mrb[55].mxu0 }
 0x3e3   :  { %v868_v26 = vadd.f32 %v867_v27, %v6375_v16 }
 0x3e4   :  { %v6621_v55 = vpack.c.bf16 %v866_v24, %v862_v39 }
 0x3e5   :  { %v1089_v35 = vpack.c.bf16 %v868_v26, %v864_v18 }
 0x3e7   :  { %v871_v56 = vpop.f32.mrb[56].mxu0  ;;  %4239 = vmatprep.subr.bf16.mxu1 %v1089_v35 }
 0x3e8   :  { %v873_v15 = vpop.f32.mrb[57].mxu0  ;;  %4240 = vmatpush3.bf16.xpose.msra.mxu1 %v1081_v30  ;;  %v872_v62 = vadd.f32 %v871_v56, %v6373_v8 }
 0x3e9   :  { %v875_v37 = vpop.f32.mrb[58].mxu0  ;;  %v874_v48 = vadd.f32 %v873_v15, %v6375_v16 }
 0x3ea   :  { %v876_v52 = vadd.f32 %v875_v37, %v6373_v8  ;;  %v877_v54 = vpop.f32.mrb[59].mxu0 }
 0x3eb   :  { %v878_v0 = vadd.f32 %v877_v54, %v6375_v16 }
 0x3ec   :  { %v1074_v59 = vpack.c.bf16 %v876_v52, %v872_v62 }
 0x3ed   :  { %v1090_v51 = vpack.c.bf16 %v878_v0, %v874_v48 }
 0x3ef   :  { %v881_v2 = vpop.f32.mrb[60].mxu0  ;;  %4241 = vmatprep.subr.bf16.mxu1 %v1090_v51 }
 0x3f0   :  { %v883_v4 = vpop.f32.mrb[61].mxu0  ;;  %4242 = vmatpush3.bf16.xpose.msra.mxu1 %v1082_v36  ;;  %v882_v61 = vadd.f32 %v881_v2, %v6373_v8 }
 0x3f1   :  { %v885_v42 = vpop.f32.mrb[62].mxu0  ;;  %v884_v23 = vadd.f32 %v883_v4, %v6375_v16 }
 0x3f2   :  { %v886_v30 = vadd.f32 %v885_v42, %v6373_v8  ;;  %v887_v31 = vpop.f32.mrb[63].mxu0 }
 0x3f3   :  { %v888_v22 = vadd.f32 %v887_v31, %v6375_v16 }
 0x3f4   :  { %v1075_v63 = vpack.c.bf16 %v886_v30, %v882_v61 }
 0x3f5   :  { %v1091_v33 = vpack.c.bf16 %v888_v22, %v884_v23 }
 0x3f7   :  { %v891_v60 = vpop.f32.mrb[64].mxu0  ;;  %4243 = vmatprep.subr.bf16.mxu1 %v1091_v33 }
 0x3f8   :  { %v893_v11 = vpop.f32.mrb[65].mxu0  ;;  %4244 = vmatpush3.bf16.xpose.msra.mxu1 %v1083_v10  ;;  %v892_v47 = vadd.f32 %v891_v60, %v6373_v8 }
 0x3f9   :  { %v895_v1 = vpop.f32.mrb[66].mxu0  ;;  %v894_v39 = vadd.f32 %v893_v11, %v6375_v16 }
 0x3fa   :  { %v896_v36 = vadd.f32 %v895_v1, %v6373_v8  ;;  %v897_v25 = vpop.f32.mrb[67].mxu0 }
 0x3fb   :  { %v898_v24 = vadd.f32 %v897_v25, %v6375_v16 }
 0x3fc   :  { %v1076_v27 = vpack.c.bf16 %v896_v36, %v892_v47 }
 0x3fd   :  { %v1092_v18 = vpack.c.bf16 %v898_v24, %v894_v39 }
 0x3ff   :  { %4245 = vmatprep.subr.bf16.mxu1 %v1092_v18 }
 0x400   :  { %4246 = vmatpush3.bf16.xpose.msra.mxu1 %v1084_v6 }
 0x407   :  { %4248 = vmatmul.mubr.bf16.vlgmr.msra.gmra.mrb[36].mxu1 %v6399_v12 }
 0x408   :  { %4249 = vmatprep.mubr.bf16.mxu1 %v6422_v3 }
 0x40f   :  { %4250 = vmatmul.mubr.bf16.gmra.mrb[40].mxu1 %v6422_v3 }
 0x410   :  { %4251 = vmatprep.mubr.bf16.mxu1 %v6450_v40 }
 0x417   :  { %4252 = vmatmul.mubr.bf16.gmra.mrb[44].mxu1 %v6450_v40 }
 0x418   :  { %4253 = vmatprep.mubr.bf16.mxu1 %v6478_v44 }
 0x41f   :  { %4254 = vmatmul.mubr.bf16.gmra.mrb[48].mxu1 %v6478_v44 }
 0x420   :  { %4255 = vmatprep.mubr.bf16.mxu1 %v6502_v32 }
 0x427   :  { %4256 = vmatmul.mubr.bf16.gmra.mrb[52].mxu1 %v6502_v32 }
 0x428   :  { %4257 = vmatprep.mubr.bf16.mxu1 %v6521_v49 }
 0x42f   :  { %4258 = vmatmul.mubr.bf16.gmra.mrb[56].mxu1 %v6521_v49 }
 0x430   :  { %4259 = vmatprep.mubr.bf16.mxu1 %v6543_v9 }
 0x437   :  { %4260 = vmatmul.mubr.bf16.gmra.mrb[60].mxu1 %v6543_v9 }
 0x438   :  { %4261 = vmatprep.mubr.bf16.mxu1 %v6565_v19 }
 0x43f   :  { %4262 = vmatmul.mubr.bf16.gmra.mrb[64].mxu1 %v6565_v19 }
 0x440   :  { %4263 = vmatprep.mubr.bf16.mxu1 %v6581_v20 }
 0x447   :  { %4264 = vmatmul.mubr.bf16.gmra.mrb[68].mxu1 %v6581_v20 }
 0x448   :  { %4265 = vmatprep.mubr.bf16.mxu1 %v6594_v13 }
 0x44f   :  { %4266 = vmatmul.mubr.bf16.gmra.mrb[72].mxu1 %v6594_v13 }
 0x450   :  { %4267 = vmatprep.mubr.bf16.mxu1 %v6603_v46 }
 0x457   :  { %4268 = vmatmul.mubr.bf16.gmra.mrb[76].mxu1 %v6603_v46 }
 0x458   :  { %4269 = vmatprep.mubr.bf16.mxu1 %v6612_v41 }
 0x45f   :  { %4270 = vmatmul.mubr.bf16.gmra.mrb[80].mxu1 %v6612_v41 }
 0x460   :  { %4271 = vmatprep.mubr.bf16.mxu1 %v6621_v55 }
 0x467   :  { %4272 = vmatmul.mubr.bf16.gmra.mrb[84].mxu1 %v6621_v55 }
 0x468   :  { %4273 = vmatprep.mubr.bf16.mxu1 %v1074_v59 }
 0x46f   :  { %4274 = vmatmul.mubr.bf16.gmra.mrb[88].mxu1 %v1074_v59 }
 0x470   :  { %4275 = vmatprep.mubr.bf16.mxu1 %v1075_v63 }
 0x477   :  { %4276 = vmatmul.mubr.bf16.gmra.mrb[92].mxu1 %v1075_v63 }
 0x478   :  { %4277 = vmatprep.mubr.bf16.mxu1 %v1076_v27 }
 0x47f   :  { %4278 = vmatmul.mubr.bf16.gmra.mrb[96].mxu1 %v1076_v27 }
 0x4da   :  { %v6672_v12 = vpop.f32.mrb[36].mxu1 }
 0x4db   :  { %v6674_v32 = vpop.f32.mrb[37].mxu1 }
 0x4dc   :  { %v6676_v3 = vpop.f32.mrb[38].mxu1  ;;  %v1302_v40 = vmax.f32 %v6672_v12, %v6674_v32 }
 0x4dd   :  { %v6680_v44 = vpop.f32.mrb[39].mxu1 }
 0x4de   :  { %1303 = vmax.xlane.f32.xlu0 %v1302_v40  ;;  %v1305_v49 = vmax.f32 %v6676_v3, %v6680_v44 }
 0x4e2   :  { %1306 = vmax.xlane.f32.xlu0 %v1305_v49  ;;  %v6684_v43 = vpop.f32.mrb[40].mxu1 }
 0x4e3   :  { %v6686_v34 = vpop.f32.mrb[41].mxu1 }
 0x4e4   :  { %v6688_v9 = vpop.f32.mrb[42].mxu1  ;;  %v1308_v10 = vmax.f32 %v6684_v43, %v6686_v34 }
 0x4e5   :  { %v6692_v57 = vpop.f32.mrb[43].mxu1 }
 0x4e6   :  { %1309 = vmax.xlane.f32.xlu1 %v1308_v10  ;;  %v1311_v58 = vmax.f32 %v6688_v9, %v6692_v57 }
 0x4ea   :  { %1312 = vmax.xlane.f32.xlu1 %v1311_v58  ;;  %v6696_v19 = vpop.f32.mrb[44].mxu1 }
 0x4eb   :  { %v6698_v6 = vpop.f32.mrb[45].mxu1 }
 0x4ec   :  { %v6700_v20 = vpop.f32.mrb[46].mxu1  ;;  %v1314_v13 = vmax.f32 %v6696_v19, %v6698_v6 }
 0x4ed   :  { %v6704_v46 = vpop.f32.mrb[47].mxu1 }
 0x4ee   :  { %1315 = vmax.xlane.f32.xlu0 %v1314_v13  ;;  %v1317_v41 = vmax.f32 %v6700_v20, %v6704_v46 }
 0x4f0   :  { %1318 = vmax.xlane.f32.xlu1 %v1317_v41 }
 0x4f2   :  { %v6708_v26 = vpop.f32.mrb[48].mxu1 }
 0x4f3   :  { %v6710_v55 = vpop.f32.mrb[49].mxu1 }
 0x4f4   :  { %v6712_v35 = vpop.f32.mrb[50].mxu1  ;;  %v1320_v56 = vmax.f32 %v6708_v26, %v6710_v55 }
 0x4f5   :  { %v6716_v15 = vpop.f32.mrb[51].mxu1 }
 0x4f6   :  { %1321 = vmax.xlane.f32.xlu0 %v1320_v56  ;;  %v1323_v37 = vmax.f32 %v6712_v35, %v6716_v15 }
 0x4f8   :  { %1324 = vmax.xlane.f32.xlu1 %v1323_v37 }
 0x4fa   :  { %v6720_v62 = vpop.f32.mrb[52].mxu1 }
 0x4fb   :  { %v6722_v52 = vpop.f32.mrb[53].mxu1 }
 0x4fc   :  { %v6724_v54 = vpop.f32.mrb[54].mxu1  ;;  %v1326_v48 = vmax.f32 %v6720_v62, %v6722_v52 }
 0x4fd   :  { %v6728_v0 = vpop.f32.mrb[55].mxu1 }
 0x4fe   :  { %1327 = vmax.xlane.f32.xlu0 %v1326_v48  ;;  %v1329_v59 = vmax.f32 %v6724_v54, %v6728_v0 }
 0x500   :  { %1330 = vmax.xlane.f32.xlu1 %v1329_v59 }
 0x502   :  { %v6732_v51 = vpop.f32.mrb[56].mxu1 }
 0x503   :  { %v6734_v2 = vpop.f32.mrb[57].mxu1 }
 0x504   :  { %v6736_v4 = vpop.f32.mrb[58].mxu1  ;;  %v1332_v42 = vmax.f32 %v6732_v51, %v6734_v2 }
 0x505   :  { %v6740_v61 = vpop.f32.mrb[59].mxu1 }
 0x506   :  { %1333 = vmax.xlane.f32.xlu0 %v1332_v42  ;;  %v1335_v30 = vmax.f32 %v6736_v4, %v6740_v61 }
 0x508   :  { %1336 = vmax.xlane.f32.xlu1 %v1335_v30 }
 0x50a   :  { %v6744_v31 = vpop.f32.mrb[60].mxu1 }
 0x50b   :  { %v6746_v23 = vpop.f32.mrb[61].mxu1 }
 0x50c   :  { %v6748_v22 = vpop.f32.mrb[62].mxu1  ;;  %v1338_v63 = vmax.f32 %v6744_v31, %v6746_v23 }
 0x50d   :  { %v6752_v33 = vpop.f32.mrb[63].mxu1 }
 0x50e   :  { %1339 = vmax.xlane.f32.xlu0 %v1338_v63  ;;  %v1341_v60 = vmax.f32 %v6748_v22, %v6752_v33 }
 0x510   :  { %1342 = vmax.xlane.f32.xlu1 %v1341_v60 }
 0x512   :  { %v6756_v11 = vpop.f32.mrb[64].mxu1 }
 0x513   :  { %v6758_v1 = vpop.f32.mrb[65].mxu1 }
 0x514   :  { %v6760_v47 = vpop.f32.mrb[66].mxu1  ;;  %v1344_v36 = vmax.f32 %v6756_v11, %v6758_v1 }
 0x515   :  { %v6764_v25 = vpop.f32.mrb[67].mxu1 }
 0x516   :  { %1345 = vmax.xlane.f32.xlu0 %v1344_v36  ;;  %v1347_v39 = vmax.f32 %v6760_v47, %v6764_v25 }
 0x518   :  { %1348 = vmax.xlane.f32.xlu1 %v1347_v39 }
 0x51a   :  { %v6768_v24 = vpop.f32.mrb[68].mxu1 }
 0x51b   :  { %v6770_v27 = vpop.f32.mrb[69].mxu1 }
 0x51c   :  { %v6772_v18 = vpop.f32.mrb[70].mxu1  ;;  %v1350_v40 = vmax.f32 %v6768_v24, %v6770_v27 }
 0x51d   :  { %v6776_v49 = vpop.f32.mrb[71].mxu1 }
 0x51e   :  { %1351 = vmax.xlane.f32.xlu0 %v1350_v40  ;;  %v1353_v10 = vmax.f32 %v6772_v18, %v6776_v49 }
 0x520   :  { %1354 = vmax.xlane.f32.xlu1 %v1353_v10 }
 0x522   :  { %v6780_v58 = vpop.f32.mrb[72].mxu1 }
 0x523   :  { %v6782_v13 = vpop.f32.mrb[73].mxu1 }
 0x524   :  { %v6784_v41 = vpop.f32.mrb[74].mxu1  ;;  %v1356_v56 = vmax.f32 %v6780_v58, %v6782_v13 }
 0x525   :  { %v6788_v37 = vpop.f32.mrb[75].mxu1 }
 0x526   :  { %7996 = vst [vmem:[#allocation19_spill] sm:$0xff] %v6788_v37  ;;  %1357 = vmax.xlane.f32.xlu0 %v1356_v56  ;;  %v1359_v48 = vmax.f32 %v6784_v41, %v6788_v37 }
 0x528   :  { %1360 = vmax.xlane.f32.xlu1 %v1359_v48 }
 0x52a   :  { %v6792_v59 = vpop.f32.mrb[76].mxu1 }
 0x52b   :  { %7997 = vst [vmem:[#allocation20_spill] sm:$0xff] %v6792_v59  ;;  %v6794_v42 = vpop.f32.mrb[77].mxu1 }
 0x52c   :  { %7998 = vst [vmem:[#allocation21_spill] sm:$0xff] %v6794_v42  ;;  %v6796_v30 = vpop.f32.mrb[78].mxu1  ;;  %v1362_v63 = vmax.f32 %v6792_v59, %v6794_v42 }
 0x52d   :  { %7999 = vst [vmem:[#allocation22_spill] sm:$0xff] %v6796_v30  ;;  %v6800_v60 = vpop.f32.mrb[79].mxu1 }
 0x52e   :  { %8000 = vst [vmem:[#allocation23_spill] sm:$0xff] %v6800_v60  ;;  %1363 = vmax.xlane.f32.xlu0 %v1362_v63  ;;  %v1365_v36 = vmax.f32 %v6796_v30, %v6800_v60 }
 0x530   :  { %1366 = vmax.xlane.f32.xlu1 %v1365_v36 }
 0x532   :  { %v6804_v39 = vpop.f32.mrb[80].mxu1 }
 0x533   :  { %8001 = vst [vmem:[#allocation24_spill] sm:$0xff] %v6804_v39  ;;  %v6806_v40 = vpop.f32.mrb[81].mxu1 }
 0x534   :  { %8002 = vst [vmem:[#allocation25_spill] sm:$0xff] %v6806_v40  ;;  %v6808_v10 = vpop.f32.mrb[82].mxu1  ;;  %v1368_v56 = vmax.f32 %v6804_v39, %v6806_v40 }
 0x535   :  { %8003 = vst [vmem:[#allocation26_spill] sm:$0xff] %v6808_v10  ;;  %v6812_v48 = vpop.f32.mrb[83].mxu1 }
 0x536   :  { %8004 = vst [vmem:[#allocation27_spill] sm:$0xff] %v6812_v48  ;;  %1369 = vmax.xlane.f32.xlu0 %v1368_v56  ;;  %v1371_v17 = vmax.f32 %v6808_v10, %v6812_v48 }
 0x538   :  { %1372 = vmax.xlane.f32.xlu1 %v1371_v17 }
 0x53a   :  { %v6816_v63 = vpop.f32.mrb[84].mxu1 }
 0x53b   :  { %8005 = vst [vmem:[#allocation28_spill] sm:$0xff] %v6816_v63  ;;  %v6818_v16 = vpop.f32.mrb[85].mxu1 }
 0x53c   :  { %8006 = vst [vmem:[#allocation29_spill] sm:$0xff] %v6818_v16  ;;  %v6820_v36 = vpop.f32.mrb[86].mxu1  ;;  %v1374_v8 = vmax.f32 %v6816_v63, %v6818_v16 }
 0x53d   :  { %8007 = vst [vmem:[#allocation30_spill] sm:$0xff] %v6820_v36  ;;  %v6824_v28 = vpop.f32.mrb[87].mxu1 }
 0x53e   :  { %8008 = vst [vmem:[#allocation31_spill] sm:$0xff] %v6824_v28  ;;  %1375 = vmax.xlane.f32.xlu0 %v1374_v8  ;;  %v1377_v40 = vmax.f32 %v6820_v36, %v6824_v28 }
 0x540   :  { %1378 = vmax.xlane.f32.xlu1 %v1377_v40 }
 0x542   :  { %v6828_v56 = vpop.f32.mrb[88].mxu1 }
 0x543   :  { %8009 = vst [vmem:[#allocation32_spill] sm:$0xff] %v6828_v56  ;;  %v6830_v48 = vpop.f32.mrb[89].mxu1 }
 0x544   :  { %8010 = vst [vmem:[#allocation33_spill] sm:$0xff] %v6830_v48  ;;  %v6832_v17 = vpop.f32.mrb[90].mxu1  ;;  %v1380_v10 = vmax.f32 %v6828_v56, %v6830_v48 }
 0x545   :  { %8011 = vst [vmem:[#allocation34_spill] sm:$0xff] %v6832_v17  ;;  %v6836_v39 = vpop.f32.mrb[91].mxu1 }
 0x546   :  { %8012 = vst [vmem:[#allocation35_spill] sm:$0xff] %v6836_v39  ;;  %1381 = vmax.xlane.f32.xlu0 %v1380_v10  ;;  %v1383_v16 = vmax.f32 %v6832_v17, %v6836_v39 }
 0x548   :  { %1384 = vmax.xlane.f32.xlu1 %v1383_v16 }
 0x54a   :  { %v6840_v8 = vpop.f32.mrb[92].mxu1 }
 0x54b   :  { %8013 = vst [vmem:[#allocation36_spill] sm:$0xff] %v6840_v8  ;;  %v6842_v28 = vpop.f32.mrb[93].mxu1 }
 0x54c   :  { %8014 = vst [vmem:[#allocation37_spill] sm:$0xff] %v6842_v28  ;;  %v6844_v40 = vpop.f32.mrb[94].mxu1  ;;  %v1386_v36 = vmax.f32 %v6840_v8, %v6842_v28  ;;  %v2240_v8 = vld [vmem:[#allocation2 + $0x108] sm:$0xff] }
 0x54d   :  { %8015 = vst [vmem:[#allocation38_spill] sm:$0xff] %v6844_v40  ;;  %v6848_v63 = vpop.f32.mrb[95].mxu1 }
 0x54e   :  { %8016 = vst [vmem:[#allocation39_spill] sm:$0xff] %v6848_v63  ;;  %1387 = vmax.xlane.f32.xlu0 %v1386_v36  ;;  %v1389_v48 = vmax.f32 %v6844_v40, %v6848_v63  ;;  %v2239_v40 = vld [vmem:[#allocation2 + $0x100] sm:$0xff] }
 0x54f   :  { %v2271_v59 = vadd.f32 %v2240_v8, %v2239_v40 }
 0x550   :  { %1390 = vmax.xlane.f32.xlu1 %v1389_v48 }
 0x552   :  { %v6852_v10 = vpop.f32.mrb[96].mxu1 }
 0x553   :  { %8017 = vst [vmem:[#allocation40_spill] sm:$0xff] %v6852_v10  ;;  %v6854_v39 = vpop.f32.mrb[97].mxu1 }
 0x554   :  { %8018 = vst [vmem:[#allocation41_spill] sm:$0xff] %v6854_v39  ;;  %v6856_v16 = vpop.f32.mrb[98].mxu1  ;;  %v1392_v17 = vmax.f32 %v6852_v10, %v6854_v39  ;;  %v2241_v10 = vld [vmem:[#allocation2 + $0x110] sm:$0xff] }
 0x555   :  { %8019 = vst [vmem:[#allocation42_spill] sm:$0xff] %v6856_v16  ;;  %v6860_v56 = vpop.f32.mrb[99].mxu1  ;;  %v2272_v37 = vadd.f32 %v2271_v59, %v2241_v10 }
 0x556   :  { %8020 = vst [vmem:[#allocation43_spill] sm:$0xff] %v6860_v56  ;;  %1393 = vmax.xlane.f32.xlu0 %v1392_v17  ;;  %v1395_v28 = vmax.f32 %v6856_v16, %v6860_v56 }
 0x558   :  { %1396 = vmax.xlane.f32.xlu1 %v1395_v28 }
 0x56b   :  { %v1304_v36 = vpop.xlane.xlu0 %1303 }
 0x56c   :  { %v1398_v63 = vsub.f32 %v6672_v12, %v1304_v36  ;;  %v1399_v48 = vsub.f32 %v6674_v32, %v1304_v36 }
 0x56e   :  { %v1462_v60 = vmul.f32 1.442695, %v1398_v63  ;;  %v1464_v30 = vmul.f32 1.442695, %v1399_v48  ;;  %v2242_v63 = vld [vmem:[#allocation2 + $0x118] sm:$0xff] }
 0x56f   :  { %v1307_v42 = vpop.xlane.xlu0 %1306  ;;  %v2273_v40 = vadd.f32 %v2272_v37, %v2242_v63  ;;  %v2244_v37 = vld [vmem:[#allocation2 + $0x128] sm:$0xff] }
 0x570   :  { %5142 = vpow2.f32 %v1462_v60  ;;  %v1400_v39 = vsub.f32 %v6676_v3, %v1307_v42  ;;  %v1401_v17 = vsub.f32 %v6680_v44, %v1307_v42  ;;  %v2243_v42 = vld [vmem:[#allocation2 + $0x120] sm:$0xff] }
 0x571   :  { %5144 = vpow2.f32 %v1464_v30  ;;  %v2274_v10 = vadd.f32 %v2273_v40, %v2243_v42 }
 0x572   :  { %v1466_v56 = vmul.f32 1.442695, %v1400_v39  ;;  %v1468_v28 = vmul.f32 1.442695, %v1401_v17 }
 0x573   :  { %v1310_v16 = vpop.xlane.xlu1 %1309 }
 0x574   :  { %5146 = vpow2.f32 %v1466_v56  ;;  %v1402_v12 = vsub.f32 %v6684_v43, %v1310_v16  ;;  %v1403_v32 = vsub.f32 %v6686_v34, %v1310_v16 }
 0x575   :  { %5148 = vpow2.f32 %v1468_v28 }
 0x576   :  { %v1470_v36 = vmul.f32 1.442695, %v1402_v12  ;;  %v1472_v8 = vmul.f32 1.442695, %v1403_v32 }
 0x577   :  { %v1313_v60 = vpop.xlane.xlu1 %1312 }
 0x578   :  { %5150 = vpow2.f32 %v1470_v36  ;;  %v1404_v3 = vsub.f32 %v6688_v9, %v1313_v60  ;;  %v1405_v44 = vsub.f32 %v6692_v57, %v1313_v60 }
 0x579   :  { %5152 = vpow2.f32 %v1472_v8  ;;  %v2275_v8 = vadd.f32 %v2274_v10, %v2244_v37 }
 0x57a   :  { %v5143_v30 = vpop.eup %5142  ;;  %v1474_v59 = vmul.f32 1.442695, %v1404_v3  ;;  %v1476_v39 = vmul.f32 1.442695, %v1405_v44 }
 0x57b   :  { %v5145_v56 = vpop.eup %5144  ;;  %v1316_v43 = vpop.xlane.xlu0 %1315 }
 0x57c   :  { %5154 = vpow2.f32 %v1474_v59  ;;  %v1406_v34 = vsub.f32 %v6696_v19, %v1316_v43  ;;  %v1407_v16 = vsub.f32 %v6698_v6, %v1316_v43  ;;  %v1590_v48 = vadd.f32 %v5145_v56, %v5143_v30  ;;  %v2245_v6 = vld [vmem:[#allocation2 + $0x130] sm:$0xff] }
 0x57d   :  { %5156 = vpow2.f32 %v1476_v39  ;;  %v1319_v17 = vpop.xlane.xlu1 %1318 }
 0x57e   :  { %v5147_v9 = vpop.eup %5146  ;;  %v1478_v28 = vmul.f32 1.442695, %v1406_v34  ;;  %v1480_v57 = vmul.f32 1.442695, %v1407_v16  ;;  %v1408_v12 = vsub.f32 %v6700_v20, %v1319_v17  ;;  %v1409_v32 = vsub.f32 %v6704_v46, %v1319_v17  ;;  %1591 = vadd.xlane.f32.xlu0 %v1590_v48 }
 0x57f   :  { %v5149_v63 = vpop.eup %5148  ;;  %v1686_v36 = vpack.c.bf16 %v5147_v9, %v5143_v30  ;;  %v2276_v46 = vadd.f32 %v2275_v8, %v2245_v6  ;;  %v2248_v6 = vld [vmem:[#allocation2 + $0x148] sm:$0xff] }
 0x580   :  { %5158 = vpow2.f32 %v1478_v28  ;;  %v1482_v60 = vmul.f32 1.442695, %v1408_v12  ;;  %v1484_v19 = vmul.f32 1.442695, %v1409_v32  ;;  %v1687_v40 = vpack.c.bf16 %v5149_v63, %v5145_v56  ;;  %v2246_v56 = vld [vmem:[#allocation2 + $0x138] sm:$0xff]  ;;  %v2247_v12 = vld [vmem:[#allocation2 + $0x140] sm:$0xff] }
 0x581   :  { %5160 = vpow2.f32 %v1480_v57  ;;  %v1593_v3 = vadd.f32 %v5149_v63, %v5147_v9  ;;  %v2277_v28 = vadd.f32 %v2276_v46, %v2246_v56 }
 0x582   :  { %v5151_v44 = vpop.eup %5150  ;;  %5162 = vpow2.f32 %v1482_v60  ;;  %1750 = vmatprep.mubr.bf16.mxu0 %v1687_v40 }
 0x583   :  { %v5153_v42 = vpop.eup %5152  ;;  %5164 = vpow2.f32 %v1484_v19  ;;  %1594 = vadd.xlane.f32.xlu1 %v1593_v3  ;;  %1751 = vmatmul.mubr.bf16.vlgmr.msra.gmra.mrb[68].mxu0 %v1686_v36  ;;  %v1322_v20 = vpop.xlane.xlu0 %1321  ;;  %v2278_v36 = vadd.f32 %v2277_v28, %v2247_v12  ;;  %v2250_v28 = vld [vmem:[#allocation2 + $0x158] sm:$0xff] }
 0x584   :  { %5039 = vmatpush3.bf16.msra.mxu0 %v5898_v5  ;;  %v1410_v30 = vsub.f32 %v6708_v26, %v1322_v20  ;;  %v1411_v59 = vsub.f32 %v6710_v55, %v1322_v20  ;;  %v1596_v39 = vadd.f32 %v5153_v42, %v5151_v44 }
 0x585   :  { %v1325_v43 = vpop.xlane.xlu1 %1324  ;;  %5040 = vmatprep.subr.bf16.mxu0 %v7991_v53  ;;  %v2279_v56 = vadd.f32 %v2278_v36, %v2248_v6 }
 0x586   :  { %v5155_v10 = vpop.eup %5154  ;;  %v1486_v34 = vmul.f32 1.442695, %v1410_v30  ;;  %v1488_v16 = vmul.f32 1.442695, %v1411_v59  ;;  %v1412_v48 = vsub.f32 %v6712_v35, %v1325_v43  ;;  %v1413_v37 = vsub.f32 %v6716_v15, %v1325_v43  ;;  %1597 = vadd.xlane.f32.xlu0 %v1596_v39 }
 0x587   :  { %v5157_v17 = vpop.eup %5156  ;;  %v1688_v9 = vpack.c.bf16 %v5155_v10, %v5151_v44 }
 0x588   :  { %5166 = vpow2.f32 %v1486_v34  ;;  %v1490_v26 = vmul.f32 1.442695, %v1412_v48  ;;  %v1492_v57 = vmul.f32 1.442695, %v1413_v37  ;;  %v1689_v55 = vpack.c.bf16 %v5157_v17, %v5153_v42  ;;  %5042 = vmatpush3.bf16.msra.mxu0 %v5901_v7 }
 0x589   :  { %5168 = vpow2.f32 %v1488_v16  ;;  %v1599_v32 = vadd.f32 %v5157_v17, %v5155_v10  ;;  %5043 = vmatprep.subr.bf16.mxu0 %v7991_v53  ;;  %v2249_v10 = vld [vmem:[#allocation2 + $0x150] sm:$0xff] }
 0x58a   :  { %v5159_v63 = vpop.eup %5158  ;;  %5170 = vpow2.f32 %v1490_v26  ;;  %1758 = vmatprep.mubr.bf16.mxu0 %v1689_v55  ;;  %v2280_v16 = vadd.f32 %v2279_v56, %v2249_v10 }
 0x58b   :  { %v5161_v35 = vpop.eup %5160  ;;  %5172 = vpow2.f32 %v1492_v57  ;;  %1600 = vadd.xlane.f32.xlu1 %v1599_v32  ;;  %1759 = vmatmul.mubr.bf16.gmra.mrb[72].mxu0 %v1688_v9  ;;  %v1328_v15 = vpop.xlane.xlu0 %1327 }
 0x58c   :  { %v5163_v8 = vpop.eup %5162  ;;  %v1414_v60 = vsub.f32 %v6720_v62, %v1328_v15  ;;  %v1415_v19 = vsub.f32 %v6722_v52, %v1328_v15  ;;  %v1602_v40 = vadd.f32 %v5161_v35, %v5159_v63  ;;  %5045 = vmatpush3.bf16.msra.mxu0 %v5915_v14  ;;  %v2281_v36 = vadd.f32 %v2280_v16, %v2250_v28  ;;  %v5528_v16 = vld [vmem:[#allocation7 + $0x4] ss:$12 sps:$4 sm:$0xff]  }
 0x58d   :  { %v5165_v3 = vpop.eup %5164  ;;  %v1331_v44 = vpop.xlane.xlu1 %1330  ;;  %v1690_v42 = vpack.c.bf16 %v5163_v8, %v5159_v63  ;;  %5046 = vmatprep.subr.bf16.mxu0 %v7991_v53 }
 0x58e   :  { %v1494_v20 = vmul.f32 1.442695, %v1414_v60  ;;  %v1496_v46 = vmul.f32 1.442695, %v1415_v19  ;;  %v1416_v30 = vsub.f32 %v6724_v54, %v1331_v44  ;;  %v1417_v59 = vsub.f32 %v6728_v0, %v1331_v44  ;;  %1603 = vadd.xlane.f32.xlu0 %v1602_v40  ;;  %v2251_v60 = vld [vmem:[#allocation2 + $0x160] sm:$0xff] }
 0x58f   :  { %v1691_v39 = vpack.c.bf16 %v5165_v3, %v5161_v35  ;;  %v1605_v62 = vadd.f32 %v5165_v3, %v5163_v8  ;;  %v2282_v40 = vadd.f32 %v2281_v36, %v2251_v60  ;;  %v2255_v60 = vld [vmem:[#allocation2 + $0x180] sm:$0xff] }
 0x590   :  { %5174 = vpow2.f32 %v1494_v20  ;;  %v1498_v52 = vmul.f32 1.442695, %v1416_v30  ;;  %v1500_v43 = vmul.f32 1.442695, %v1417_v59  ;;  %5048 = vmatpush3.bf16.msra.mxu0 %v5927_v21  ;;  %v2252_v20 = vld [vmem:[#allocation2 + $0x168] sm:$0xff] }
 0x591   :  { %5176 = vpow2.f32 %v1496_v46  ;;  %1766 = vmatprep.mubr.bf16.mxu0 %v1691_v39  ;;  %1606 = vadd.xlane.f32.xlu1 %v1605_v62  ;;  %v2283_v10 = vadd.f32 %v2282_v40, %v2252_v20 }
 0x592   :  { %v5167_v34 = vpop.eup %5166  ;;  %5178 = vpow2.f32 %v1498_v52  ;;  %5049 = vmatprep.subr.bf16.mxu0 %v7991_v53 }
 0x593   :  { %v5169_v54 = vpop.eup %5168  ;;  %5180 = vpow2.f32 %v1500_v43  ;;  %1767 = vmatmul.mubr.bf16.gmra.mrb[76].mxu0 %v1690_v42  ;;  %v1334_v0 = vpop.xlane.xlu0 %1333 }
 0x594   :  { %v5171_v48 = vpop.eup %5170  ;;  %v1418_v37 = vsub.f32 %v6732_v51, %v1334_v0  ;;  %v1419_v17 = vsub.f32 %v6734_v2, %v1334_v0  ;;  %v1608_v9 = vadd.f32 %v5169_v54, %v5167_v34  ;;  %5051 = vmatpush3.bf16.msra.mxu0 %v5939_v29 }
 0x595   :  { %v5173_v26 = vpop.eup %5172  ;;  %v1337_v57 = vpop.xlane.xlu1 %1336  ;;  %v1692_v55 = vpack.c.bf16 %v5171_v48, %v5167_v34  ;;  %5052 = vmatprep.subr.bf16.mxu0 %v7991_v53 }
 0x596   :  { %v1502_v12 = vmul.f32 1.442695, %v1418_v37  ;;  %v1504_v32 = vmul.f32 1.442695, %v1419_v17  ;;  %v1420_v63 = vsub.f32 %v6736_v4, %v1337_v57  ;;  %v1421_v35 = vsub.f32 %v6740_v61, %v1337_v57  ;;  %1609 = vadd.xlane.f32.xlu0 %v1608_v9 }
 0x597   :  { %v1693_v15 = vpack.c.bf16 %v5173_v26, %v5169_v54  ;;  %v1611_v51 = vadd.f32 %v5173_v26, %v5171_v48  ;;  %v2253_v54 = vld [vmem:[#allocation2 + $0x170] sm:$0xff]  ;;  %v2254_v26 = vld [vmem:[#allocation2 + $0x178] sm:$0xff] }
 0x598   :  { %5182 = vpow2.f32 %v1502_v12  ;;  %v1506_v2 = vmul.f32 1.442695, %v1420_v63  ;;  %v1508_v8 = vmul.f32 1.442695, %v1421_v35  ;;  %5054 = vmatpush3.bf16.msra.mxu0 %v5953_v38  ;;  %v2284_v48 = vadd.f32 %v2283_v10, %v2253_v54 }
 0x599   :  { %5184 = vpow2.f32 %v1504_v32  ;;  %1774 = vmatprep.mubr.bf16.mxu0 %v1693_v15  ;;  %1612 = vadd.xlane.f32.xlu1 %v1611_v51 }
 0x59a   :  { %v5175_v19 = vpop.eup %5174  ;;  %5186 = vpow2.f32 %v1506_v2  ;;  %5055 = vmatprep.subr.bf16.mxu0 %v7991_v53  ;;  %v2285_v2 = vadd.f32 %v2284_v48, %v2254_v26 }
 0x59b   :  { %v5177_v4 = vpop.eup %5176  ;;  %5188 = vpow2.f32 %v1508_v8  ;;  %1775 = vmatmul.mubr.bf16.gmra.mrb[80].mxu0 %v1692_v55  ;;  %v1340_v61 = vpop.xlane.xlu0 %1339 }
 0x59c   :  { %v5179_v6 = vpop.eup %5178  ;;  %v1422_v3 = vsub.f32 %v6744_v31, %v1340_v61  ;;  %v1423_v44 = vsub.f32 %v6746_v23, %v1340_v61  ;;  %v1614_v42 = vadd.f32 %v5177_v4, %v5175_v19  ;;  %5057 = vmatpush3.bf16.msra.mxu0 %v5965_v45 }
 0x59d   :  { %v5181_v46 = vpop.eup %5180  ;;  %v1343_v30 = vpop.xlane.xlu1 %1342  ;;  %v1694_v59 = vpack.c.bf16 %v5179_v6, %v5175_v19  ;;  %5058 = vmatprep.subr.bf16.mxu0 %v7991_v53 }
 0x59e   :  { %v1510_v39 = vmul.f32 1.442695, %v1422_v3  ;;  %v1512_v62 = vmul.f32 1.442695, %v1423_v44  ;;  %v1424_v56 = vsub.f32 %v6748_v22, %v1343_v30  ;;  %v1425_v52 = vsub.f32 %v6752_v33, %v1343_v30  ;;  %1615 = vadd.xlane.f32.xlu0 %v1614_v42  ;;  %v2256_v3 = vld [vmem:[#allocation2 + $0x188] sm:$0xff] }
 0x59f   :  { %v1695_v43 = vpack.c.bf16 %v5181_v46, %v5177_v4  ;;  %v1617_v31 = vadd.f32 %v5181_v46, %v5179_v6 }
 0x5a0   :  { %5190 = vpow2.f32 %v1510_v39  ;;  %v1514_v23 = vmul.f32 1.442695, %v1424_v56  ;;  %v1516_v34 = vmul.f32 1.442695, %v1425_v52  ;;  %5060 = vmatpush3.bf16.msra.mxu0 %v5977_v50 }
 0x5a1   :  { %5192 = vpow2.f32 %v1512_v62  ;;  %1782 = vmatprep.mubr.bf16.mxu0 %v1695_v43  ;;  %1618 = vadd.xlane.f32.xlu1 %v1617_v31  ;;  %v2257_v31 = vld [vmem:[#allocation2 + $0x190] sm:$0xff] }
 0x5a2   :  { %v5183_v0 = vpop.eup %5182  ;;  %5194 = vpow2.f32 %v1514_v23  ;;  %2642 = vmatprep.subr.bf16.mxu0 %v5528_v16  ;;  %v2258_v16 = vld [vmem:[#allocation2 + $0x198] sm:$0xff] }
 0x5a3   :  { %v5185_v22 = vpop.eup %5184  ;;  %5196 = vpow2.f32 %v1516_v34  ;;  %1783 = vmatmul.mubr.bf16.gmra.mrb[84].mxu0 %v1694_v59  ;;  %v1346_v33 = vpop.xlane.xlu0 %1345 }
 0x5a4   :  { %v5187_v37 = vpop.eup %5186  ;;  %v1426_v17 = vsub.f32 %v6756_v11, %v1346_v33  ;;  %v1427_v9 = vsub.f32 %v6758_v1, %v1346_v33  ;;  %v1620_v28 = vadd.f32 %v5185_v22, %v5183_v0 }
 0x5a5   :  { %v5189_v57 = vpop.eup %5188  ;;  %v1349_v55 = vpop.xlane.xlu1 %1348  ;;  %v1696_v12 = vpack.c.bf16 %v5187_v37, %v5183_v0 }
 0x5a6   :  { %v1518_v32 = vmul.f32 1.442695, %v1426_v17  ;;  %v1520_v63 = vmul.f32 1.442695, %v1427_v9  ;;  %v1428_v35 = vsub.f32 %v6760_v47, %v1349_v55  ;;  %v1429_v15 = vsub.f32 %v6764_v25, %v1349_v55  ;;  %1621 = vadd.xlane.f32.xlu0 %v1620_v28  ;;  %v8021_v28 = vld [vmem:[#allocation19_spill] sm:$0xff] }
 0x5a7   :  { %v1697_v51 = vpack.c.bf16 %v5189_v57, %v5185_v22  ;;  %v1623_v36 = vadd.f32 %v5189_v57, %v5187_v37  ;;  %v2286_v47 = vadd.f32 %v2285_v2, %v2255_v60 }
 0x5a8   :  { %5198 = vpow2.f32 %v1518_v32  ;;  %v1522_v8 = vmul.f32 1.442695, %v1428_v35  ;;  %v1524_v11 = vmul.f32 1.442695, %v1429_v15 }
 0x5a9   :  { %5200 = vpow2.f32 %v1520_v63  ;;  %1790 = vmatprep.mubr.bf16.mxu0 %v1697_v51  ;;  %1624 = vadd.xlane.f32.xlu1 %v1623_v36  ;;  %v2287_v52 = vadd.f32 %v2286_v47, %v2256_v3  ;;  %v2259_v63 = vld [vmem:[#allocation2 + $0x1a0] sm:$0xff]  ;;  %v8022_v36 = vld [vmem:[#allocation20_spill] sm:$0xff] }
 0x5aa   :  { %v5191_v1 = vpop.eup %5190  ;;  %5202 = vpow2.f32 %v1522_v8  ;;  %v8023_v8 = vld [vmem:[#allocation21_spill] sm:$0xff]  ;;  %v8025_v3 = vld [vmem:[#allocation23_spill] sm:$0xff] }
 0x5ab   :  { %v5193_v19 = vpop.eup %5192  ;;  %5204 = vpow2.f32 %v1524_v11  ;;  %1791 = vmatmul.mubr.bf16.gmra.mrb[88].mxu0 %v1696_v12  ;;  %v1352_v4 = vpop.xlane.xlu0 %1351 }
 0x5ac   :  { %v5195_v61 = vpop.eup %5194  ;;  %v1430_v25 = vsub.f32 %v6768_v24, %v1352_v4  ;;  %v1431_v40 = vsub.f32 %v6770_v27, %v1352_v4  ;;  %v1626_v6 = vadd.f32 %v5193_v19, %v5191_v1 }
 0x5ad   :  { %v5197_v44 = vpop.eup %5196  ;;  %v1355_v42 = vpop.xlane.xlu1 %1354  ;;  %v1698_v20 = vpack.c.bf16 %v5195_v61, %v5191_v1  ;;  %v2260_v1 = vld [vmem:[#allocation2 + $0x1a8] sm:$0xff] }
 0x5ae   :  { %v1526_v46 = vmul.f32 1.442695, %v1430_v25  ;;  %v1528_v30 = vmul.f32 1.442695, %v1431_v40  ;;  %v1432_v59 = vsub.f32 %v6772_v18, %v1355_v42  ;;  %v1433_v39 = vsub.f32 %v6776_v49, %v1355_v42  ;;  %1627 = vadd.xlane.f32.xlu0 %v1626_v6  ;;  %v8024_v40 = vld [vmem:[#allocation22_spill] sm:$0xff] }
 0x5af   :  { %v1699_v62 = vpack.c.bf16 %v5197_v44, %v5193_v19  ;;  %v1629_v56 = vadd.f32 %v5197_v44, %v5195_v61  ;;  %v2288_v18 = vadd.f32 %v2287_v52, %v2257_v31  ;;  %v8026_v31 = vld [vmem:[#allocation24_spill] sm:$0xff] }
 0x5b0   :  { %5206 = vpow2.f32 %v1526_v46  ;;  %v1530_v43 = vmul.f32 1.442695, %v1432_v59  ;;  %v1532_v24 = vmul.f32 1.442695, %v1433_v39  ;;  %v2261_v39 = vld [vmem:[#allocation2 + $0x1b0] sm:$0xff] }
 0x5b1   :  { %5208 = vpow2.f32 %v1528_v30  ;;  %1798 = vmatprep.mubr.bf16.mxu0 %v1699_v62  ;;  %1630 = vadd.xlane.f32.xlu1 %v1629_v56  ;;  %v2289_v12 = vadd.f32 %v2288_v18, %v2258_v16 }
 0x5b2   :  { %v5199_v27 = vpop.eup %5198  ;;  %5210 = vpow2.f32 %v1530_v43 }
 0x5b3   :  { %v5201_v10 = vpop.eup %5200  ;;  %5212 = vpow2.f32 %v1532_v24  ;;  %1799 = vmatmul.mubr.bf16.gmra.mrb[92].mxu0 %v1698_v20  ;;  %v1358_v23 = vpop.xlane.xlu0 %1357 }
 0x5b4   :  { %v5203_v34 = vpop.eup %5202  ;;  %v1434_v49 = vsub.f32 %v6780_v58, %v1358_v23  ;;  %v1435_v54 = vsub.f32 %v6782_v13, %v1358_v23  ;;  %v1632_v0 = vadd.f32 %v5201_v10, %v5199_v27 }
 0x5b5   :  { %v5205_v22 = vpop.eup %5204  ;;  %v1361_v33 = vpop.xlane.xlu1 %1360  ;;  %v1700_v48 = vpack.c.bf16 %v5203_v34, %v5199_v27 }
 0x5b6   :  { %v1534_v37 = vmul.f32 1.442695, %v1434_v49  ;;  %v1536_v17 = vmul.f32 1.442695, %v1435_v54  ;;  %v1436_v9 = vsub.f32 %v6784_v41, %v1361_v33  ;;  %v1437_v26 = vsub.f32 %v8021_v28, %v1361_v33  ;;  %1633 = vadd.xlane.f32.xlu0 %v1632_v0  ;;  %v8028_v33 = vld [vmem:[#allocation26_spill] sm:$0xff] }
 0x5b7   :  { %v1701_v57 = vpack.c.bf16 %v5205_v22, %v5201_v10  ;;  %v1635_v55 = vadd.f32 %v5205_v22, %v5203_v34  ;;  %v2290_v41 = vadd.f32 %v2289_v12, %v2259_v63  ;;  %v8027_v10 = vld [vmem:[#allocation25_spill] sm:$0xff]  ;;  %v2262_v34 = vld [vmem:[#allocation2 + $0x1b8] sm:$0xff] }
 0x5b8   :  { %5214 = vpow2.f32 %v1534_v37  ;;  %v1538_v32 = vmul.f32 1.442695, %v1436_v9  ;;  %v1540_v58 = vmul.f32 1.442695, %v1437_v26  ;;  %v8029_v37 = vld [vmem:[#allocation27_spill] sm:$0xff] }
 0x5b9   :  { %5216 = vpow2.f32 %v1536_v17  ;;  %1806 = vmatprep.mubr.bf16.mxu0 %v1701_v57  ;;  %1636 = vadd.xlane.f32.xlu1 %v1635_v55  ;;  %v2291_v46 = vadd.f32 %v2290_v41, %v2260_v1  ;;  %v5132_v57 = vld [vmem:[#allocation8] sm:$0xff]   ;;  %v8030_v41 = vld [vmem:[#allocation28_spill] sm:$0xff] }
 0x5ba   :  { %v5207_v13 = vpop.eup %5206  ;;  %5218 = vpow2.f32 %v1538_v32  ;;  %v2263_v32 = vld [vmem:[#allocation2 + $0x1c0] sm:$0xff]  ;;  %4775 = vmatprep.subr.bf16.mxu1 %v5132_v57 }
 0x5bb   :  { %v5209_v35 = vpop.eup %5208  ;;  %5220 = vpow2.f32 %v1540_v58  ;;  %1807 = vmatmul.mubr.bf16.gmra.mrb[96].mxu0 %v1700_v48  ;;  %v1364_v15 = vpop.xlane.xlu0 %1363  ;;  %v2292_v43 = vadd.f32 %v2291_v46, %v2261_v39  ;;  %4776 = vmatpush3.bf16.msra.mxu1 %v5132_v57  ;;  %v5134_v46 = vld [vmem:[#allocation8 + $0x10] sm:$0xff]  }
 0x5bc   :  { %v5211_v51 = vpop.eup %5210  ;;  %v1438_v2 = vsub.f32 %v8022_v36, %v1364_v15  ;;  %v1439_v11 = vsub.f32 %v8023_v8, %v1364_v15  ;;  %v1638_v60 = vadd.f32 %v5209_v35, %v5207_v13  ;;  %v8031_v36 = vld [vmem:[#allocation29_spill] sm:$0xff] }
 0x5bd   :  { %v5213_v19 = vpop.eup %5212  ;;  %v1367_v4 = vpop.xlane.xlu1 %1366  ;;  %v1702_v47 = vpack.c.bf16 %v5211_v51, %v5207_v13  ;;  %v2293_v26 = vadd.f32 %v2292_v43, %v2262_v34  ;;  %v6931_v39 = vld [vmem:[#allocation2 + $0x1d0] sm:$0xff]  ;;  %v6936_v34 = vld [vmem:[#allocation2 + $0x1d8] sm:$0xff] }
 0x5be   :  { %v1542_v61 = vmul.f32 1.442695, %v1438_v2  ;;  %v1544_v25 = vmul.f32 1.442695, %v1439_v11  ;;  %v1440_v6 = vsub.f32 %v8024_v40, %v1367_v4  ;;  %v1441_v44 = vsub.f32 %v8025_v3, %v1367_v4  ;;  %1639 = vadd.xlane.f32.xlu0 %v1638_v60  ;;  %v2264_v11 = vld [vmem:[#allocation2 + $0x1c8] sm:$0xff] }
 0x5bf   :  { %v1703_v42 = vpack.c.bf16 %v5213_v19, %v5209_v35  ;;  %v1641_v20 = vadd.f32 %v5213_v19, %v5211_v51  ;;  %v2294_v35 = vadd.f32 %v2293_v26, %v2263_v32  ;;  %v5133_v60 = vld [vmem:[#allocation8 + $0x8] sm:$0xff]   ;;  %v6941_v32 = vld [vmem:[#allocation2 + $0x1e0] sm:$0xff] }
 0x5c0   :  { %5222 = vpow2.f32 %v1542_v61  ;;  %v1546_v30 = vmul.f32 1.442695, %v1440_v6  ;;  %v1548_v59 = vmul.f32 1.442695, %v1441_v44  ;;  %v8033_v6 = vld [vmem:[#allocation31_spill] sm:$0xff]  ;;  %4777 = vmatprep.subr.bf16.mxu1 %v5133_v60 }
 0x5c1   :  { %5224 = vpow2.f32 %v1544_v25  ;;  %1814 = vmatprep.mubr.bf16.mxu0 %v1703_v42  ;;  %1642 = vadd.xlane.f32.xlu1 %v1641_v20  ;;  %v8032_v25 = vld [vmem:[#allocation30_spill] sm:$0xff]  ;;  %v2295_v20 = vadd.f32 %v2294_v35, %v2264_v11 }
 0x5c2   :  { %v5215_v62 = vpop.eup %5214  ;;  %5226 = vpow2.f32 %v1546_v30  ;;  %4778 = vmatpush3.bf16.msra.mxu1 %v5133_v60  ;;  %v6946_v60 = vld [vmem:[#allocation2 + $0x1e8] sm:$0xff] }
 0x5c3   :  { %v5217_v56 = vpop.eup %5216  ;;  %5228 = vpow2.f32 %v1548_v59  ;;  %1815 = vmatmul.mubr.bf16.gmra.mrb[100].mxu0 %v1702_v47  ;;  %v1370_v52 = vpop.xlane.xlu0 %1369  ;;  %4779 = vmatprep.subr.bf16.mxu1 %v5134_v46  ;;  %v2296_v43 = vadd.f32 %v2295_v20, %v6931_v39 }
 0x5c4   :  { %v5219_v24 = vpop.eup %5218  ;;  %v1442_v27 = vsub.f32 %v8026_v31, %v1370_v52  ;;  %v1443_v23 = vsub.f32 %v8027_v10, %v1370_v52  ;;  %v1644_v18 = vadd.f32 %v5217_v56, %v5215_v62  ;;  %v8034_v31 = vld [vmem:[#allocation32_spill] sm:$0xff]  ;;  %v8035_v10 = vld [vmem:[#allocation33_spill] sm:$0xff] }
 0x5c5   :  { %v5221_v49 = vpop.eup %5220  ;;  %v1373_v54 = vpop.xlane.xlu1 %1372  ;;  %v1704_v0 = vpack.c.bf16 %v5219_v24, %v5215_v62  ;;  %v2297_v57 = vadd.f32 %v2296_v43, %v6936_v34 }
 0x5c6   :  { %v1550_v16 = vmul.f32 1.442695, %v1442_v27  ;;  %v1552_v22 = vmul.f32 1.442695, %v1443_v23  ;;  %v1444_v48 = vsub.f32 %v8028_v33, %v1373_v54  ;;  %v1445_v17 = vsub.f32 %v8029_v37, %v1373_v54  ;;  %1645 = vadd.xlane.f32.xlu0 %v1644_v18  ;;  %4780 = vmatpush3.bf16.msra.mxu1 %v5134_v46 }
 0x5c7   :  { %v1705_v9 = vpack.c.bf16 %v5221_v49, %v5217_v56  ;;  %v1647_v28 = vadd.f32 %v5221_v49, %v5219_v24  ;;  %v5135_v49 = vld [vmem:[#allocation8 + $0x18] sm:$0xff]  }
 0x5c8   :  { %5230 = vpow2.f32 %v1550_v16  ;;  %v1554_v55 = vmul.f32 1.442695, %v1444_v48  ;;  %v1556_v12 = vmul.f32 1.442695, %v1445_v17  ;;  %v8036_v48 = vld [vmem:[#allocation34_spill] sm:$0xff]  ;;  %v8037_v17 = vld [vmem:[#allocation35_spill] sm:$0xff]  ;;  %4781 = vmatprep.subr.bf16.mxu1 %v5135_v49 }
 0x5c9   :  { %5232 = vpow2.f32 %v1552_v22  ;;  %1822 = vmatprep.mubr.bf16.mxu0 %v1705_v9  ;;  %1648 = vadd.xlane.f32.xlu1 %v1647_v28 }
 0x5ca   :  { %v5223_v58 = vpop.eup %5222  ;;  %5234 = vpow2.f32 %v1554_v55  ;;  %4782 = vmatpush3.bf16.msra.mxu1 %v5135_v49 }
 0x5cb   :  { %v5225_v63 = vpop.eup %5224  ;;  %5236 = vpow2.f32 %v1556_v12  ;;  %1823 = vmatmul.mubr.bf16.gmra.mrb[104].mxu0 %v1704_v0  ;;  %v1376_v13 = vpop.xlane.xlu0 %1375 }
 0x5cc   :  { %v5227_v15 = vpop.eup %5226  ;;  %v1446_v51 = vsub.f32 %v8030_v41, %v1376_v13  ;;  %v1447_v2 = vsub.f32 %v8031_v36, %v1376_v13  ;;  %v1650_v8 = vadd.f32 %v5225_v63, %v5223_v58 }
 0x5cd   :  { %v5229_v1 = vpop.eup %5228  ;;  %v1379_v19 = vpop.xlane.xlu1 %1378  ;;  %v1706_v4 = vpack.c.bf16 %v5227_v15, %v5223_v58 }
 0x5ce   :  { %v1558_v47 = vmul.f32 1.442695, %v1446_v51  ;;  %v1560_v61 = vmul.f32 1.442695, %v1447_v2  ;;  %v1448_v40 = vsub.f32 %v8032_v25, %v1379_v19  ;;  %v1449_v3 = vsub.f32 %v8033_v6, %v1379_v19  ;;  %1651 = vadd.xlane.f32.xlu0 %v1650_v8  ;;  %v8038_v51 = vld [vmem:[#allocation36_spill] sm:$0xff]  ;;  %v8039_v2 = vld [vmem:[#allocation37_spill] sm:$0xff] }
 0x5cf   :  { %v1707_v44 = vpack.c.bf16 %v5229_v1, %v5225_v63  ;;  %v1653_v42 = vadd.f32 %v5229_v1, %v5227_v15  ;;  %v5136_v63 = vld [vmem:[#allocation8 + $0x20] sm:$0xff]   ;;  %v2298_v15 = vadd.f32 %v2297_v57, %v6941_v32  ;;  %v5137_v1 = vld [vmem:[#allocation8 + $0x28] sm:$0xff]   ;;  %v5139_v57 = vld [vmem:[#allocation8 + $0x38] sm:$0xff]  }
 0x5d0   :  { %5238 = vpow2.f32 %v1558_v47  ;;  %v1562_v30 = vmul.f32 1.442695, %v1448_v40  ;;  %v1564_v59 = vmul.f32 1.442695, %v1449_v3  ;;  %4783 = vmatprep.subr.bf16.mxu1 %v5136_v63  ;;  %v8040_v40 = vld [vmem:[#allocation38_spill] sm:$0xff]  ;;  %v8041_v3 = vld [vmem:[#allocation39_spill] sm:$0xff] }
 0x5d1   :  { %5240 = vpow2.f32 %v1560_v61  ;;  %1830 = vmatprep.mubr.bf16.mxu0 %v1707_v44  ;;  %1654 = vadd.xlane.f32.xlu1 %v1653_v42  ;;  %v2299_v46 = vadd.f32 %v2298_v15, %v6946_v60 }
 0x5d2   :  { %v5231_v62 = vpop.eup %5230  ;;  %5242 = vpow2.f32 %v1562_v30  ;;  %4784 = vmatpush3.bf16.msra.mxu1 %v5136_v63 }
 0x5d3   :  { %v5233_v56 = vpop.eup %5232  ;;  %5244 = vpow2.f32 %v1564_v59  ;;  %1831 = vmatmul.mubr.bf16.gmra.mrb[108].mxu0 %v1706_v4  ;;  %v1382_v52 = vpop.xlane.xlu0 %1381  ;;  %4785 = vmatprep.subr.bf16.mxu1 %v5137_v1 }
 0x5d4   :  { %v5235_v24 = vpop.eup %5234  ;;  %v1450_v27 = vsub.f32 %v8034_v31, %v1382_v52  ;;  %v1451_v23 = vsub.f32 %v8035_v10, %v1382_v52  ;;  %v1656_v18 = vadd.f32 %v5233_v56, %v5231_v62  ;;  %v5138_v52 = vld [vmem:[#allocation8 + $0x30] sm:$0xff]   ;;  %v8042_v10 = vld [vmem:[#allocation40_spill] sm:$0xff] }
 0x5d5   :  { %v5237_v54 = vpop.eup %5236  ;;  %v1385_v0 = vpop.xlane.xlu1 %1384  ;;  %v1708_v16 = vpack.c.bf16 %v5235_v24, %v5231_v62  ;;  %v6951_v62 = vld [vmem:[#allocation2 + $0x1f0] sm:$0xff] }
 0x5d6   :  { %v1566_v22 = vmul.f32 1.442695, %v1450_v27  ;;  %v1568_v33 = vmul.f32 1.442695, %v1451_v23  ;;  %v1452_v37 = vsub.f32 %v8036_v48, %v1385_v0  ;;  %v1453_v9 = vsub.f32 %v8037_v17, %v1385_v0  ;;  %1657 = vadd.xlane.f32.xlu0 %v1656_v18  ;;  %4786 = vmatpush3.bf16.msra.mxu1 %v5137_v1  ;;  %v8043_v18 = vld [vmem:[#allocation41_spill] sm:$0xff]  ;;  %v6956_v0 = vld [vmem:[#allocation2 + $0x1f8] sm:$0xff] }
 0x5d7   :  { %v1709_v28 = vpack.c.bf16 %v5237_v54, %v5233_v56  ;;  %v1659_v26 = vadd.f32 %v5237_v54, %v5235_v24  ;;  %v2300_v31 = vadd.f32 %v2299_v46, %v6951_v62  ;;  %4787 = vmatprep.subr.bf16.mxu1 %v5138_v52  ;;  %v8044_v17 = vld [vmem:[#allocation42_spill] sm:$0xff] }
 0x5d8   :  { %5246 = vpow2.f32 %v1566_v22  ;;  %v1570_v55 = vmul.f32 1.442695, %v1452_v37  ;;  %v1572_v12 = vmul.f32 1.442695, %v1453_v9 }
 0x5d9   :  { %5248 = vpow2.f32 %v1568_v33  ;;  %1838 = vmatprep.mubr.bf16.mxu0 %v1709_v28  ;;  %1660 = vadd.xlane.f32.xlu1 %v1659_v26  ;;  %v8045_v28 = vld [vmem:[#allocation43_spill] sm:$0xff] }
 0x5da   :  { %v5239_v58 = vpop.eup %5238  ;;  %5250 = vpow2.f32 %v1570_v55  ;;  %4788 = vmatpush3.bf16.msra.mxu1 %v5138_v52  ;;  %v8047_v52 = vmov 0  }
 0x5db   :  { %v5241_v13 = vpop.eup %5240  ;;  %5252 = vpow2.f32 %v1572_v12  ;;  %1839 = vmatmul.mubr.bf16.gmra.mrb[112].mxu0 %v1708_v16  ;;  %v1388_v35 = vpop.xlane.xlu0 %1387  ;;  %4789 = vmatprep.subr.bf16.mxu1 %v5139_v57 }
 0x5dc   :  { %v5243_v41 = vpop.eup %5242  ;;  %v1454_v36 = vsub.f32 %v8038_v51, %v1388_v35  ;;  %v1455_v8 = vsub.f32 %v8039_v2, %v1388_v35  ;;  %v1662_v11 = vadd.f32 %v5241_v13, %v5239_v58 }
 0x5dd   :  { %v5245_v19 = vpop.eup %5244  ;;  %v1391_v4 = vpop.xlane.xlu1 %1390  ;;  %v1710_v47 = vpack.c.bf16 %v5243_v41, %v5239_v58  ;;  %v2301_v58 = vadd.f32 %v2300_v31, %v6956_v0  ;;  %v5532_v31 = vld [vmem:[#allocation7 + $0x34] ss:$12 sps:$4 sm:$0xff]  }
 0x5de   :  { %v1574_v61 = vmul.f32 1.442695, %v1454_v36  ;;  %v1576_v25 = vmul.f32 1.442695, %v1455_v8  ;;  %v1456_v6 = vsub.f32 %v8040_v40, %v1391_v4  ;;  %v1457_v44 = vsub.f32 %v8041_v3, %v1391_v4  ;;  %1663 = vadd.xlane.f32.xlu0 %v1662_v11  ;;  %4790 = vmatpush3.bf16.msra.mxu1 %v5139_v57 }
 0x5df   :  { %v1711_v42 = vpack.c.bf16 %v5245_v19, %v5241_v13  ;;  %v1665_v20 = vadd.f32 %v5245_v19, %v5243_v41  ;;  %v2302_v41 = vrot.slane %v2301_v58, 4  ;;  %5061 = vmatprep.subr.bf16.mxu1 %v7991_v53 }
 0x5e0   :  { %5254 = vpow2.f32 %v1574_v61  ;;  %v1578_v30 = vmul.f32 1.442695, %v1456_v6  ;;  %v1580_v59 = vmul.f32 1.442695, %v1457_v44 }
 0x5e1   :  { %5256 = vpow2.f32 %v1576_v25  ;;  %1846 = vmatprep.mubr.bf16.mxu0 %v1711_v42  ;;  %1666 = vadd.xlane.f32.xlu1 %v1665_v20  ;;  %v2303_v19 = vadd.f32 %v2302_v41, %v2301_v58 }
 0x5e2   :  { %v5247_v56 = vpop.eup %5246  ;;  %5258 = vpow2.f32 %v1578_v30  ;;  %v8046_v30 = vmov 0.0  }
 0x5e3   :  { %v5249_v43 = vpop.eup %5248  ;;  %5260 = vpow2.f32 %v1580_v59  ;;  %1847 = vmatmul.mubr.bf16.gmra.mrb[116].mxu0 %v1710_v47  ;;  %v1394_v24 = vpop.xlane.xlu0 %1393  ;;  %v2304_v61 = vrot.slane %v2303_v19, 2 }
 0x5e4   :  { %v5251_v27 = vpop.eup %5250  ;;  %v1458_v23 = vsub.f32 %v8042_v10, %v1394_v24  ;;  %v1459_v49 = vsub.f32 %v8043_v18, %v1394_v24  ;;  %v1668_v54 = vadd.f32 %v5249_v43, %v5247_v56  ;;  %v5531_v24 = vld [vmem:[#allocation7 + $0x18] ss:$12 sps:$4 sm:$0xff]  }
 0x5e5   :  { %v5253_v16 = vpop.eup %5252  ;;  %v1397_v22 = vpop.xlane.xlu1 %1396  ;;  %v1712_v33 = vpack.c.bf16 %v5251_v27, %v5247_v56  ;;  %v2305_v20 = vadd.f32 %v2304_v61, %v2303_v19  ;;  %v5529_v56 = vld [vmem:[#allocation7] ss:$12 sps:$4 sm:$0xff]   ;;  %v5536_v18 = vld [vmem:[#allocation7 + $0x64] ss:$12 sps:$4 sm:$0xff]  }
 0x5e6   :  { %v1582_v48 = vmul.f32 1.442695, %v1458_v23  ;;  %v1584_v37 = vmul.f32 1.442695, %v1459_v49  ;;  %1669 = vadd.xlane.f32.xlu0 %v1668_v54  ;;  %v1460_v9 = vsub.f32 %v8044_v17, %v1397_v22  ;;  %v1461_v26 = vsub.f32 %v8045_v28, %v1397_v22  ;;  %v5534_v10 = vld [vmem:[#allocation7 + $0x4c] ss:$12 sps:$4 sm:$0xff]  }
 0x5e7   :  { %v1713_v55 = vpack.c.bf16 %v5253_v16, %v5249_v43  ;;  %v1671_v12 = vadd.f32 %v5253_v16, %v5251_v27  ;;  %v2306_v46 = vrot.slane %v2305_v20, 1  ;;  %v5530_v43 = vld [vmem:[#allocation7 + $0x1c] ss:$12 sps:$4 sm:$0xff]   ;;  %v5537_v49 = vld [vmem:[#allocation7 + $0x60] ss:$12 sps:$4 sm:$0xff]  }
 0x5e8   :  { %5262 = vpow2.f32 %v1582_v48  ;;  %v1586_v63 = vmul.f32 1.442695, %v1460_v9  ;;  %v1588_v13 = vmul.f32 1.442695, %v1461_v26  ;;  %v5533_v27 = vld [vmem:[#allocation7 + $0x30] ss:$12 sps:$4 sm:$0xff]  }
 0x5e9   :  { %5264 = vpow2.f32 %v1584_v37  ;;  %1854 = vmatprep.mubr.bf16.mxu0 %v1713_v55  ;;  %1672 = vadd.xlane.f32.xlu1 %v1671_v12  ;;  %v2307_v59 = vadd.f32 %v2306_v46, %v2305_v20  ;;  %v5535_v23 = vld [vmem:[#allocation7 + $0x48] ss:$12 sps:$4 sm:$0xff]   ;;  %v5539_v16 = vld [vmem:[#allocation7 + $0x78] ss:$12 sps:$4 sm:$0xff]  }
 0x5ea   :  { %v5255_v35 = vpop.eup %5254  ;;  %5266 = vpow2.f32 %v1586_v63  ;;  %v5538_v54 = vld [vmem:[#allocation7 + $0x7c] ss:$12 sps:$4 sm:$0xff]   ;;  %v5540_v22 = vld [vmem:[#allocation7 + $0x94] ss:$12 sps:$4 sm:$0xff]   ;;  %v5542_v48 = vld [vmem:[#allocation7 + $0xac] ss:$12 sps:$4 sm:$0xff]  }
 0x5eb   :  { %v5257_v15 = vpop.eup %5256  ;;  %5268 = vpow2.f32 %v1588_v13  ;;  %1855 = vmatmul.mubr.bf16.gmra.mrb[120].mxu0 %v1712_v33  ;;  %v5541_v33 = vld [vmem:[#allocation7 + $0x90] ss:$12 sps:$4 sm:$0xff]   ;;  %v5543_v37 = vld [vmem:[#allocation7 + $0xa8] ss:$12 sps:$4 sm:$0xff]  }
 0x5ec   :  { %v5259_v51 = vpop.eup %5258  ;;  %v1674_v36 = vadd.f32 %v5257_v15, %v5255_v35 }
 0x5ed   :  { %v5261_v2 = vpop.eup %5260  ;;  %v1714_v8 = vpack.c.bf16 %v5259_v51, %v5255_v35 }
 0x5ee   :  { %1675 = vadd.xlane.f32.xlu0 %v1674_v36  ;;  %v1715_v11 = vpack.c.bf16 %v5261_v2, %v5257_v15  ;;  %v1677_v1 = vadd.f32 %v5261_v2, %v5259_v51 }
 0x5f0   :  { %1862 = vmatprep.mubr.bf16.mxu0 %v1715_v11  ;;  %1678 = vadd.xlane.f32.xlu1 %v1677_v1 }
 0x5f2   :  { %v5263_v4 = vpop.eup %5262 }
 0x5f3   :  { %v5265_v47 = vpop.eup %5264  ;;  %1863 = vmatmul.mubr.bf16.gmra.mrb[124].mxu0 %v1714_v8 }
 0x5f4   :  { %v5267_v25 = vpop.eup %5266  ;;  %v1680_v40 = vadd.f32 %v5265_v47, %v5263_v4 }
 0x5f5   :  { %v5269_v6 = vpop.eup %5268  ;;  %v1716_v3 = vpack.c.bf16 %v5267_v25, %v5263_v4 }
 0x5f6   :  { %1681 = vadd.xlane.f32.xlu0 %v1680_v40  ;;  %v1717_v44 = vpack.c.bf16 %v5269_v6, %v5265_v47  ;;  %v1683_v42 = vadd.f32 %v5269_v6, %v5267_v25 }
 0x5f8   :  { %1870 = vmatprep.mubr.bf16.mxu0 %v1717_v44  ;;  %1684 = vadd.xlane.f32.xlu1 %v1683_v42 }
 0x5fb   :  { %1871 = vmatmul.mubr.bf16.gmra.mrb[128].mxu0 %v1716_v3 }
 0x5fc   :  { %4855 = vmatprep.mubr.msk.f32.mxu0 %vm5782_vm0, %v8046_v30 }
 0x603   :  { %4856 = vmatmul.mubr.f32.vlgmr.msra.gmra.mrb[2].mxu0 %v2307_v59 }
 0x604   :  { %2643 = vmatpush1.bf16.msra.mxu0 %v5529_v56  ;;  %2674 = vmatprep.mubr.bf16.mxu0 %v8047_v52 }
 0x605   :  { %2644 = vmatprep.subr.bf16.mxu0 %v5530_v43 }
 0x608   :  { %2645 = vmatpush1.bf16.msra.mxu0 %v5531_v24 }
 0x609   :  { %2646 = vmatprep.subr.bf16.mxu0 %v5532_v31 }
 0x60b   :  { %v1592_v17 = vpop.xlane.xlu0 %1591 }
 0x60c   :  { %2647 = vmatpush1.bf16.msra.mxu0 %v5533_v27  ;;  %5270 = vrcp.f32 %v1592_v17 }
 0x60d   :  { %2648 = vmatprep.subr.bf16.mxu0 %v5534_v10 }
 0x610   :  { %2649 = vmatpush1.bf16.msra.mxu0 %v5535_v23  ;;  %v1595_v9 = vpop.xlane.xlu1 %1594 }
 0x611   :  { %2650 = vmatprep.subr.bf16.mxu0 %v5536_v18  ;;  %5272 = vrcp.f32 %v1595_v9 }
 0x613   :  { %v1598_v28 = vpop.xlane.xlu0 %1597 }
 0x614   :  { %2651 = vmatpush1.bf16.msra.mxu0 %v5537_v49  ;;  %5274 = vrcp.f32 %v1598_v28 }
 0x615   :  { %2652 = vmatprep.subr.bf16.mxu0 %v5538_v54 }
 0x616   :  { %v5271_v13 = vpop.eup %5270 }
 0x618   :  { %2653 = vmatpush1.bf16.msra.mxu0 %v5539_v16  ;;  %v1601_v26 = vpop.xlane.xlu1 %1600 }
 0x619   :  { %2654 = vmatprep.subr.bf16.mxu0 %v5540_v22  ;;  %5276 = vrcp.f32 %v1601_v26 }
 0x61b   :  { %v5273_v15 = vpop.eup %5272  ;;  %v1604_v36 = vpop.xlane.xlu0 %1603 }
 0x61c   :  { %2655 = vmatpush1.bf16.msra.mxu0 %v5541_v33  ;;  %5278 = vrcp.f32 %v1604_v36 }
 0x61d   :  { %2656 = vmatprep.subr.bf16.mxu0 %v5542_v48 }
 0x61e   :  { %v1607_v2 = vpop.xlane.xlu1 %1606  ;;  %v5275_v61 = vpop.eup %5274 }
 0x61f   :  { %5280 = vrcp.f32 %v1607_v2 }
 0x620   :  { %2657 = vmatpush1.bf16.msra.mxu0 %v5543_v37 }
 0x623   :  { %v5277_v40 = vpop.eup %5276  ;;  %v1610_v44 = vpop.xlane.xlu0 %1609 }
 0x624   :  { %5282 = vrcp.f32 %v1610_v44 }
 0x626   :  { %v1613_v42 = vpop.xlane.xlu1 %1612  ;;  %v5279_v31 = vpop.eup %5278 }
 0x627   :  { %5284 = vrcp.f32 %v1613_v42 }
 0x629   :  { %v5281_v10 = vpop.eup %5280 }
 0x62b   :  { %v1616_v49 = vpop.xlane.xlu0 %1615 }
 0x62c   :  { %5286 = vrcp.f32 %v1616_v49 }
 0x62e   :  { %v1619_v54 = vpop.xlane.xlu1 %1618  ;;  %v5283_v17 = vpop.eup %5282 }
 0x62f   :  { %5288 = vrcp.f32 %v1619_v54 }
 0x631   :  { %v5285_v28 = vpop.eup %5284 }
 0x656   :  { %v4295_v57 = vpop.f32.mrb[68].mxu0 }
 0x657   :  { %v4296_v55 = vpop.f32.mrb[69].mxu0 }
 0x658   :  { %v4297_v12 = vadd.f32 %v4296_v55, %v4295_v57  ;;  %v4298_v58 = vpop.f32.mrb[70].mxu0  ;;  %v1622_v57 = vpop.xlane.xlu0 %1621 }
 0x659   :  { %v4299_v63 = vpop.f32.mrb[71].mxu0  ;;  %v1625_v55 = vpop.xlane.xlu1 %1624  ;;  %5290 = vrcp.f32 %v1622_v57 }
 0x65a   :  { %v4300_v35 = vadd.f32 %v4299_v63, %v4298_v58  ;;  %v1911_v41 = vmul.f32 %v5271_v13, %v4297_v12  ;;  %5292 = vrcp.f32 %v1625_v55 }
 0x65c   :  { %v1912_v51 = vmul.f32 %v5273_v15, %v4300_v35  ;;  %v5287_v15 = vpop.eup %5286  ;;  %v1628_v2 = vpop.xlane.xlu0 %1627 }
 0x65d   :  { %5294 = vrcp.f32 %v1628_v2 }
 0x65e   :  { %v4301_v8 = vpop.f32.mrb[72].mxu0  ;;  %v1943_v11 = vpack.c.bf16 %v1912_v51, %v1911_v41  ;;  %v5289_v51 = vpop.eup %5288 }
 0x65f   :  { %v4302_v1 = vpop.f32.mrb[73].mxu0 }
 0x660   :  { %v4303_v19 = vadd.f32 %v4302_v1, %v4301_v8  ;;  %v4304_v4 = vpop.f32.mrb[74].mxu0  ;;  %4791 = vmatprep.mubr.bf16.mxu1 %v1943_v11  ;;  %v1631_v8 = vpop.xlane.xlu1 %1630 }
 0x661   :  { %v4305_v47 = vpop.f32.mrb[75].mxu0  ;;  %5296 = vrcp.f32 %v1631_v8 }
 0x662   :  { %v4306_v25 = vadd.f32 %v4305_v47, %v4304_v4  ;;  %v1913_v6 = vmul.f32 %v5275_v61, %v4303_v19 }
 0x663   :  { %v5291_v61 = vpop.eup %5290 }
 0x664   :  { %v1914_v3 = vmul.f32 %v5277_v40, %v4306_v25  ;;  %v5293_v40 = vpop.eup %5292  ;;  %v1637_v44 = vpop.xlane.xlu1 %1636 }
 0x666   :  { %v1944_v20 = vpack.c.bf16 %v1914_v3, %v1913_v6  ;;  %v4307_v46 = vpop.f32.mrb[76].mxu0  ;;  %v1634_v3 = vpop.xlane.xlu0 %1633 }
 0x667   :  { %v4308_v59 = vpop.f32.mrb[77].mxu0  ;;  %5298 = vrcp.f32 %v1634_v3 }
 0x668   :  { %v4309_v56 = vadd.f32 %v4308_v59, %v4307_v46  ;;  %v4310_v43 = vpop.f32.mrb[78].mxu0  ;;  %4792 = vmatmul.mubr.bf16.vlgmr.msra.gmra.mrb[100].mxu1 %v1944_v20  ;;  %v6980_v46 = vld [vmem:[#allocation7 + $0x8] ss:$12 sps:$4 sm:$0xff]   ;;  %5300 = vrcp.f32 %v1637_v44 }
 0x669   :  { %v4311_v24 = vpop.f32.mrb[79].mxu0  ;;  %5063 = vmatpush3.bf16.msra.mxu1 %v5898_v5 }
 0x66a   :  { %v4312_v27 = vadd.f32 %v4311_v24, %v4310_v43  ;;  %5064 = vmatprep.subr.bf16.mxu1 %v7991_v53  ;;  %v1915_v23 = vmul.f32 %v5279_v31, %v4309_v56  ;;  %v5295_v43 = vpop.eup %5294 }
 0x66b   :  { %v5297_v31 = vpop.eup %5296 }
 0x66c   :  { %v1916_v18 = vmul.f32 %v5281_v10, %v4312_v27 }
 0x66d   :  { %5066 = vmatpush3.bf16.msra.mxu1 %v5901_v7 }
 0x66e   :  { %v4313_v16 = vpop.f32.mrb[80].mxu0  ;;  %v1945_v22 = vpack.c.bf16 %v1916_v18, %v1915_v23  ;;  %5067 = vmatprep.subr.bf16.mxu1 %v7991_v53  ;;  %v1643_v23 = vpop.xlane.xlu1 %1642 }
 0x66f   :  { %v4314_v33 = vpop.f32.mrb[81].mxu0 }
 0x670   :  { %v4315_v48 = vadd.f32 %v4314_v33, %v4313_v16  ;;  %v4316_v37 = vpop.f32.mrb[82].mxu0  ;;  %4795 = vmatprep.mubr.bf16.mxu1 %v1945_v22 }
 0x671   :  { %v4317_v5 = vpop.f32.mrb[83].mxu0  ;;  %5069 = vmatpush3.bf16.msra.mxu1 %v5915_v14 }
 0x672   :  { %v4318_v9 = vadd.f32 %v4317_v5, %v4316_v37  ;;  %5070 = vmatprep.subr.bf16.mxu1 %v7991_v53  ;;  %v1917_v7 = vmul.f32 %v5283_v17, %v4315_v48  ;;  %v5299_v48 = vpop.eup %5298 }
 0x673   :  { %v5301_v5 = vpop.eup %5300 }
 0x674   :  { %v1918_v26 = vmul.f32 %v5285_v28, %v4318_v9 }
 0x675   :  { %5072 = vmatpush3.bf16.msra.mxu1 %v5927_v21 }
 0x676   :  { %v4319_v12 = vpop.f32.mrb[84].mxu0  ;;  %v1946_v58 = vpack.c.bf16 %v1918_v26, %v1917_v7  ;;  %5073 = vmatprep.subr.bf16.mxu1 %v7991_v53  ;;  %v1649_v7 = vpop.xlane.xlu1 %1648 }
 0x677   :  { %v4320_v63 = vpop.f32.mrb[85].mxu0 }
 0x678   :  { %v4321_v13 = vadd.f32 %v4320_v63, %v4319_v12  ;;  %v4322_v35 = vpop.f32.mrb[86].mxu0  ;;  %4796 = vmatmul.mubr.bf16.gmra.mrb[104].mxu1 %v1946_v58 }
 0x679   :  { %v4323_v14 = vpop.f32.mrb[87].mxu0  ;;  %5075 = vmatpush3.bf16.msra.mxu1 %v5939_v29 }
 0x67a   :  { %v4324_v41 = vadd.f32 %v4323_v14, %v4322_v35  ;;  %5076 = vmatprep.subr.bf16.mxu1 %v7991_v53  ;;  %v1919_v21 = vmul.f32 %v5287_v15, %v4321_v13 }
 0x67c   :  { %v1920_v36 = vmul.f32 %v5289_v51, %v4324_v41 }
 0x67d   :  { %5078 = vmatpush3.bf16.msra.mxu1 %v5953_v38 }
 0x67e   :  { %v4325_v11 = vpop.f32.mrb[88].mxu0  ;;  %v1947_v1 = vpack.c.bf16 %v1920_v36, %v1919_v21  ;;  %5079 = vmatprep.subr.bf16.mxu1 %v7991_v53  ;;  %v1655_v21 = vpop.xlane.xlu1 %1654 }
 0x67f   :  { %v4326_v19 = vpop.f32.mrb[89].mxu0 }
 0x680   :  { %v4327_v4 = vadd.f32 %v4326_v19, %v4325_v11  ;;  %v4328_v47 = vpop.f32.mrb[90].mxu0  ;;  %4799 = vmatprep.mubr.bf16.mxu1 %v1947_v1 }
 0x681   :  { %v4329_v29 = vpop.f32.mrb[91].mxu0  ;;  %5081 = vmatpush3.bf16.msra.mxu1 %v5965_v45 }
 0x682   :  { %v4330_v25 = vadd.f32 %v4329_v29, %v4328_v47  ;;  %5082 = vmatprep.subr.bf16.mxu1 %v7991_v53  ;;  %v1921_v38 = vmul.f32 %v5291_v61, %v4327_v4 }
 0x684   :  { %v1922_v6 = vmul.f32 %v5293_v40, %v4330_v25 }
 0x685   :  { %5084 = vmatpush3.bf16.msra.mxu1 %v5977_v50  ;;  %v1640_v50 = vpop.xlane.xlu0 %1639 }
 0x686   :  { %v4331_v42 = vpop.f32.mrb[92].mxu0  ;;  %v1948_v20 = vpack.c.bf16 %v1922_v6, %v1921_v38  ;;  %4893 = vmatprep.subr.bf16.mxu1 %v6980_v46  ;;  %5302 = vrcp.f32 %v1640_v50  ;;  %v1661_v38 = vpop.xlane.xlu1 %1660 }
 0x687   :  { %v4332_v59 = vpop.f32.mrb[93].mxu0  ;;  %5304 = vrcp.f32 %v1643_v23 }
 0x688   :  { %v4333_v45 = vadd.f32 %v4332_v59, %v4331_v42  ;;  %v4334_v56 = vpop.f32.mrb[94].mxu0  ;;  %4800 = vmatmul.mubr.bf16.gmra.mrb[108].mxu1 %v1948_v20 }
 0x689   :  { %v4335_v53 = vpop.f32.mrb[95].mxu0  ;;  %v1646_v28 = vpop.xlane.xlu0 %1645 }
 0x68a   :  { %v4336_v24 = vadd.f32 %v4335_v53, %v4334_v56  ;;  %v1923_v27 = vmul.f32 %v5295_v43, %v4333_v45  ;;  %5306 = vrcp.f32 %v1646_v28 }
 0x68b   :  { %5308 = vrcp.f32 %v1649_v7 }
 0x68c   :  { %v1924_v10 = vmul.f32 %v5297_v31, %v4336_v24 }
 0x68d   :  { %v1652_v51 = vpop.xlane.xlu0 %1651 }
 0x68e   :  { %v4337_v18 = vpop.f32.mrb[96].mxu0  ;;  %v1949_v49 = vpack.c.bf16 %v1924_v10, %v1923_v27  ;;  %5310 = vrcp.f32 %v1652_v51  ;;  %v1667_v27 = vpop.xlane.xlu1 %1666 }
 0x68f   :  { %v4338_v54 = vpop.f32.mrb[97].mxu0  ;;  %5312 = vrcp.f32 %v1655_v21 }
 0x690   :  { %v4339_v16 = vadd.f32 %v4338_v54, %v4337_v18  ;;  %v4340_v22 = vpop.f32.mrb[98].mxu0  ;;  %4803 = vmatprep.mubr.bf16.mxu1 %v1949_v49  ;;  %v5303_v13 = vpop.eup %5302 }
 0x691   :  { %v4341_v33 = vpop.f32.mrb[99].mxu0  ;;  %v5305_v14 = vpop.eup %5304 }
 0x692   :  { %v4342_v37 = vadd.f32 %v4341_v33, %v4340_v22  ;;  %v1925_v17 = vmul.f32 %v5299_v48, %v4339_v16  ;;  %v1658_v40 = vpop.xlane.xlu0 %1657 }
 0x693   :  { %5314 = vrcp.f32 %v1658_v40 }
 0x694   :  { %v1926_v9 = vmul.f32 %v5301_v5, %v4342_v37  ;;  %v5307_v4 = vpop.eup %5306  ;;  %5316 = vrcp.f32 %v1661_v38 }
 0x695   :  { %v5309_v29 = vpop.eup %5308 }
 0x696   :  { %v4343_v26 = vpop.f32.mrb[100].mxu0  ;;  %v1950_v57 = vpack.c.bf16 %v1926_v9, %v1925_v17  ;;  %v1664_v31 = vpop.xlane.xlu0 %1663 }
 0x697   :  { %v4344_v55 = vpop.f32.mrb[101].mxu0  ;;  %5318 = vrcp.f32 %v1664_v31  ;;  %v1673_v17 = vpop.xlane.xlu1 %1672 }
 0x698   :  { %v4345_v12 = vadd.f32 %v4344_v55, %v4343_v26  ;;  %v4346_v58 = vpop.f32.mrb[102].mxu0  ;;  %4804 = vmatmul.mubr.bf16.gmra.mrb[112].mxu1 %v1950_v57  ;;  %v5311_v45 = vpop.eup %5310  ;;  %5320 = vrcp.f32 %v1667_v27 }
 0x699   :  { %v4347_v63 = vpop.f32.mrb[103].mxu0  ;;  %v5313_v53 = vpop.eup %5312 }
 0x69a   :  { %v4348_v35 = vadd.f32 %v4347_v63, %v4346_v58  ;;  %v1927_v15 = vmul.f32 %v5303_v13, %v4345_v12  ;;  %v1670_v5 = vpop.xlane.xlu0 %1669 }
 0x69b   :  { %5322 = vrcp.f32 %v1670_v5 }
 0x69c   :  { %v1928_v41 = vmul.f32 %v5305_v14, %v4348_v35  ;;  %5324 = vrcp.f32 %v1673_v17  ;;  %v5545_v17 = vld [vmem:[#allocation2 + $0x100] sm:$0xff] }
 0x69d   :  { %v5315_v16 = vpop.eup %5314 }
 0x69e   :  { %v4349_v36 = vpop.f32.mrb[104].mxu0  ;;  %v1951_v2 = vpack.c.bf16 %v1928_v41, %v1927_v15  ;;  %v5317_v33 = vpop.eup %5316 }
 0x69f   :  { %v4350_v8 = vpop.f32.mrb[105].mxu0  ;;  %v1676_v14 = vpop.xlane.xlu0 %1675 }
 0x6a0   :  { %v4351_v11 = vadd.f32 %v4350_v8, %v4349_v36  ;;  %v4352_v1 = vpop.f32.mrb[106].mxu0  ;;  %4807 = vmatprep.mubr.bf16.mxu1 %v1951_v2  ;;  %v1679_v15 = vpop.xlane.xlu1 %1678  ;;  %5326 = vrcp.f32 %v1676_v14 }
 0x6a1   :  { %v4353_v19 = vpop.f32.mrb[107].mxu0  ;;  %v5319_v12 = vpop.eup %5318  ;;  %5328 = vrcp.f32 %v1679_v15  ;;  %v5550_v15 = vld [vmem:[#allocation2 + $0x128] sm:$0xff] }
 0x6a2   :  { %v4354_v47 = vadd.f32 %v4353_v19, %v4352_v1  ;;  %v1929_v61 = vmul.f32 %v5307_v4, %v4351_v11  ;;  %v5321_v63 = vpop.eup %5320 }
 0x6a4   :  { %v1930_v25 = vmul.f32 %v5309_v29, %v4354_v47  ;;  %v1682_v29 = vpop.xlane.xlu0 %1681 }
 0x6a5   :  { %v5323_v11 = vpop.eup %5322  ;;  %5330 = vrcp.f32 %v1682_v29  ;;  %v5553_v29 = vld [vmem:[#allocation2 + $0x140] sm:$0xff] }
 0x6a6   :  { %v4355_v6 = vpop.f32.mrb[108].mxu0  ;;  %v1952_v3 = vpack.c.bf16 %v1930_v25, %v1929_v61  ;;  %v5325_v19 = vpop.eup %5324 }
 0x6a7   :  { %v4356_v44 = vpop.f32.mrb[109].mxu0  ;;  %v1685_v61 = vpop.xlane.xlu1 %1684 }
 0x6a8   :  { %v4357_v42 = vadd.f32 %v4356_v44, %v4355_v6  ;;  %v4358_v20 = vpop.f32.mrb[110].mxu0  ;;  %4808 = vmatmul.mubr.bf16.gmra.mrb[116].mxu1 %v1952_v3  ;;  %5332 = vrcp.f32 %v1685_v61 }
 0x6a9   :  { %v4359_v59 = vpop.f32.mrb[111].mxu0 }
 0x6aa   :  { %v4360_v56 = vadd.f32 %v4359_v59, %v4358_v20  ;;  %v1931_v43 = vmul.f32 %v5311_v45, %v4357_v42  ;;  %v5327_v42 = vpop.eup %5326 }
 0x6ab   :  { %v5329_v59 = vpop.eup %5328 }
 0x6ac   :  { %v1932_v24 = vmul.f32 %v5313_v53, %v4360_v56 }
 0x6ae   :  { %v4361_v10 = vpop.f32.mrb[112].mxu0  ;;  %v1953_v50 = vpack.c.bf16 %v1932_v24, %v1931_v43 }
 0x6af   :  { %v4362_v23 = vpop.f32.mrb[113].mxu0 }
 0x6b0   :  { %v4363_v18 = vadd.f32 %v4362_v23, %v4361_v10  ;;  %v4364_v49 = vpop.f32.mrb[114].mxu0  ;;  %4811 = vmatprep.mubr.bf16.mxu1 %v1953_v50  ;;  %v5331_v50 = vpop.eup %5330 }
 0x6b1   :  { %v4365_v54 = vpop.f32.mrb[115].mxu0 }
 0x6b2   :  { %v4366_v22 = vadd.f32 %v4365_v54, %v4364_v49  ;;  %v1933_v48 = vmul.f32 %v5315_v16, %v4363_v18  ;;  %v5333_v18 = vpop.eup %5332 }
 0x6b4   :  { %v1934_v37 = vmul.f32 %v5317_v33, %v4366_v22 }
 0x6b6   :  { %v4367_v9 = vpop.f32.mrb[116].mxu0  ;;  %v1954_v28 = vpack.c.bf16 %v1934_v37, %v1933_v48  ;;  %v8048_v37 = vld [vmem:[#allocation15_spill] sm:$0xff] }
 0x6b7   :  { %v4368_v7 = vpop.f32.mrb[117].mxu0 }
 0x6b8   :  { %v4369_v26 = vadd.f32 %v4368_v7, %v4367_v9  ;;  %v4370_v57 = vpop.f32.mrb[118].mxu0  ;;  %4812 = vmatmul.mubr.bf16.gmra.mrb[120].mxu1 %v1954_v28  ;;  %v5546_v28 = vld [vmem:[#allocation2 + $0x108] sm:$0xff] }
 0x6b9   :  { %v4371_v55 = vpop.f32.mrb[119].mxu0 }
 0x6ba   :  { %v4372_v58 = vadd.f32 %v4371_v55, %v4370_v57  ;;  %v1935_v13 = vmul.f32 %v5319_v12, %v4369_v26  ;;  %v5547_v26 = vld [vmem:[#allocation2 + $0x110] sm:$0xff]  ;;  %v5548_v12 = vld [vmem:[#allocation2 + $0x118] sm:$0xff] }
 0x6bc   :  { %v1936_v35 = vmul.f32 %v5321_v63, %v4372_v58  ;;  %v5549_v63 = vld [vmem:[#allocation2 + $0x120] sm:$0xff] }
 0x6be   :  { %v4373_v41 = vpop.f32.mrb[120].mxu0  ;;  %v1955_v51 = vpack.c.bf16 %v1936_v35, %v1935_v13 }
 0x6bf   :  { %v4374_v21 = vpop.f32.mrb[121].mxu0 }
 0x6c0   :  { %v4375_v36 = vadd.f32 %v4374_v21, %v4373_v41  ;;  %v4376_v2 = vpop.f32.mrb[122].mxu0  ;;  %4815 = vmatprep.mubr.bf16.mxu1 %v1955_v51 }
 0x6c1   :  { %v4377_v8 = vpop.f32.mrb[123].mxu0 }
 0x6c2   :  { %v4378_v1 = vadd.f32 %v4377_v8, %v4376_v2  ;;  %v1937_v4 = vmul.f32 %v5323_v11, %v4375_v36  ;;  %v5551_v36 = vld [vmem:[#allocation2 + $0x130] sm:$0xff] }
 0x6c4   :  { %v1938_v47 = vmul.f32 %v5325_v19, %v4378_v1  ;;  %v5552_v1 = vld [vmem:[#allocation2 + $0x138] sm:$0xff] }
 0x6c6   :  { %v4379_v25 = vpop.f32.mrb[124].mxu0  ;;  %v1956_v40 = vpack.c.bf16 %v1938_v47, %v1937_v4 }
 0x6c7   :  { %v4380_v38 = vpop.f32.mrb[125].mxu0 }
 0x6c8   :  { %v4381_v6 = vadd.f32 %v4380_v38, %v4379_v25  ;;  %v4382_v3 = vpop.f32.mrb[126].mxu0  ;;  %4816 = vmatmul.mubr.bf16.gmra.mrb[124].mxu1 %v1956_v40  ;;  %v5554_v38 = vld [vmem:[#allocation2 + $0x148] sm:$0xff] }
 0x6c9   :  { %v4383_v44 = vpop.f32.mrb[127].mxu0 }
 0x6ca   :  { %v4384_v20 = vadd.f32 %v4383_v44, %v4382_v3  ;;  %v1939_v45 = vmul.f32 %v5327_v42, %v4381_v6  ;;  %v5555_v42 = vld [vmem:[#allocation2 + $0x150] sm:$0xff] }
 0x6cc   :  { %v1940_v56 = vmul.f32 %v5329_v59, %v4384_v20 }
 0x6ce   :  { %v4385_v53 = vpop.f32.mrb[128].mxu0  ;;  %v1957_v43 = vpack.c.bf16 %v1940_v56, %v1939_v45  ;;  %v5556_v56 = vld [vmem:[#allocation2 + $0x158] sm:$0xff] }
 0x6cf   :  { %v4386_v24 = vpop.f32.mrb[129].mxu0 }
 0x6d0   :  { %v4387_v31 = vadd.f32 %v4386_v24, %v4385_v53  ;;  %v4388_v27 = vpop.f32.mrb[130].mxu0  ;;  %4819 = vmatprep.mubr.bf16.mxu1 %v1957_v43 }
 0x6d1   :  { %v4389_v10 = vpop.f32.mrb[131].mxu0 }
 0x6d2   :  { %v4390_v23 = vadd.f32 %v4389_v10, %v4388_v27  ;;  %v1941_v49 = vmul.f32 %v5331_v50, %v4387_v31  ;;  %v5557_v31 = vld [vmem:[#allocation2 + $0x160] sm:$0xff] }
 0x6d4   :  { %v1942_v54 = vmul.f32 %v5333_v18, %v4390_v23  ;;  %v5558_v23 = vld [vmem:[#allocation2 + $0x168] sm:$0xff] }
 0x6d6   :  { %v2374_v16 = vpop.f32.mrb[2].mxu0  ;;  %v1958_v22 = vpack.c.bf16 %v1942_v54, %v1941_v49 }
 0x6d7   :  { %v4857_v33 = vpop.f32.mrb[3].mxu0  ;;  %v2378_v48 = vmul.f32 0.00390625, %v2374_v16  ;;  %v5559_v16 = vld [vmem:[#allocation2 + $0x170] sm:$0xff] }
 0x6d8   :  { %4820 = vmatmul.mubr.bf16.gmra.mrb[128].mxu1 %v1958_v22 }
 0x6d9   :  { %4890 = vmatprep.mubr.msk.f32.mxu1 %vm5782_vm0, %v8046_v30  ;;  %v6986_v5 = vrot.slane %v2378_v48, %v8048_v37 }
 0x6db   :  { %v6989_v9 = vsub.f32 %v5545_v17, %v6986_v5  ;;  %v6992_v7 = vsub.f32 %v5546_v28, %v6986_v5  ;;  %v6995_v57 = vsub.f32 %v5547_v26, %v6986_v5  ;;  %v7002_v58 = vsub.f32 %v5548_v12, %v6986_v5  ;;  %v5560_v17 = vld [vmem:[#allocation2 + $0x178] sm:$0xff] }
 0x6dc   :  { %v7005_v13 = vsub.f32 %v5549_v63, %v6986_v5  ;;  %v7010_v41 = vsub.f32 %v5550_v15, %v6986_v5  ;;  %v7015_v2 = vsub.f32 %v5551_v36, %v6986_v5  ;;  %v7020_v19 = vsub.f32 %v5552_v1, %v6986_v5  ;;  %v5563_v36 = vld [vmem:[#allocation2 + $0x190] sm:$0xff] }
 0x6dd   :  { %v2415_v55 = vmul.f32 %v6989_v9, %v6989_v9  ;;  %v2416_v30 = vmul.f32 %v6992_v7, %v6992_v7  ;;  %v2417_v35 = vmul.f32 %v6995_v57, %v6995_v57  ;;  %v2418_v51 = vmul.f32 %v7002_v58, %v7002_v58 }
 0x6de   :  { %v2419_v8 = vmul.f32 %v7005_v13, %v7005_v13  ;;  %v2420_v4 = vmul.f32 %v7010_v41, %v7010_v41  ;;  %v7025_v61 = vsub.f32 %v5553_v29, %v6986_v5  ;;  %v2421_v25 = vmul.f32 %v7015_v2, %v7015_v2 }
 0x6df   :  { %v2447_v14 = vadd.f32 %v2416_v30, %v2415_v55  ;;  %v7030_v6 = vsub.f32 %v5554_v38, %v6986_v5  ;;  %v2422_v3 = vmul.f32 %v7020_v19, %v7020_v19  ;;  %v7035_v20 = vsub.f32 %v5555_v42, %v6986_v5  ;;  %v5561_v30 = vld [vmem:[#allocation2 + $0x180] sm:$0xff]  ;;  %v5566_v42 = vld [vmem:[#allocation2 + $0x1a8] sm:$0xff] }
 0x6e0   :  { %v2423_v59 = vmul.f32 %v7025_v61, %v7025_v61  ;;  %v7040_v53 = vsub.f32 %v5556_v56, %v6986_v5  ;;  %v7045_v27 = vsub.f32 %v5557_v31, %v6986_v5  ;;  %v7050_v18 = vsub.f32 %v5558_v23, %v6986_v5 }
 0x6e1   :  { %v2448_v21 = vadd.f32 %v2447_v14, %v2417_v35  ;;  %v2424_v43 = vmul.f32 %v7030_v6, %v7030_v6  ;;  %v2425_v10 = vmul.f32 %v7035_v20, %v7035_v20  ;;  %v7055_v22 = vsub.f32 %v5559_v16, %v6986_v5  ;;  %v5562_v14 = vld [vmem:[#allocation2 + $0x188] sm:$0xff]  ;;  %v5569_v16 = vld [vmem:[#allocation2 + $0x1c0] sm:$0xff] }
 0x6e2   :  { %v2426_v49 = vmul.f32 %v7040_v53, %v7040_v53  ;;  %v2427_v33 = vmul.f32 %v7045_v27, %v7045_v27  ;;  %v7060_v28 = vsub.f32 %v5560_v17, %v6986_v5  ;;  %v2428_v26 = vmul.f32 %v7050_v18, %v7050_v18 }
 0x6e3   :  { %v2449_v11 = vadd.f32 %v2448_v21, %v2418_v51  ;;  %v7065_v12 = vsub.f32 %v5561_v30, %v6986_v5  ;;  %v2429_v63 = vmul.f32 %v7055_v22, %v7055_v22  ;;  %v7070_v15 = vsub.f32 %v5562_v14, %v6986_v5 }
 0x6e4   :  { %v2430_v51 = vmul.f32 %v7060_v28, %v7060_v28 }
 0x6e5   :  { %v2450_v47 = vadd.f32 %v2449_v11, %v2419_v8  ;;  %v7075_v8 = vsub.f32 %v5563_v36, %v6986_v5  ;;  %v2431_v11 = vmul.f32 %v7065_v12, %v7065_v12  ;;  %v2432_v29 = vmul.f32 %v7070_v15, %v7070_v15 }
 0x6e7   :  { %v2451_v40 = vadd.f32 %v2450_v47, %v2420_v4  ;;  %v5564_v4 = vld [vmem:[#allocation2 + $0x198] sm:$0xff] }
 0x6e8   :  { %v7080_v47 = vsub.f32 %v5564_v4, %v6986_v5 }
 0x6e9   :  { %v2452_v44 = vadd.f32 %v2451_v40, %v2421_v25  ;;  %v5565_v40 = vld [vmem:[#allocation2 + $0x1a0] sm:$0xff] }
 0x6ea   :  { %v7085_v38 = vsub.f32 %v5565_v40, %v6986_v5  ;;  %v7140_v40 = vsub.f32 %v6951_v62, %v6986_v5 }
 0x6eb   :  { %v2453_v45 = vadd.f32 %v2452_v44, %v2422_v3  ;;  %v2433_v3 = vmul.f32 %v7075_v8, %v7075_v8 }
 0x6ec   :  { %v2435_v31 = vmul.f32 %v7085_v38, %v7085_v38 }
 0x6ed   :  { %v2454_v24 = vadd.f32 %v2453_v45, %v2423_v59  ;;  %v7090_v59 = vsub.f32 %v5566_v42, %v6986_v5  ;;  %v2434_v45 = vmul.f32 %v7080_v47, %v7080_v47 }
 0x6ef   :  { %v2455_v50 = vadd.f32 %v2454_v24, %v2424_v43  ;;  %v5567_v43 = vld [vmem:[#allocation2 + $0x1b0] sm:$0xff] }
 0x6f0   :  { %v7095_v24 = vsub.f32 %v5567_v43, %v6986_v5 }
 0x6f1   :  { %v2456_v54 = vadd.f32 %v2455_v50, %v2425_v10  ;;  %v5568_v50 = vld [vmem:[#allocation2 + $0x1b8] sm:$0xff] }
 0x6f2   :  { %v7100_v23 = vsub.f32 %v5568_v50, %v6986_v5 }
 0x6f3   :  { %v2457_v48 = vadd.f32 %v2456_v54, %v2426_v49  ;;  %v2436_v49 = vmul.f32 %v7090_v59, %v7090_v59 }
 0x6f4   :  { %v2438_v30 = vmul.f32 %v7100_v23, %v7100_v23 }
 0x6f5   :  { %v2458_v55 = vadd.f32 %v2457_v48, %v2427_v33  ;;  %v7105_v33 = vsub.f32 %v5569_v16, %v6986_v5  ;;  %v2437_v48 = vmul.f32 %v7095_v24, %v7095_v24 }
 0x6f7   :  { %v2459_v35 = vadd.f32 %v2458_v55, %v2428_v26  ;;  %v5570_v26 = vld [vmem:[#allocation2 + $0x1c8] sm:$0xff]  ;;  %v2439_v14 = vmul.f32 %v7105_v33, %v7105_v33 }
 0x6f8   :  { %v7110_v55 = vsub.f32 %v5570_v26, %v6986_v5  ;;  %v5572_v26 = vld [vmem:[#allocation7 + $0x38] ss:$12 sps:$4 sm:$0xff]  }
 0x6f9   :  { %v2460_v21 = vadd.f32 %v2459_v35, %v2429_v63  ;;  %v7116_v35 = vsub.f32 %v6931_v39, %v6986_v5 }
 0x6fa   :  { %v2440_v36 = vmul.f32 %v7110_v55, %v7110_v55 }
 0x6fb   :  { %v2461_v1 = vadd.f32 %v2460_v21, %v2430_v51  ;;  %v7122_v21 = vsub.f32 %v6936_v34, %v6986_v5  ;;  %v2441_v39 = vmul.f32 %v7116_v35, %v7116_v35 }
 0x6fd   :  { %v2462_v25 = vadd.f32 %v2461_v1, %v2431_v11  ;;  %v7128_v1 = vsub.f32 %v6941_v32, %v6986_v5  ;;  %v2442_v34 = vmul.f32 %v7122_v21, %v7122_v21 }
 0x6ff   :  { %v2463_v44 = vadd.f32 %v2462_v25, %v2432_v29  ;;  %v7134_v29 = vsub.f32 %v6946_v60, %v6986_v5  ;;  %v2443_v32 = vmul.f32 %v7128_v1, %v7128_v1 }
 0x701   :  { %v2464_v56 = vadd.f32 %v2463_v44, %v2433_v3  ;;  %v7146_v44 = vsub.f32 %v6956_v0, %v6986_v5  ;;  %v2444_v60 = vmul.f32 %v7134_v29, %v7134_v29  ;;  %v5571_v5 = vld [vmem:[#allocation7 + $0x20] ss:$12 sps:$4 sm:$0xff]  }
 0x703   :  { %v2465_v10 = vadd.f32 %v2464_v56, %v2434_v45  ;;  %v2445_v45 = vmul.f32 %v7140_v40, %v7140_v40  ;;  %v2446_v62 = vmul.f32 %v7146_v44, %v7146_v44 }
 0x705   :  { %v2466_v54 = vadd.f32 %v2465_v10, %v2435_v31 }
 0x707   :  { %v2467_v17 = vadd.f32 %v2466_v54, %v2436_v49 }
 0x709   :  { %v2468_v63 = vadd.f32 %v2467_v17, %v2437_v48  ;;  %v7158_v48 = vld [vmem:[%s7929_s7] ss:$0 sm:$0xff] }
 0x70b   :  { %v2469_v51 = vadd.f32 %v2468_v63, %v2438_v30 }
 0x70d   :  { %v2470_v11 = vadd.f32 %v2469_v51, %v2439_v14 }
 0x70f   :  { %v2471_v4 = vadd.f32 %v2470_v11, %v2440_v36  ;;  %v5573_v36 = vld [vmem:[#allocation2 + $0x10] sm:$0xff] }
 0x711   :  { %v2472_v25 = vadd.f32 %v2471_v4, %v2441_v39  ;;  %v5574_v4 = vld [vmem:[#allocation2] sm:$0xff] }
 0x713   :  { %v2473_v3 = vadd.f32 %v2472_v25, %v2442_v34 }
 0x715   :  { %v2474_v42 = vadd.f32 %v2473_v3, %v2443_v32  ;;  %v5575_v32 = vld [vmem:[#allocation7 + $0x50] ss:$12 sps:$4 sm:$0xff]  }
 0x716   :  { %v5576_v3 = vld [vmem:[#allocation2 + $0x18] sm:$0xff] }
 0x717   :  { %v2475_v56 = vadd.f32 %v2474_v42, %v2444_v60  ;;  %v5577_v42 = vld [vmem:[#allocation2 + $0x8] sm:$0xff] }
 0x719   :  { %v2476_v43 = vadd.f32 %v2475_v56, %v2445_v45  ;;  %v5578_v56 = vld [vmem:[#allocation7 + $0x68] ss:$12 sps:$4 sm:$0xff]  }
 0x71b   :  { %v2477_v31 = vadd.f32 %v2476_v43, %v2446_v62  ;;  %v5579_v62 = vld [vmem:[#allocation7 + $0x80] ss:$12 sps:$4 sm:$0xff]  }
 0x71d   :  { %v2478_v10 = vrot.slane %v2477_v31, 4 }
 0x71f   :  { %v2479_v50 = vadd.f32 %v2478_v10, %v2477_v31  ;;  %v5580_v31 = vld [vmem:[#allocation7 + $0x98] ss:$12 sps:$4 sm:$0xff]  }
 0x721   :  { %v2480_v49 = vrot.slane %v2479_v50, 2 }
 0x723   :  { %v2481_v54 = vadd.f32 %v2480_v49, %v2479_v50 }
 0x725   :  { %v2482_v16 = vrot.slane %v2481_v54, 1 }
 0x727   :  { %v2483_v0 = vadd.f32 %v2482_v16, %v2481_v54  ;;  %v5581_v16 = vld [vmem:[#allocation2 + $0x30] sm:$0xff] }
 0x729   :  { %4891 = vmatmul.mubr.f32.vlgmr.msra.gmra.mrb[2].mxu1 %v2483_v0 }
 0x72a   :  { %4894 = vmatpush3.bf16.msra.mxu1 %v6980_v46 }
 0x72b   :  { %4895 = vmatprep.subr.bf16.mxu1 %v5571_v5 }
 0x72e   :  { %4896 = vmatpush3.bf16.msra.mxu1 %v5571_v5 }
 0x72f   :  { %4897 = vmatprep.subr.bf16.mxu1 %v5572_v26 }
 0x732   :  { %4898 = vmatpush3.bf16.msra.mxu1 %v5572_v26  ;;  %v5582_v26 = vld [vmem:[#allocation2 + $0x20] sm:$0xff] }
 0x733   :  { %4899 = vmatprep.subr.bf16.mxu1 %v5575_v32 }
 0x736   :  { %4900 = vmatpush3.bf16.msra.mxu1 %v5575_v32 }
 0x737   :  { %4901 = vmatprep.subr.bf16.mxu1 %v5578_v56 }
 0x73a   :  { %4902 = vmatpush3.bf16.msra.mxu1 %v5578_v56  ;;  %v5587_v56 = vld [vmem:[#allocation2 + $0x40] sm:$0xff] }
 0x73b   :  { %v4793_v17 = vpop.f32.mrb[100].mxu1  ;;  %4903 = vmatprep.subr.bf16.mxu1 %v5579_v62 }
 0x73c   :  { %v2056_v30 = vadd.f32 %v4793_v17, %v7158_v48  ;;  %v2047_v63 = vpop.f32.mrb[101].mxu1 }
 0x73d   :  { %v2048_v14 = vadd.f32 %v7158_v48, %v2047_v63  ;;  %v4794_v51 = vpop.f32.mrb[102].mxu1 }
 0x73e   :  { %v2176_v11 = vadd.f32 %v5573_v36, %v2056_v30  ;;  %v2059_v46 = vadd.f32 %v4794_v51, %v7158_v48  ;;  %v2050_v39 = vpop.f32.mrb[103].mxu1  ;;  %4904 = vmatpush3.bf16.msra.mxu1 %v5579_v62  ;;  %v5584_v51 = vld [vmem:[#allocation2 + $0x38] sm:$0xff] }
 0x73f   :  { %v2174_v34 = vadd.f32 %v5574_v4, %v2048_v14  ;;  %v2051_v25 = vadd.f32 %v7158_v48, %v2050_v39  ;;  %4905 = vmatprep.subr.bf16.mxu1 %v5580_v31  ;;  %v5583_v14 = vld [vmem:[#allocation7 + $0xb0] ss:$12 sps:$4 sm:$0xff]  }
 0x740   :  { %2208 = vst [vmem:[#allocation10 + $0x10] sm:$0xff] %v2176_v11  ;;  %v2177_v60 = vadd.f32 %v5576_v3, %v2059_v46  ;;  %v5585_v11 = vld [vmem:[#allocation2 + $0x28] sm:$0xff]  ;;  %v5586_v3 = vld [vmem:[#allocation2 + $0x50] sm:$0xff] }
 0x741   :  { %2206 = vst [vmem:[#allocation10] sm:$0xff] %v2174_v34  ;;  %v2175_v45 = vadd.f32 %v5577_v42, %v2051_v25 }
 0x742   :  { %2209 = vst [vmem:[#allocation10 + $0x18] sm:$0xff] %v2177_v60  ;;  %4906 = vmatpush3.bf16.msra.mxu1 %v5580_v31  ;;  %v5588_v31 = vld [vmem:[#allocation2 + $0x58] sm:$0xff] }
 0x743   :  { %2207 = vst [vmem:[#allocation10 + $0x8] sm:$0xff] %v2175_v45  ;;  %4907 = vmatprep.subr.bf16.mxu1 %v5583_v14 }
 0x746   :  { %4908 = vmatpush3.bf16.msra.mxu1 %v5583_v14 }
 0x74b   :  { %v4797_v43 = vpop.f32.mrb[104].mxu1 }
 0x74c   :  { %v2072_v10 = vadd.f32 %v4797_v43, %v7158_v48  ;;  %v2063_v50 = vpop.f32.mrb[105].mxu1 }
 0x74d   :  { %v2064_v49 = vadd.f32 %v7158_v48, %v2063_v50  ;;  %v4798_v54 = vpop.f32.mrb[106].mxu1  ;;  %v5589_v50 = vld [vmem:[#allocation2 + $0x48] sm:$0xff] }
 0x74e   :  { %v2180_v0 = vadd.f32 %v5581_v16, %v2072_v10  ;;  %v2075_v5 = vadd.f32 %v4798_v54, %v7158_v48  ;;  %v2066_v17 = vpop.f32.mrb[107].mxu1 }
 0x74f   :  { %v2178_v30 = vadd.f32 %v5582_v26, %v2064_v49  ;;  %v2067_v63 = vadd.f32 %v7158_v48, %v2066_v17  ;;  %v5590_v26 = vld [vmem:[#allocation2 + $0x70] sm:$0xff] }
 0x750   :  { %2212 = vst [vmem:[#allocation10 + $0x30] sm:$0xff] %v2180_v0  ;;  %v2181_v36 = vadd.f32 %v5584_v51, %v2075_v5  ;;  %v5591_v51 = vld [vmem:[#allocation2 + $0x60] sm:$0xff] }
 0x751   :  { %2210 = vst [vmem:[#allocation10 + $0x20] sm:$0xff] %v2178_v30  ;;  %v2179_v46 = vadd.f32 %v5585_v11, %v2067_v63 }
 0x752   :  { %2213 = vst [vmem:[#allocation10 + $0x38] sm:$0xff] %v2181_v36 }
 0x753   :  { %2211 = vst [vmem:[#allocation10 + $0x28] sm:$0xff] %v2179_v46  ;;  %v5592_v46 = vld [vmem:[#allocation2 + $0x78] sm:$0xff] }
 0x75b   :  { %v4801_v39 = vpop.f32.mrb[108].mxu1 }
 0x75c   :  { %v2088_v4 = vadd.f32 %v4801_v39, %v7158_v48  ;;  %v2079_v34 = vpop.f32.mrb[109].mxu1 }
 0x75d   :  { %v2080_v25 = vadd.f32 %v7158_v48, %v2079_v34  ;;  %v4802_v32 = vpop.f32.mrb[110].mxu1 }
 0x75e   :  { %v2184_v60 = vadd.f32 %v5586_v3, %v2088_v4  ;;  %v2091_v42 = vadd.f32 %v4802_v32, %v7158_v48  ;;  %v2082_v45 = vpop.f32.mrb[111].mxu1  ;;  %v5593_v4 = vld [vmem:[#allocation2 + $0x68] sm:$0xff] }
 0x75f   :  { %v2182_v62 = vadd.f32 %v5587_v56, %v2080_v25  ;;  %v2083_v43 = vadd.f32 %v7158_v48, %v2082_v45  ;;  %v5594_v45 = vld [vmem:[#allocation2 + $0x90] sm:$0xff] }
 0x760   :  { %2216 = vst [vmem:[#allocation10 + $0x50] sm:$0xff] %v2184_v60  ;;  %v2185_v10 = vadd.f32 %v5588_v31, %v2091_v42  ;;  %v5595_v31 = vld [vmem:[#allocation2 + $0x80] sm:$0xff] }
 0x761   :  { %2214 = vst [vmem:[#allocation10 + $0x40] sm:$0xff] %v2182_v62  ;;  %v2183_v49 = vadd.f32 %v5589_v50, %v2083_v43 }
 0x762   :  { %2217 = vst [vmem:[#allocation10 + $0x58] sm:$0xff] %v2185_v10 }
 0x763   :  { %2215 = vst [vmem:[#allocation10 + $0x48] sm:$0xff] %v2183_v49  ;;  %v5596_v49 = vld [vmem:[#allocation2 + $0x98] sm:$0xff] }
 0x76b   :  { %v4805_v54 = vpop.f32.mrb[112].mxu1 }
 0x76c   :  { %v2104_v16 = vadd.f32 %v4805_v54, %v7158_v48  ;;  %v2095_v0 = vpop.f32.mrb[113].mxu1 }
 0x76d   :  { %v2096_v5 = vadd.f32 %v7158_v48, %v2095_v0  ;;  %v4806_v17 = vpop.f32.mrb[114].mxu1 }
 0x76e   :  { %v2188_v30 = vadd.f32 %v5590_v26, %v2104_v16  ;;  %v2107_v63 = vadd.f32 %v4806_v17, %v7158_v48  ;;  %v2098_v14 = vpop.f32.mrb[115].mxu1  ;;  %v5597_v16 = vld [vmem:[#allocation2 + $0x88] sm:$0xff] }
 0x76f   :  { %v2186_v36 = vadd.f32 %v5591_v51, %v2096_v5  ;;  %v2099_v11 = vadd.f32 %v7158_v48, %v2098_v14  ;;  %v5598_v14 = vld [vmem:[#allocation2 + $0xb0] sm:$0xff] }
 0x770   :  { %2220 = vst [vmem:[#allocation10 + $0x70] sm:$0xff] %v2188_v30  ;;  %v2189_v39 = vadd.f32 %v5592_v46, %v2107_v63  ;;  %v5599_v46 = vld [vmem:[#allocation2 + $0xa0] sm:$0xff] }
 0x771   :  { %2218 = vst [vmem:[#allocation10 + $0x60] sm:$0xff] %v2186_v36  ;;  %v2187_v34 = vadd.f32 %v5593_v4, %v2099_v11 }
 0x772   :  { %2221 = vst [vmem:[#allocation10 + $0x78] sm:$0xff] %v2189_v39 }
 0x773   :  { %2219 = vst [vmem:[#allocation10 + $0x68] sm:$0xff] %v2187_v34  ;;  %v5600_v34 = vld [vmem:[#allocation2 + $0xb8] sm:$0xff] }
 0x77b   :  { %v4809_v25 = vpop.f32.mrb[116].mxu1 }
 0x77c   :  { %v2120_v32 = vadd.f32 %v4809_v25, %v7158_v48  ;;  %v2111_v3 = vpop.f32.mrb[117].mxu1 }
 0x77d   :  { %v2112_v60 = vadd.f32 %v7158_v48, %v2111_v3  ;;  %v4810_v42 = vpop.f32.mrb[118].mxu1 }
 0x77e   :  { %v2192_v56 = vadd.f32 %v5594_v45, %v2120_v32  ;;  %v2123_v62 = vadd.f32 %v4810_v42, %v7158_v48  ;;  %v2114_v43 = vpop.f32.mrb[119].mxu1  ;;  %v5601_v32 = vld [vmem:[#allocation2 + $0xa8] sm:$0xff] }
 0x77f   :  { %v2190_v10 = vadd.f32 %v5595_v31, %v2112_v60  ;;  %v2115_v50 = vadd.f32 %v7158_v48, %v2114_v43  ;;  %v5602_v43 = vld [vmem:[#allocation2 + $0xd0] sm:$0xff] }
 0x780   :  { %2224 = vst [vmem:[#allocation10 + $0x90] sm:$0xff] %v2192_v56  ;;  %v2193_v54 = vadd.f32 %v5596_v49, %v2123_v62  ;;  %v5603_v49 = vld [vmem:[#allocation2 + $0xc0] sm:$0xff] }
 0x781   :  { %2222 = vst [vmem:[#allocation10 + $0x80] sm:$0xff] %v2190_v10  ;;  %v2191_v0 = vadd.f32 %v5597_v16, %v2115_v50 }
 0x782   :  { %2225 = vst [vmem:[#allocation10 + $0x98] sm:$0xff] %v2193_v54 }
 0x783   :  { %2223 = vst [vmem:[#allocation10 + $0x88] sm:$0xff] %v2191_v0  ;;  %v5604_v0 = vld [vmem:[#allocation2 + $0xd8] sm:$0xff] }
 0x78b   :  { %v4813_v5 = vpop.f32.mrb[120].mxu1 }
 0x78c   :  { %v2136_v17 = vadd.f32 %v4813_v5, %v7158_v48  ;;  %v2127_v26 = vpop.f32.mrb[121].mxu1 }
 0x78d   :  { %v2128_v30 = vadd.f32 %v7158_v48, %v2127_v26  ;;  %v4814_v63 = vpop.f32.mrb[122].mxu1 }
 0x78e   :  { %v2196_v51 = vadd.f32 %v5598_v14, %v2136_v17  ;;  %v2139_v36 = vadd.f32 %v4814_v63, %v7158_v48  ;;  %v2130_v11 = vpop.f32.mrb[123].mxu1  ;;  %v5605_v17 = vld [vmem:[#allocation2 + $0xc8] sm:$0xff] }
 0x78f   :  { %v2194_v39 = vadd.f32 %v5599_v46, %v2128_v30  ;;  %v2131_v4 = vadd.f32 %v7158_v48, %v2130_v11  ;;  %v5606_v11 = vld [vmem:[#allocation2 + $0xf0] sm:$0xff] }
 0x790   :  { %2228 = vst [vmem:[#allocation10 + $0xb0] sm:$0xff] %v2196_v51  ;;  %v2197_v25 = vadd.f32 %v5600_v34, %v2139_v36  ;;  %v5607_v34 = vld [vmem:[#allocation2 + $0xe0] sm:$0xff] }
 0x791   :  { %2226 = vst [vmem:[#allocation10 + $0xa0] sm:$0xff] %v2194_v39  ;;  %v2195_v3 = vadd.f32 %v5601_v32, %v2131_v4 }
 0x792   :  { %2229 = vst [vmem:[#allocation10 + $0xb8] sm:$0xff] %v2197_v25 }
 0x793   :  { %2227 = vst [vmem:[#allocation10 + $0xa8] sm:$0xff] %v2195_v3  ;;  %v5608_v3 = vld [vmem:[#allocation2 + $0xf8] sm:$0xff] }
 0x79b   :  { %v4817_v60 = vpop.f32.mrb[124].mxu1 }
 0x79c   :  { %v2152_v42 = vadd.f32 %v4817_v60, %v7158_v48  ;;  %v2143_v45 = vpop.f32.mrb[125].mxu1 }
 0x79d   :  { %v2144_v56 = vadd.f32 %v7158_v48, %v2143_v45  ;;  %v4818_v62 = vpop.f32.mrb[126].mxu1 }
 0x79e   :  { %v2200_v31 = vadd.f32 %v5602_v43, %v2152_v42  ;;  %v2155_v10 = vadd.f32 %v4818_v62, %v7158_v48  ;;  %v2146_v50 = vpop.f32.mrb[127].mxu1  ;;  %v5609_v42 = vld [vmem:[#allocation2 + $0xe8] sm:$0xff] }
 0x79f   :  { %v2198_v54 = vadd.f32 %v5603_v49, %v2144_v56  ;;  %v2147_v16 = vadd.f32 %v7158_v48, %v2146_v50  ;;  %v5610_v50 = vld [vmem:[%s7923_s1] sm:$0x1] }
 0x7a0   :  { %2232 = vst [vmem:[#allocation10 + $0xd0] sm:$0xff] %v2200_v31  ;;  %v2201_v5 = vadd.f32 %v5604_v0, %v2155_v10 }
 0x7a1   :  { %2230 = vst [vmem:[#allocation10 + $0xc0] sm:$0xff] %v2198_v54  ;;  %v2199_v26 = vadd.f32 %v5605_v17, %v2147_v16 }
 0x7a2   :  { %2233 = vst [vmem:[#allocation10 + $0xd8] sm:$0xff] %v2201_v5 }
 0x7a3   :  { %2231 = vst [vmem:[#allocation10 + $0xc8] sm:$0xff] %v2199_v26 }
 0x7ab   :  { %v4821_v30 = vpop.f32.mrb[128].mxu1 }
 0x7ac   :  { %v2168_v63 = vadd.f32 %v4821_v30, %v7158_v48  ;;  %v2159_v14 = vpop.f32.mrb[129].mxu1 }
 0x7ad   :  { %v2160_v51 = vadd.f32 %v7158_v48, %v2159_v14  ;;  %v4822_v36 = vpop.f32.mrb[130].mxu1 }
 0x7ae   :  { %v2204_v46 = vadd.f32 %v5606_v11, %v2168_v63  ;;  %v2171_v39 = vadd.f32 %v4822_v36, %v7158_v48  ;;  %v2162_v4 = vpop.f32.mrb[131].mxu1 }
 0x7af   :  { %v2202_v25 = vadd.f32 %v5607_v34, %v2160_v51  ;;  %v2163_v32 = vadd.f32 %v7158_v48, %v2162_v4 }
 0x7b0   :  { %2236 = vst [vmem:[#allocation10 + $0xf0] sm:$0xff] %v2204_v46  ;;  %v2205_v60 = vadd.f32 %v5608_v3, %v2171_v39 }
 0x7b1   :  { %2234 = vst [vmem:[#allocation10 + $0xe0] sm:$0xff] %v2202_v25  ;;  %v2203_v45 = vadd.f32 %v5609_v42, %v2163_v32 }
 0x7b2   :  { %2237 = vst [vmem:[#allocation10 + $0xf8] sm:$0xff] %v2205_v60 }
 0x7b3   :  { %2235 = vst [vmem:[#allocation10 + $0xe8] sm:$0xff] %v2203_v45 }
 0x7fc   :  { %v2550_v56 = vpop.f32.mrb[2].mxu1 }
 0x7fd   :  { %v2554_v62 = vmul.f32 0.00390625, %v2550_v56  ;;  %v4892_v43 = vpop.f32.mrb[3].mxu1 }
 0x7ff   :  { %v2555_v31 = vadd.f32 1e-05, %v2554_v62 }
 0x801   :  { %5334 = vrsqrt.f32 %v2555_v31 }
 0x80b   :  { %v5335_v10 = vpop.eup %5334 }
 0x80c   :  { %v2557_v49 = vmul.f32 %v5610_v50, %v5335_v10 }
 0x80e   :  { %v7196_v48 = vrot.slane %v2557_v49, %v8048_v37  ;;  %v7213_v37 = vld [vmem:[%s7924_s2] ss:$0 sm:$0xff] }
 0x810   :  { %v2562_v54 = vmul.f32 %v7196_v48, %v6989_v9  ;;  %v2563_v16 = vmul.f32 %v7196_v48, %v6992_v7  ;;  %v2564_v0 = vmul.f32 %v7196_v48, %v6995_v57  ;;  %v2565_v5 = vmul.f32 %v7196_v48, %v7002_v58 }
 0x811   :  { %v2566_v17 = vmul.f32 %v7196_v48, %v7005_v13  ;;  %v2567_v26 = vmul.f32 %v7196_v48, %v7010_v41  ;;  %v2568_v41 = vmul.f32 %v7196_v48, %v7015_v2  ;;  %v2569_v51 = vmul.f32 %v7196_v48, %v7020_v19 }
 0x812   :  { %v2594_v9 = vadd.f32 %v7213_v37, %v2562_v54  ;;  %v2595_v7 = vadd.f32 %v7213_v37, %v2563_v16  ;;  %v2596_v57 = vadd.f32 %v7213_v37, %v2564_v0  ;;  %v2597_v30 = vadd.f32 %v7213_v37, %v2565_v5 }
 0x813   :  { %v2598_v58 = vadd.f32 %v7213_v37, %v2566_v17  ;;  %v2599_v13 = vadd.f32 %v7213_v37, %v2567_v26  ;;  %v2570_v11 = vmul.f32 %v7196_v48, %v7025_v61  ;;  %v2571_v46 = vmul.f32 %v7196_v48, %v7030_v6 }
 0x814   :  { %v2626_v63 = vpack.c.bf16 %v2595_v7, %v2594_v9  ;;  %v2627_v14 = vpack.c.bf16 %v2597_v30, %v2596_v57  ;;  %v2600_v39 = vadd.f32 %v7213_v37, %v2568_v41  ;;  %v2601_v2 = vadd.f32 %v7213_v37, %v2569_v51 }
 0x815   :  { %v2628_v36 = vpack.c.bf16 %v2599_v13, %v2598_v58  ;;  %v2602_v4 = vadd.f32 %v7213_v37, %v2570_v11  ;;  %v2603_v19 = vadd.f32 %v7213_v37, %v2571_v46  ;;  %v2572_v25 = vmul.f32 %v7196_v48, %v7035_v20 }
 0x816   :  { %2675 = vmatmul.mubr.bf16.vlgmr.msra.gmra.mrb[132].mxu0 %v2626_v63  ;;  %4909 = vmatprep.mubr.bf16.mxu1 %v2626_v63  ;;  %v2629_v34 = vpack.c.bf16 %v2601_v2, %v2600_v39  ;;  %v2573_v61 = vmul.f32 %v7196_v48, %v7040_v53  ;;  %v2574_v32 = vmul.f32 %v7196_v48, %v7045_v27 }
 0x817   :  { %4910 = vmatmul.mubr.bf16.vlgmr.msra.gmra.mrb[132].mxu1 %v2627_v14  ;;  %2684 = vmatprep.mubr.bf16.mxu0 %v8047_v52  ;;  %v2630_v6 = vpack.c.bf16 %v2603_v19, %v2602_v4  ;;  %v2575_v3 = vmul.f32 %v7196_v48, %v7050_v18  ;;  %v2604_v60 = vadd.f32 %v7213_v37, %v2572_v25  ;;  %v8049_v19 = vld [vmem:[#allocation16_spill] sm:$0xff] }
 0x818   :  { %4913 = vmatprep.mubr.bf16.mxu1 %v2628_v36  ;;  %v2605_v42 = vadd.f32 %v7213_v37, %v2573_v61  ;;  %v2606_v20 = vadd.f32 %v7213_v37, %v2574_v32  ;;  %v2576_v56 = vmul.f32 %v7196_v48, %v7055_v22  ;;  %v2577_v27 = vmul.f32 %v7196_v48, %v7060_v28  ;;  %v8050_v32 = vld [vmem:[#allocation17_spill] sm:$0xff] }
 0x819   :  { %v2607_v53 = vadd.f32 %v7213_v37, %v2575_v3  ;;  %v2578_v62 = vmul.f32 %v7196_v48, %v7065_v12  ;;  %v2579_v43 = vmul.f32 %v7196_v48, %v7070_v15  ;;  %v2580_v49 = vmul.f32 %v7196_v48, %v7075_v8 }
 0x81a   :  { %v2631_v45 = vpack.c.bf16 %v2605_v42, %v2604_v60  ;;  %v2608_v31 = vadd.f32 %v7213_v37, %v2576_v56  ;;  %v2609_v10 = vadd.f32 %v7213_v37, %v2577_v27  ;;  %v2581_v12 = vmul.f32 %v7196_v48, %v7080_v47  ;;  %v8051_v60 = vld [vmem:[#allocation18_spill] sm:$0xff] }
 0x81b   :  { %v2632_v18 = vpack.c.bf16 %v2607_v53, %v2606_v20  ;;  %v2610_v22 = vadd.f32 %v7213_v37, %v2578_v62  ;;  %v2611_v28 = vadd.f32 %v7213_v37, %v2579_v43  ;;  %v2582_v54 = vmul.f32 %v7196_v48, %v7085_v38 }
 0x81c   :  { %v2633_v50 = vpack.c.bf16 %v2609_v10, %v2608_v31  ;;  %v2583_v16 = vmul.f32 %v7196_v48, %v7090_v59  ;;  %v2612_v0 = vadd.f32 %v7213_v37, %v2580_v49  ;;  %v2613_v5 = vadd.f32 %v7213_v37, %v2581_v12 }
 0x81d   :  { %v2634_v15 = vpack.c.bf16 %v2611_v28, %v2610_v22  ;;  %v2614_v8 = vadd.f32 %v7213_v37, %v2582_v54  ;;  %v2584_v26 = vmul.f32 %v7196_v48, %v7095_v24  ;;  %v2585_v38 = vmul.f32 %v7196_v48, %v7100_v23 }
 0x81e   :  { %2685 = vmatmul.mubr.bf16.gmra.mrb[136].mxu0 %v2627_v14  ;;  %v2615_v47 = vadd.f32 %v7213_v37, %v2583_v16  ;;  %v2635_v17 = vpack.c.bf16 %v2613_v5, %v2612_v0  ;;  %v2586_v9 = vmul.f32 %v7196_v48, %v7105_v33  ;;  %v2587_v7 = vmul.f32 %v7196_v48, %v7110_v55 }
 0x81f   :  { %4914 = vmatmul.mubr.bf16.gmra.mrb[136].mxu1 %v2629_v34  ;;  %2694 = vmatprep.mubr.bf16.mxu0 %v8047_v52  ;;  %v2616_v57 = vadd.f32 %v7213_v37, %v2584_v26  ;;  %v2617_v30 = vadd.f32 %v7213_v37, %v2585_v38  ;;  %v2588_v13 = vmul.f32 %v7196_v48, %v7116_v35 }
 0x820   :  { %4917 = vmatprep.mubr.bf16.mxu1 %v2630_v6  ;;  %v2636_v59 = vpack.c.bf16 %v2615_v47, %v2614_v8  ;;  %v2618_v24 = vadd.f32 %v7213_v37, %v2586_v9  ;;  %v2619_v23 = vadd.f32 %v7213_v37, %v2587_v7  ;;  %v2589_v33 = vmul.f32 %v7196_v48, %v7122_v21 }
 0x821   :  { %v2637_v58 = vpack.c.bf16 %v2617_v30, %v2616_v57  ;;  %v2590_v63 = vmul.f32 %v7196_v48, %v7128_v1  ;;  %v2591_v14 = vmul.f32 %v7196_v48, %v7134_v29  ;;  %v2620_v41 = vadd.f32 %v7213_v37, %v2588_v13 }
 0x822   :  { %v2638_v55 = vpack.c.bf16 %v2619_v23, %v2618_v24  ;;  %v2621_v51 = vadd.f32 %v7213_v37, %v2589_v33  ;;  %v2592_v11 = vmul.f32 %v7196_v48, %v7140_v40  ;;  %v2593_v1 = vmul.f32 %v7196_v48, %v7146_v44 }
 0x823   :  { %v2622_v35 = vadd.f32 %v7213_v37, %v2590_v63  ;;  %v2623_v21 = vadd.f32 %v7213_v37, %v2591_v14 }
 0x824   :  { %v2624_v46 = vadd.f32 %v7213_v37, %v2592_v11  ;;  %v2625_v39 = vadd.f32 %v7213_v37, %v2593_v1 }
 0x825   :  { %v2640_v29 = vpack.c.bf16 %v2623_v21, %v2622_v35 }
 0x826   :  { %2695 = vmatmul.mubr.bf16.gmra.mrb[140].mxu0 %v2628_v36  ;;  %v2639_v36 = vpack.c.bf16 %v2621_v51, %v2620_v41  ;;  %v2641_v2 = vpack.c.bf16 %v2625_v39, %v2624_v46 }
 0x827   :  { %4918 = vmatmul.mubr.bf16.gmra.mrb[140].mxu1 %v2631_v45  ;;  %2704 = vmatprep.mubr.bf16.mxu0 %v8047_v52 }
 0x828   :  { %4921 = vmatprep.mubr.bf16.mxu1 %v2632_v18 }
 0x82e   :  { %2705 = vmatmul.mubr.bf16.gmra.mrb[144].mxu0 %v2629_v34 }
 0x82f   :  { %4922 = vmatmul.mubr.bf16.gmra.mrb[144].mxu1 %v2633_v50  ;;  %2714 = vmatprep.mubr.bf16.mxu0 %v8047_v52 }
 0x830   :  { %4925 = vmatprep.mubr.bf16.mxu1 %v2634_v15 }
 0x836   :  { %2715 = vmatmul.mubr.bf16.gmra.mrb[148].mxu0 %v2630_v6 }
 0x837   :  { %4926 = vmatmul.mubr.bf16.gmra.mrb[148].mxu1 %v2635_v17  ;;  %2724 = vmatprep.mubr.bf16.mxu0 %v8047_v52 }
 0x838   :  { %4929 = vmatprep.mubr.bf16.mxu1 %v2636_v59 }
 0x83e   :  { %2725 = vmatmul.mubr.bf16.gmra.mrb[152].mxu0 %v2631_v45 }
 0x83f   :  { %4930 = vmatmul.mubr.bf16.gmra.mrb[152].mxu1 %v2637_v58  ;;  %2734 = vmatprep.mubr.bf16.mxu0 %v8047_v52 }
 0x840   :  { %4933 = vmatprep.mubr.bf16.mxu1 %v2638_v55 }
 0x846   :  { %2735 = vmatmul.mubr.bf16.gmra.mrb[156].mxu0 %v2632_v18 }
 0x847   :  { %4934 = vmatmul.mubr.bf16.gmra.mrb[156].mxu1 %v2639_v36  ;;  %2744 = vmatprep.mubr.bf16.mxu0 %v8047_v52 }
 0x848   :  { %4937 = vmatprep.mubr.bf16.mxu1 %v2640_v29 }
 0x84e   :  { %2745 = vmatmul.mubr.bf16.gmra.mrb[160].mxu0 %v2633_v50 }
 0x84f   :  { %4938 = vmatmul.mubr.bf16.gmra.mrb[160].mxu1 %v2641_v2  ;;  %2754 = vmatprep.mubr.bf16.mxu0 %v8047_v52 }
 0x856   :  { %2755 = vmatmul.mubr.bf16.gmra.mrb[164].mxu0 %v2634_v15 }
 0x857   :  { %2764 = vmatprep.mubr.bf16.mxu0 %v8047_v52 }
 0x85e   :  { %2765 = vmatmul.mubr.bf16.gmra.mrb[168].mxu0 %v2635_v17 }
 0x85f   :  { %2774 = vmatprep.mubr.bf16.mxu0 %v8047_v52 }
 0x866   :  { %2775 = vmatmul.mubr.bf16.gmra.mrb[172].mxu0 %v2636_v59 }
 0x867   :  { %2784 = vmatprep.mubr.bf16.mxu0 %v8047_v52 }
 0x86e   :  { %2785 = vmatmul.mubr.bf16.gmra.mrb[176].mxu0 %v2637_v58 }
 0x86f   :  { %2794 = vmatprep.mubr.bf16.mxu0 %v8047_v52 }
 0x876   :  { %2795 = vmatmul.mubr.bf16.gmra.mrb[180].mxu0 %v2638_v55 }
 0x877   :  { %2804 = vmatprep.mubr.bf16.mxu0 %v8047_v52 }
 0x87e   :  { %2805 = vmatmul.mubr.bf16.gmra.mrb[184].mxu0 %v2639_v36 }
 0x87f   :  { %2814 = vmatprep.mubr.bf16.mxu0 %v8047_v52 }
 0x886   :  { %2815 = vmatmul.mubr.bf16.gmra.mrb[188].mxu0 %v2640_v29 }
 0x887   :  { %2824 = vmatprep.mubr.bf16.mxu0 %v8047_v52 }
 0x88e   :  { %2825 = vmatmul.mubr.bf16.gmra.mrb[192].mxu0 %v2641_v2 }
 0x8e9   :  { %v2676_v40 = vpop.f32.mrb[132].mxu0 }
 0x8ea   :  { %v2678_v44 = vpop.f32.mrb[133].mxu0  ;;  %v4911_v48 = vpop.f32.mrb[132].mxu1  ;;  %v2677_v34 = vadd.f32 %v2676_v40, %v8049_v19 }
 0x8eb   :  { %v2680_v37 = vpop.f32.mrb[134].mxu0  ;;  %v2869_v4 = vpop.f32.mrb[133].mxu1  ;;  %v7317_v3 = vadd.f32 %v2678_v44, %v8050_v32  ;;  %v7320_v42 = vadd.f32 %v4911_v48, %v8051_v60 }
 0x8ec   :  { %v2681_v25 = vadd.f32 %v2680_v37, %v8049_v19  ;;  %v2682_v61 = vpop.f32.mrb[135].mxu0  ;;  %v4912_v6 = vpop.f32.mrb[134].mxu1  ;;  %v7331_v56 = vadd.f32 %v2869_v4, %v8051_v60 }
 0x8ed   :  { %v7323_v52 = vadd.f32 %v2682_v61, %v8050_v32  ;;  %v7326_v20 = vadd.f32 %v4912_v6, %v8051_v60  ;;  %v2872_v53 = vpop.f32.mrb[135].mxu1 }
 0x8ee   :  { %v7328_v45 = vpack.c.bf16 %v2681_v25, %v2677_v34  ;;  %v7334_v27 = vadd.f32 %v2872_v53, %v8051_v60 }
 0x8ef   :  { %v3012_v18 = vpack.c.bf16 %v7323_v52, %v7317_v3  ;;  %v3029_v62 = vpack.c.bf16 %v7326_v20, %v7320_v42 }
 0x8f0   :  { %v3028_v43 = vpack.c.bf16 %v7334_v27, %v7331_v56  ;;  %4489 = vmatprep.mubr.bf16.mxu1 %v7328_v45 }
 0x8f1   :  { %v2686_v31 = vpop.f32.mrb[136].mxu0 }
 0x8f2   :  { %v2688_v10 = vpop.f32.mrb[137].mxu0  ;;  %v4915_v22 = vpop.f32.mrb[136].mxu1  ;;  %v2687_v49 = vadd.f32 %v2686_v31, %v8049_v19 }
 0x8f3   :  { %v2690_v28 = vpop.f32.mrb[138].mxu0  ;;  %v2885_v50 = vpop.f32.mrb[137].mxu1  ;;  %v7346_v16 = vadd.f32 %v2688_v10, %v8050_v32  ;;  %v7349_v0 = vadd.f32 %v4915_v22, %v8051_v60 }
 0x8f4   :  { %v2691_v12 = vadd.f32 %v2690_v28, %v8049_v19  ;;  %v2692_v15 = vpop.f32.mrb[139].mxu0  ;;  %v4916_v54 = vpop.f32.mrb[138].mxu1  ;;  %v7360_v26 = vadd.f32 %v2885_v50, %v8051_v60 }
 0x8f5   :  { %v7352_v5 = vadd.f32 %v2692_v15, %v8050_v32  ;;  %v7355_v8 = vadd.f32 %v4916_v54, %v8051_v60  ;;  %v2888_v47 = vpop.f32.mrb[139].mxu1 }
 0x8f6   :  { %v7357_v17 = vpack.c.bf16 %v2691_v12, %v2687_v49  ;;  %v7363_v38 = vadd.f32 %v2888_v47, %v8051_v60 }
 0x8f7   :  { %v3013_v59 = vpack.c.bf16 %v7352_v5, %v7346_v16  ;;  %v3031_v9 = vpack.c.bf16 %v7355_v8, %v7349_v0 }
 0x8f8   :  { %v3030_v7 = vpack.c.bf16 %v7363_v38, %v7360_v26 }
 0x8f9   :  { %v2696_v57 = vpop.f32.mrb[140].mxu0 }
 0x8fa   :  { %v2698_v30 = vpop.f32.mrb[141].mxu0  ;;  %v4919_v24 = vpop.f32.mrb[140].mxu1  ;;  %v2697_v13 = vadd.f32 %v2696_v57, %v8049_v19 }
 0x8fb   :  { %v2700_v23 = vpop.f32.mrb[142].mxu0  ;;  %v2901_v58 = vpop.f32.mrb[141].mxu1  ;;  %v7374_v14 = vadd.f32 %v2698_v30, %v8050_v32  ;;  %v7377_v41 = vadd.f32 %v4919_v24, %v8051_v60 }
 0x8fc   :  { %v2701_v33 = vadd.f32 %v2700_v23, %v8049_v19  ;;  %v2702_v55 = vpop.f32.mrb[143].mxu0  ;;  %v4920_v63 = vpop.f32.mrb[142].mxu1  ;;  %v7388_v11 = vadd.f32 %v2901_v58, %v8051_v60 }
 0x8fd   :  { %v7380_v51 = vadd.f32 %v2702_v55, %v8050_v32  ;;  %v7383_v35 = vadd.f32 %v4920_v63, %v8051_v60  ;;  %v2904_v21 = vpop.f32.mrb[143].mxu1 }
 0x8fe   :  { %v7385_v36 = vpack.c.bf16 %v2701_v33, %v2697_v13  ;;  %v7391_v1 = vadd.f32 %v2904_v21, %v8051_v60 }
 0x8ff   :  { %v3014_v29 = vpack.c.bf16 %v7380_v51, %v7374_v14  ;;  %v3033_v46 = vpack.c.bf16 %v7383_v35, %v7377_v41 }
 0x900   :  { %v3032_v39 = vpack.c.bf16 %v7391_v1, %v7388_v11 }
 0x901   :  { %v2706_v2 = vpop.f32.mrb[144].mxu0 }
 0x902   :  { %v2708_v40 = vpop.f32.mrb[145].mxu0  ;;  %v4923_v44 = vpop.f32.mrb[144].mxu1  ;;  %v2707_v4 = vadd.f32 %v2706_v2, %v8049_v19 }
 0x903   :  { %v2710_v48 = vpop.f32.mrb[146].mxu0  ;;  %v2917_v37 = vpop.f32.mrb[145].mxu1  ;;  %v7402_v6 = vadd.f32 %v2708_v40, %v8050_v32  ;;  %v7405_v53 = vadd.f32 %v4923_v44, %v8051_v60 }
 0x904   :  { %v2711_v34 = vadd.f32 %v2710_v48, %v8049_v19  ;;  %v2712_v25 = vpop.f32.mrb[147].mxu0  ;;  %v4924_v61 = vpop.f32.mrb[146].mxu1  ;;  %v7416_v50 = vadd.f32 %v2917_v37, %v8051_v60 }
 0x905   :  { %v7408_v31 = vadd.f32 %v2712_v25, %v8050_v32  ;;  %v7411_v10 = vadd.f32 %v4924_v61, %v8051_v60  ;;  %v2920_v22 = vpop.f32.mrb[147].mxu1 }
 0x906   :  { %v7413_v28 = vpack.c.bf16 %v2711_v34, %v2707_v4  ;;  %v7419_v49 = vadd.f32 %v2920_v22, %v8051_v60 }
 0x907   :  { %v3015_v12 = vpack.c.bf16 %v7408_v31, %v7402_v6  ;;  %v3035_v15 = vpack.c.bf16 %v7411_v10, %v7405_v53 }
 0x908   :  { %v3034_v54 = vpack.c.bf16 %v7419_v49, %v7416_v50 }
 0x909   :  { %v2716_v47 = vpop.f32.mrb[148].mxu0 }
 0x90a   :  { %v2718_v57 = vpop.f32.mrb[149].mxu0  ;;  %v4927_v30 = vpop.f32.mrb[148].mxu1  ;;  %v2717_v58 = vadd.f32 %v2716_v47, %v8049_v19 }
 0x90b   :  { %v2720_v24 = vpop.f32.mrb[150].mxu0  ;;  %v2933_v23 = vpop.f32.mrb[149].mxu1  ;;  %v7430_v63 = vadd.f32 %v2718_v57, %v8050_v32  ;;  %v2942_v21 = vadd.f32 %v4927_v30, %v8051_v60 }
 0x90c   :  { %v2721_v13 = vadd.f32 %v2720_v24, %v8049_v19  ;;  %v2722_v33 = vpop.f32.mrb[151].mxu0  ;;  %v4928_v55 = vpop.f32.mrb[150].mxu1  ;;  %v2934_v37 = vadd.f32 %v2933_v23, %v8051_v60 }
 0x90d   :  { %v7434_v2 = vadd.f32 %v2722_v33, %v8050_v32  ;;  %v2945_v40 = vadd.f32 %v4928_v55, %v8051_v60  ;;  %v2936_v44 = vpop.f32.mrb[151].mxu1 }
 0x90e   :  { %v7437_v48 = vpack.c.bf16 %v2721_v13, %v2717_v58  ;;  %v2937_v4 = vadd.f32 %v2936_v44, %v8051_v60 }
 0x90f   :  { %v3016_v34 = vpack.c.bf16 %v7434_v2, %v7430_v63  ;;  %v3037_v25 = vpack.c.bf16 %v2945_v40, %v2942_v21 }
 0x910   :  { %v3036_v61 = vpack.c.bf16 %v2937_v4, %v2934_v37 }
 0x911   :  { %v2726_v22 = vpop.f32.mrb[152].mxu0 }
 0x912   :  { %v2728_v47 = vpop.f32.mrb[153].mxu0  ;;  %v4931_v57 = vpop.f32.mrb[152].mxu1  ;;  %4521 = vmatprep.subr.bf16.mxu0 %v3036_v61  ;;  %v2727_v58 = vadd.f32 %v2726_v22, %v8049_v19 }
 0x913   :  { %v2730_v30 = vpop.f32.mrb[154].mxu0  ;;  %v2949_v24 = vpop.f32.mrb[153].mxu1  ;;  %4522 = vmatpush3.bf16.msra.mxu0 %v3028_v43  ;;  %v7449_v55 = vadd.f32 %v2728_v47, %v8050_v32  ;;  %v2958_v21 = vadd.f32 %v4931_v57, %v8051_v60 }
 0x914   :  { %v2731_v23 = vadd.f32 %v2730_v30, %v8049_v19  ;;  %v2732_v13 = vpop.f32.mrb[155].mxu0  ;;  %v4932_v33 = vpop.f32.mrb[154].mxu1  ;;  %4523 = vmatprep.subr.bf16.mxu0 %v3037_v25  ;;  %v2950_v27 = vadd.f32 %v2949_v24, %v8051_v60 }
 0x915   :  { %v7453_v40 = vadd.f32 %v2732_v13, %v8050_v32  ;;  %v2961_v44 = vadd.f32 %v4932_v33, %v8051_v60  ;;  %v2952_v37 = vpop.f32.mrb[155].mxu1 }
 0x916   :  { %v7456_v56 = vpack.c.bf16 %v2731_v23, %v2727_v58  ;;  %v2953_v43 = vadd.f32 %v2952_v37, %v8051_v60 }
 0x917   :  { %v3017_v4 = vpack.c.bf16 %v7453_v40, %v7449_v55  ;;  %v3039_v25 = vpack.c.bf16 %v2961_v44, %v2958_v21  ;;  %4524 = vmatpush3.bf16.msra.mxu0 %v3029_v62 }
 0x918   :  { %v3038_v61 = vpack.c.bf16 %v2953_v43, %v2950_v27 }
 0x919   :  { %v2736_v22 = vpop.f32.mrb[156].mxu0 }
 0x91a   :  { %v2738_v47 = vpop.f32.mrb[157].mxu0  ;;  %v4935_v57 = vpop.f32.mrb[156].mxu1  ;;  %4525 = vmatprep.subr.bf16.mxu0 %v3038_v61  ;;  %v2737_v24 = vadd.f32 %v2736_v22, %v8049_v19 }
 0x91b   :  { %v2740_v30 = vpop.f32.mrb[158].mxu0  ;;  %v2965_v58 = vpop.f32.mrb[157].mxu1  ;;  %4526 = vmatpush3.bf16.msra.mxu0 %v3030_v7  ;;  %v7471_v42 = vadd.f32 %v2738_v47, %v8050_v32  ;;  %v2974_v20 = vadd.f32 %v4935_v57, %v8051_v60 }
 0x91c   :  { %v2741_v23 = vadd.f32 %v2740_v30, %v8049_v19  ;;  %v2742_v13 = vpop.f32.mrb[159].mxu0  ;;  %v4936_v33 = vpop.f32.mrb[158].mxu1  ;;  %4527 = vmatprep.subr.bf16.mxu0 %v3039_v25  ;;  %v2966_v38 = vadd.f32 %v2965_v58, %v8051_v60 }
 0x91d   :  { %v7475_v62 = vadd.f32 %v2742_v13, %v8050_v32  ;;  %v2977_v21 = vadd.f32 %v4936_v33, %v8051_v60  ;;  %v2968_v44 = vpop.f32.mrb[159].mxu1 }
 0x91e   :  { %v7478_v26 = vpack.c.bf16 %v2741_v23, %v2737_v24  ;;  %v2969_v7 = vadd.f32 %v2968_v44, %v8051_v60 }
 0x91f   :  { %v3018_v37 = vpack.c.bf16 %v7475_v62, %v7471_v42  ;;  %v3041_v27 = vpack.c.bf16 %v2977_v21, %v2974_v20  ;;  %4528 = vmatpush3.bf16.msra.mxu0 %v3031_v9  ;;  %v5614_v42 = vld [vmem:[#allocation8 + $0x10] sm:$0xff]   ;;  %v5616_v62 = vld [vmem:[#allocation8 + $0x20] sm:$0xff]  }
 0x920   :  { %v3040_v43 = vpack.c.bf16 %v2969_v7, %v2966_v38 }
 0x921   :  { %v2746_v25 = vpop.f32.mrb[160].mxu0 }
 0x922   :  { %v2748_v61 = vpop.f32.mrb[161].mxu0  ;;  %v4939_v22 = vpop.f32.mrb[160].mxu1  ;;  %4529 = vmatprep.subr.bf16.mxu0 %v3040_v43  ;;  %v2747_v30 = vadd.f32 %v2746_v25, %v8049_v19 }
 0x923   :  { %v2750_v47 = vpop.f32.mrb[162].mxu0  ;;  %v2981_v57 = vpop.f32.mrb[161].mxu1  ;;  %4530 = vmatpush3.bf16.msra.mxu0 %v3032_v39  ;;  %v7493_v0 = vadd.f32 %v2748_v61, %v8050_v32  ;;  %v2990_v8 = vadd.f32 %v4939_v22, %v8051_v60 }
 0x924   :  { %v2751_v58 = vadd.f32 %v2750_v47, %v8049_v19  ;;  %v2752_v24 = vpop.f32.mrb[163].mxu0  ;;  %v4940_v23 = vpop.f32.mrb[162].mxu1  ;;  %4531 = vmatprep.subr.bf16.mxu0 %v3041_v27  ;;  %v2982_v1 = vadd.f32 %v2981_v57, %v8051_v60 }
 0x925   :  { %v7497_v9 = vadd.f32 %v2752_v24, %v8050_v32  ;;  %v2993_v13 = vadd.f32 %v4940_v23, %v8051_v60  ;;  %v2984_v33 = vpop.f32.mrb[163].mxu1 }
 0x926   :  { %v7500_v11 = vpack.c.bf16 %v2751_v58, %v2747_v30  ;;  %v2985_v39 = vadd.f32 %v2984_v33, %v8051_v60 }
 0x927   :  { %v3019_v20 = vpack.c.bf16 %v7497_v9, %v7493_v0  ;;  %v3043_v21 = vpack.c.bf16 %v2993_v13, %v2990_v8  ;;  %4532 = vmatpush3.bf16.msra.mxu0 %v3033_v46 }
 0x928   :  { %v3042_v44 = vpack.c.bf16 %v2985_v39, %v2982_v1 }
 0x929   :  { %v2756_v38 = vpop.f32.mrb[164].mxu0 }
 0x92a   :  { %v2758_v7 = vpop.f32.mrb[165].mxu0  ;;  %4533 = vmatprep.subr.bf16.mxu0 %v3042_v44  ;;  %v2757_v43 = vadd.f32 %v2756_v38, %v8049_v19 }
 0x92b   :  { %v2760_v27 = vpop.f32.mrb[166].mxu0  ;;  %4534 = vmatpush3.bf16.msra.mxu0 %v3034_v54  ;;  %v2759_v61 = vadd.f32 %v2758_v7, %v8050_v32 }
 0x92c   :  { %v2761_v60 = vadd.f32 %v2760_v27, %v8049_v19  ;;  %v2762_v25 = vpop.f32.mrb[167].mxu0  ;;  %4535 = vmatprep.subr.bf16.mxu0 %v3043_v21 }
 0x92d   :  { %v2763_v41 = vadd.f32 %v2762_v25, %v8050_v32 }
 0x92e   :  { %v7516_v35 = vpack.c.bf16 %v2761_v60, %v2757_v43 }
 0x92f   :  { %v3020_v46 = vpack.c.bf16 %v2763_v41, %v2759_v61  ;;  %4536 = vmatpush3.bf16.msra.mxu0 %v3035_v15 }
 0x931   :  { %v2766_v22 = vpop.f32.mrb[168].mxu0  ;;  %4473 = vmatprep.subr.bf16.mxu1 %v3020_v46 }
 0x932   :  { %v2768_v50 = vpop.f32.mrb[169].mxu0  ;;  %4474 = vmatpush3.bf16.xpose.msra.mxu1 %v3012_v18  ;;  %v2767_v54 = vadd.f32 %v2766_v22, %v8049_v19 }
 0x933   :  { %v2770_v49 = vpop.f32.mrb[170].mxu0  ;;  %v2769_v30 = vadd.f32 %v2768_v50, %v8050_v32 }
 0x934   :  { %v2771_v47 = vadd.f32 %v2770_v49, %v8049_v19  ;;  %v2772_v57 = vpop.f32.mrb[171].mxu0 }
 0x935   :  { %v2773_v58 = vadd.f32 %v2772_v57, %v8050_v32 }
 0x936   :  { %v7528_v24 = vpack.c.bf16 %v2771_v47, %v2767_v54 }
 0x937   :  { %v3021_v53 = vpack.c.bf16 %v2773_v58, %v2769_v30 }
 0x939   :  { %v2776_v10 = vpop.f32.mrb[172].mxu0  ;;  %4475 = vmatprep.subr.bf16.mxu1 %v3021_v53 }
 0x93a   :  { %v2778_v15 = vpop.f32.mrb[173].mxu0  ;;  %4476 = vmatpush3.bf16.xpose.msra.mxu1 %v3013_v59  ;;  %v2777_v52 = vadd.f32 %v2776_v10, %v8049_v19 }
 0x93b   :  { %v2780_v3 = vpop.f32.mrb[174].mxu0  ;;  %v2779_v8 = vadd.f32 %v2778_v15, %v8050_v32 }
 0x93c   :  { %v2781_v18 = vadd.f32 %v2780_v3, %v8049_v19  ;;  %v2782_v23 = vpop.f32.mrb[175].mxu0 }
 0x93d   :  { %v2783_v13 = vadd.f32 %v2782_v23, %v8050_v32 }
 0x93e   :  { %v7537_v33 = vpack.c.bf16 %v2781_v18, %v2777_v52 }
 0x93f   :  { %v3022_v1 = vpack.c.bf16 %v2783_v13, %v2779_v8 }
 0x941   :  { %v2786_v39 = vpop.f32.mrb[176].mxu0  ;;  %4477 = vmatprep.subr.bf16.mxu1 %v3022_v1 }
 0x942   :  { %v2788_v21 = vpop.f32.mrb[177].mxu0  ;;  %4478 = vmatpush3.bf16.xpose.msra.mxu1 %v3014_v29  ;;  %v2787_v5 = vadd.f32 %v2786_v39, %v8049_v19 }
 0x943   :  { %v2790_v16 = vpop.f32.mrb[178].mxu0  ;;  %v2789_v38 = vadd.f32 %v2788_v21, %v8050_v32 }
 0x944   :  { %v2791_v59 = vadd.f32 %v2790_v16, %v8049_v19  ;;  %v2792_v44 = vpop.f32.mrb[179].mxu0 }
 0x945   :  { %v2793_v7 = vadd.f32 %v2792_v44, %v8050_v32  ;;  %v5612_v44 = vld [vmem:[#allocation8] sm:$0xff]  }
 0x946   :  { %v7546_v27 = vpack.c.bf16 %v2791_v59, %v2787_v5 }
 0x947   :  { %v3023_v43 = vpack.c.bf16 %v2793_v7, %v2789_v38 }
 0x949   :  { %v2796_v60 = vpop.f32.mrb[180].mxu0  ;;  %4479 = vmatprep.subr.bf16.mxu1 %v3023_v43 }
 0x94a   :  { %v2798_v25 = vpop.f32.mrb[181].mxu0  ;;  %4480 = vmatpush3.bf16.xpose.msra.mxu1 %v3015_v12  ;;  %v2797_v51 = vadd.f32 %v2796_v60, %v8049_v19 }
 0x94b   :  { %v2800_v14 = vpop.f32.mrb[182].mxu0  ;;  %v2799_v41 = vadd.f32 %v2798_v25, %v8050_v32 }
 0x94c   :  { %v2801_v29 = vadd.f32 %v2800_v14, %v8049_v19  ;;  %v2802_v61 = vpop.f32.mrb[183].mxu0 }
 0x94d   :  { %v2803_v46 = vadd.f32 %v2802_v61, %v8050_v32 }
 0x94e   :  { %v7555_v22 = vpack.c.bf16 %v2801_v29, %v2797_v51 }
 0x94f   :  { %v3024_v50 = vpack.c.bf16 %v2803_v46, %v2799_v41 }
 0x951   :  { %v2806_v49 = vpop.f32.mrb[184].mxu0  ;;  %4481 = vmatprep.subr.bf16.mxu1 %v3024_v50 }
 0x952   :  { %v2808_v54 = vpop.f32.mrb[185].mxu0  ;;  %4482 = vmatpush3.bf16.xpose.msra.mxu1 %v3016_v34  ;;  %v2807_v31 = vadd.f32 %v2806_v49, %v8049_v19 }
 0x953   :  { %v2810_v6 = vpop.f32.mrb[186].mxu0  ;;  %v2809_v57 = vadd.f32 %v2808_v54, %v8050_v32 }
 0x954   :  { %v2811_v12 = vadd.f32 %v2810_v6, %v8049_v19  ;;  %v2812_v47 = vpop.f32.mrb[187].mxu0 }
 0x955   :  { %v2813_v30 = vadd.f32 %v2812_v47, %v8050_v32 }
 0x956   :  { %v7564_v58 = vpack.c.bf16 %v2811_v12, %v2807_v31 }
 0x957   :  { %v3025_v53 = vpack.c.bf16 %v2813_v30, %v2809_v57 }
 0x959   :  { %v2816_v10 = vpop.f32.mrb[188].mxu0  ;;  %4483 = vmatprep.subr.bf16.mxu1 %v3025_v53 }
 0x95a   :  { %v2818_v15 = vpop.f32.mrb[189].mxu0  ;;  %4484 = vmatpush3.bf16.xpose.msra.mxu1 %v3017_v4  ;;  %v2817_v2 = vadd.f32 %v2816_v10, %v8049_v19 }
 0x95b   :  { %v2820_v63 = vpop.f32.mrb[190].mxu0  ;;  %v2819_v52 = vadd.f32 %v2818_v15, %v8050_v32 }
 0x95c   :  { %v2821_v34 = vadd.f32 %v2820_v63, %v8049_v19  ;;  %v2822_v3 = vpop.f32.mrb[191].mxu0 }
 0x95d   :  { %v2823_v18 = vadd.f32 %v2822_v3, %v8050_v32 }
 0x95e   :  { %v7573_v23 = vpack.c.bf16 %v2821_v34, %v2817_v2 }
 0x95f   :  { %v3026_v8 = vpack.c.bf16 %v2823_v18, %v2819_v52 }
 0x961   :  { %v2826_v13 = vpop.f32.mrb[192].mxu0  ;;  %4485 = vmatprep.subr.bf16.mxu1 %v3026_v8 }
 0x962   :  { %v2828_v1 = vpop.f32.mrb[193].mxu0  ;;  %4486 = vmatpush3.bf16.xpose.msra.mxu1 %v3018_v37  ;;  %v2827_v40 = vadd.f32 %v2826_v13, %v8049_v19  ;;  %v5618_v37 = vld [vmem:[#allocation8 + $0x30] sm:$0xff]  }
 0x963   :  { %v2830_v55 = vpop.f32.mrb[194].mxu0  ;;  %v2829_v21 = vadd.f32 %v2828_v1, %v8050_v32 }
 0x964   :  { %v2831_v4 = vadd.f32 %v2830_v55, %v8049_v19  ;;  %v2832_v39 = vpop.f32.mrb[195].mxu0  ;;  %v5613_v19 = vld [vmem:[#allocation8 + $0x8] sm:$0xff]  }
 0x965   :  { %v2833_v16 = vadd.f32 %v2832_v39, %v8050_v32  ;;  %v5615_v32 = vld [vmem:[#allocation8 + $0x18] sm:$0xff]  }
 0x966   :  { %v3011_v5 = vpack.c.bf16 %v2831_v4, %v2827_v40 }
 0x967   :  { %v3027_v59 = vpack.c.bf16 %v2833_v16, %v2829_v21 }
 0x969   :  { %4487 = vmatprep.subr.bf16.mxu1 %v3027_v59 }
 0x96a   :  { %4488 = vmatpush3.bf16.xpose.msra.mxu1 %v3019_v20 }
 0x96b   :  { %4941 = vmatprep.subr.bf16.mxu1 %v5612_v44 }
 0x971   :  { %4490 = vmatmul.mubr.bf16.vlgmr.msra.gmra.mrb[164].mxu1 %v7328_v45  ;;  %v5617_v45 = vld [vmem:[#allocation8 + $0x28] sm:$0xff]  }
 0x972   :  { %4491 = vmatprep.mubr.bf16.mxu1 %v7357_v17  ;;  %4942 = vmatpush3.bf16.msra.mxu1 %v5612_v44 }
 0x973   :  { %4943 = vmatprep.subr.bf16.mxu1 %v5613_v19 }
 0x976   :  { %4944 = vmatpush3.bf16.msra.mxu1 %v5613_v19 }
 0x977   :  { %4945 = vmatprep.subr.bf16.mxu1 %v5614_v42 }
 0x979   :  { %4492 = vmatmul.mubr.bf16.gmra.mrb[168].mxu1 %v7357_v17  ;;  %v5619_v17 = vld [vmem:[#allocation8 + $0x38] sm:$0xff]  }
 0x97a   :  { %4493 = vmatprep.mubr.bf16.mxu1 %v7385_v36  ;;  %4946 = vmatpush3.bf16.msra.mxu1 %v5614_v42 }
 0x97b   :  { %4947 = vmatprep.subr.bf16.mxu1 %v5615_v32 }
 0x97e   :  { %4948 = vmatpush3.bf16.msra.mxu1 %v5615_v32 }
 0x97f   :  { %4949 = vmatprep.subr.bf16.mxu1 %v5616_v62 }
 0x981   :  { %4494 = vmatmul.mubr.bf16.gmra.mrb[172].mxu1 %v7385_v36 }
 0x982   :  { %4495 = vmatprep.mubr.bf16.mxu1 %v7413_v28  ;;  %4950 = vmatpush3.bf16.msra.mxu1 %v5616_v62 }
 0x983   :  { %4951 = vmatprep.subr.bf16.mxu1 %v5617_v45 }
 0x986   :  { %4952 = vmatpush3.bf16.msra.mxu1 %v5617_v45 }
 0x987   :  { %4953 = vmatprep.subr.bf16.mxu1 %v5618_v37 }
 0x989   :  { %4496 = vmatmul.mubr.bf16.gmra.mrb[176].mxu1 %v7413_v28 }
 0x98a   :  { %4497 = vmatprep.mubr.bf16.mxu1 %v7437_v48  ;;  %4954 = vmatpush3.bf16.msra.mxu1 %v5618_v37 }
 0x98b   :  { %4955 = vmatprep.subr.bf16.mxu1 %v5619_v17 }
 0x98e   :  { %4956 = vmatpush3.bf16.msra.mxu1 %v5619_v17 }
 0x991   :  { %4498 = vmatmul.mubr.bf16.gmra.mrb[180].mxu1 %v7437_v48 }
 0x992   :  { %4499 = vmatprep.mubr.bf16.mxu1 %v7456_v56 }
 0x999   :  { %4500 = vmatmul.mubr.bf16.gmra.mrb[184].mxu1 %v7456_v56 }
 0x99a   :  { %4501 = vmatprep.mubr.bf16.mxu1 %v7478_v26 }
 0x9a1   :  { %4502 = vmatmul.mubr.bf16.gmra.mrb[188].mxu1 %v7478_v26 }
 0x9a2   :  { %4503 = vmatprep.mubr.bf16.mxu1 %v7500_v11 }
 0x9a9   :  { %4504 = vmatmul.mubr.bf16.gmra.mrb[192].mxu1 %v7500_v11 }
 0x9aa   :  { %4505 = vmatprep.mubr.bf16.mxu1 %v7516_v35 }
 0x9b1   :  { %4506 = vmatmul.mubr.bf16.gmra.mrb[196].mxu1 %v7516_v35 }
 0x9b2   :  { %4507 = vmatprep.mubr.bf16.mxu1 %v7528_v24 }
 0x9b9   :  { %4508 = vmatmul.mubr.bf16.gmra.mrb[200].mxu1 %v7528_v24 }
 0x9ba   :  { %4509 = vmatprep.mubr.bf16.mxu1 %v7537_v33 }
 0x9c1   :  { %4510 = vmatmul.mubr.bf16.gmra.mrb[204].mxu1 %v7537_v33 }
 0x9c2   :  { %4511 = vmatprep.mubr.bf16.mxu1 %v7546_v27 }
 0x9c9   :  { %4512 = vmatmul.mubr.bf16.gmra.mrb[208].mxu1 %v7546_v27 }
 0x9ca   :  { %4513 = vmatprep.mubr.bf16.mxu1 %v7555_v22 }
 0x9d1   :  { %4514 = vmatmul.mubr.bf16.gmra.mrb[212].mxu1 %v7555_v22 }
 0x9d2   :  { %4515 = vmatprep.mubr.bf16.mxu1 %v7564_v58 }
 0x9d9   :  { %4516 = vmatmul.mubr.bf16.gmra.mrb[216].mxu1 %v7564_v58 }
 0x9da   :  { %4517 = vmatprep.mubr.bf16.mxu1 %v7573_v23 }
 0x9e1   :  { %4518 = vmatmul.mubr.bf16.gmra.mrb[220].mxu1 %v7573_v23 }
 0x9e2   :  { %4519 = vmatprep.mubr.bf16.mxu1 %v3011_v5 }
 0x9e9   :  { %4520 = vmatmul.mubr.bf16.gmra.mrb[224].mxu1 %v3011_v5 }
 0xa44   :  { %v7614_v36 = vpop.f32.mrb[164].mxu1 }
 0xa45   :  { %v7616_v28 = vpop.f32.mrb[165].mxu1 }
 0xa46   :  { %v7618_v48 = vpop.f32.mrb[166].mxu1  ;;  %v3237_v56 = vmax.f32 %v7614_v36, %v7616_v28 }
 0xa47   :  { %v7622_v26 = vpop.f32.mrb[167].mxu1 }
 0xa48   :  { %3238 = vmax.xlane.f32.xlu0 %v3237_v56  ;;  %v3240_v0 = vmax.f32 %v7618_v48, %v7622_v26 }
 0xa4a   :  { %3241 = vmax.xlane.f32.xlu1 %v3240_v0 }
 0xa4c   :  { %v7626_v9 = vpop.f32.mrb[168].mxu1 }
 0xa4d   :  { %v7628_v11 = vpop.f32.mrb[169].mxu1 }
 0xa4e   :  { %v7630_v20 = vpop.f32.mrb[170].mxu1  ;;  %v3243_v35 = vmax.f32 %v7626_v9, %v7628_v11 }
 0xa4f   :  { %v7634_v24 = vpop.f32.mrb[171].mxu1 }
 0xa50   :  { %3244 = vmax.xlane.f32.xlu0 %v3243_v35  ;;  %v3246_v33 = vmax.f32 %v7630_v20, %v7634_v24 }
 0xa52   :  { %3247 = vmax.xlane.f32.xlu1 %v3246_v33 }
 0xa54   :  { %v7638_v38 = vpop.f32.mrb[172].mxu1 }
 0xa55   :  { %v7640_v7 = vpop.f32.mrb[173].mxu1 }
 0xa56   :  { %v7642_v27 = vpop.f32.mrb[174].mxu1  ;;  %v3249_v43 = vmax.f32 %v7638_v38, %v7640_v7 }
 0xa57   :  { %v7646_v60 = vpop.f32.mrb[175].mxu1 }
 0xa58   :  { %3250 = vmax.xlane.f32.xlu0 %v3249_v43  ;;  %v3252_v25 = vmax.f32 %v7642_v27, %v7646_v60 }
 0xa5a   :  { %3253 = vmax.xlane.f32.xlu1 %v3252_v25 }
 0xa5c   :  { %v7650_v14 = vpop.f32.mrb[176].mxu1 }
 0xa5d   :  { %v7652_v51 = vpop.f32.mrb[177].mxu1 }
 0xa5e   :  { %v7654_v29 = vpop.f32.mrb[178].mxu1  ;;  %v3255_v61 = vmax.f32 %v7650_v14, %v7652_v51 }
 0xa5f   :  { %v7658_v41 = vpop.f32.mrb[179].mxu1 }
 0xa60   :  { %3256 = vmax.xlane.f32.xlu0 %v3255_v61  ;;  %v3258_v46 = vmax.f32 %v7654_v29, %v7658_v41 }
 0xa62   :  { %3259 = vmax.xlane.f32.xlu1 %v3258_v46 }
 0xa64   :  { %v7662_v22 = vpop.f32.mrb[180].mxu1 }
 0xa65   :  { %v7664_v50 = vpop.f32.mrb[181].mxu1 }
 0xa66   :  { %v7666_v49 = vpop.f32.mrb[182].mxu1  ;;  %v3261_v54 = vmax.f32 %v7662_v22, %v7664_v50 }
 0xa67   :  { %v7670_v6 = vpop.f32.mrb[183].mxu1 }
 0xa68   :  { %3262 = vmax.xlane.f32.xlu0 %v3261_v54  ;;  %v3264_v31 = vmax.f32 %v7666_v49, %v7670_v6 }
 0xa6a   :  { %3265 = vmax.xlane.f32.xlu1 %v3264_v31 }
 0xa6c   :  { %v7674_v12 = vpop.f32.mrb[184].mxu1 }
 0xa6d   :  { %v7676_v47 = vpop.f32.mrb[185].mxu1 }
 0xa6e   :  { %v7678_v57 = vpop.f32.mrb[186].mxu1  ;;  %v3267_v30 = vmax.f32 %v7674_v12, %v7676_v47 }
 0xa6f   :  { %v7682_v58 = vpop.f32.mrb[187].mxu1 }
 0xa70   :  { %3268 = vmax.xlane.f32.xlu0 %v3267_v30  ;;  %v3270_v53 = vmax.f32 %v7678_v57, %v7682_v58 }
 0xa72   :  { %3271 = vmax.xlane.f32.xlu1 %v3270_v53 }
 0xa74   :  { %v7686_v10 = vpop.f32.mrb[188].mxu1 }
 0xa75   :  { %v7688_v15 = vpop.f32.mrb[189].mxu1 }
 0xa76   :  { %v7690_v63 = vpop.f32.mrb[190].mxu1  ;;  %v3273_v2 = vmax.f32 %v7686_v10, %v7688_v15 }
 0xa77   :  { %v7694_v34 = vpop.f32.mrb[191].mxu1 }
 0xa78   :  { %3274 = vmax.xlane.f32.xlu0 %v3273_v2  ;;  %v3276_v3 = vmax.f32 %v7690_v63, %v7694_v34 }
 0xa7a   :  { %3277 = vmax.xlane.f32.xlu1 %v3276_v3 }
 0xa7c   :  { %v7698_v52 = vpop.f32.mrb[192].mxu1 }
 0xa7d   :  { %v7700_v18 = vpop.f32.mrb[193].mxu1 }
 0xa7e   :  { %v7702_v23 = vpop.f32.mrb[194].mxu1  ;;  %v3279_v8 = vmax.f32 %v7698_v52, %v7700_v18 }
 0xa7f   :  { %v7706_v13 = vpop.f32.mrb[195].mxu1 }
 0xa80   :  { %3280 = vmax.xlane.f32.xlu0 %v3279_v8  ;;  %v3282_v1 = vmax.f32 %v7702_v23, %v7706_v13 }
 0xa82   :  { %3283 = vmax.xlane.f32.xlu1 %v3282_v1 }
 0xa84   :  { %v7710_v55 = vpop.f32.mrb[196].mxu1 }
 0xa85   :  { %v7712_v40 = vpop.f32.mrb[197].mxu1 }
 0xa86   :  { %v7714_v4 = vpop.f32.mrb[198].mxu1  ;;  %v3285_v39 = vmax.f32 %v7710_v55, %v7712_v40 }
 0xa87   :  { %v7718_v21 = vpop.f32.mrb[199].mxu1 }
 0xa88   :  { %3286 = vmax.xlane.f32.xlu0 %v3285_v39  ;;  %v3288_v16 = vmax.f32 %v7714_v4, %v7718_v21 }
 0xa8a   :  { %3289 = vmax.xlane.f32.xlu1 %v3288_v16 }
 0xa8c   :  { %v7722_v5 = vpop.f32.mrb[200].mxu1 }
 0xa8d   :  { %v7724_v59 = vpop.f32.mrb[201].mxu1 }
 0xa8e   :  { %v7726_v44 = vpop.f32.mrb[202].mxu1  ;;  %v3291_v19 = vmax.f32 %v7722_v5, %v7724_v59 }
 0xa8f   :  { %v7730_v42 = vpop.f32.mrb[203].mxu1 }
 0xa90   :  { %3292 = vmax.xlane.f32.xlu0 %v3291_v19  ;;  %v3294_v32 = vmax.f32 %v7726_v44, %v7730_v42 }
 0xa92   :  { %3295 = vmax.xlane.f32.xlu1 %v3294_v32 }
 0xa94   :  { %v7734_v62 = vpop.f32.mrb[204].mxu1 }
 0xa95   :  { %v7736_v45 = vpop.f32.mrb[205].mxu1 }
 0xa96   :  { %v7738_v37 = vpop.f32.mrb[206].mxu1  ;;  %v3297_v17 = vmax.f32 %v7734_v62, %v7736_v45 }
 0xa97   :  { %v7742_v56 = vpop.f32.mrb[207].mxu1 }
 0xa98   :  { %3298 = vmax.xlane.f32.xlu0 %v3297_v17  ;;  %v3300_v0 = vmax.f32 %v7738_v37, %v7742_v56 }
 0xa9a   :  { %3301 = vmax.xlane.f32.xlu1 %v3300_v0 }
 0xa9c   :  { %v7746_v35 = vpop.f32.mrb[208].mxu1 }
 0xa9d   :  { %v7748_v33 = vpop.f32.mrb[209].mxu1 }
 0xa9e   :  { %v7750_v43 = vpop.f32.mrb[210].mxu1  ;;  %v3303_v25 = vmax.f32 %v7746_v35, %v7748_v33 }
 0xa9f   :  { %v7754_v61 = vpop.f32.mrb[211].mxu1 }
 0xaa0   :  { %3304 = vmax.xlane.f32.xlu0 %v3303_v25  ;;  %v3306_v46 = vmax.f32 %v7750_v43, %v7754_v61 }
 0xaa2   :  { %3307 = vmax.xlane.f32.xlu1 %v3306_v46 }
 0xaa4   :  { %v7758_v54 = vpop.f32.mrb[212].mxu1 }
 0xaa5   :  { %v7760_v31 = vpop.f32.mrb[213].mxu1 }
 0xaa6   :  { %v7762_v30 = vpop.f32.mrb[214].mxu1  ;;  %v3309_v53 = vmax.f32 %v7758_v54, %v7760_v31 }
 0xaa7   :  { %8052 = vst [vmem:[#allocation19_spill] sm:$0xff] %v7762_v30  ;;  %v7766_v2 = vpop.f32.mrb[215].mxu1 }
 0xaa8   :  { %8053 = vst [vmem:[#allocation20_spill] sm:$0xff] %v7766_v2  ;;  %3310 = vmax.xlane.f32.xlu0 %v3309_v53  ;;  %v3312_v3 = vmax.f32 %v7762_v30, %v7766_v2 }
 0xaaa   :  { %3313 = vmax.xlane.f32.xlu1 %v3312_v3 }
 0xaac   :  { %v7770_v8 = vpop.f32.mrb[216].mxu1 }
 0xaad   :  { %8054 = vst [vmem:[#allocation21_spill] sm:$0xff] %v7770_v8  ;;  %v7772_v1 = vpop.f32.mrb[217].mxu1 }
 0xaae   :  { %8055 = vst [vmem:[#allocation22_spill] sm:$0xff] %v7772_v1  ;;  %v7774_v39 = vpop.f32.mrb[218].mxu1  ;;  %v3315_v16 = vmax.f32 %v7770_v8, %v7772_v1 }
 0xaaf   :  { %8056 = vst [vmem:[#allocation23_spill] sm:$0xff] %v7774_v39  ;;  %v7778_v19 = vpop.f32.mrb[219].mxu1 }
 0xab0   :  { %8057 = vst [vmem:[#allocation24_spill] sm:$0xff] %v7778_v19  ;;  %3316 = vmax.xlane.f32.xlu0 %v3315_v16  ;;  %v3318_v32 = vmax.f32 %v7774_v39, %v7778_v19 }
 0xab2   :  { %3319 = vmax.xlane.f32.xlu1 %v3318_v32 }
 0xab4   :  { %v7782_v17 = vpop.f32.mrb[220].mxu1 }
 0xab5   :  { %8058 = vst [vmem:[#allocation25_spill] sm:$0xff] %v7782_v17  ;;  %v7784_v0 = vpop.f32.mrb[221].mxu1 }
 0xab6   :  { %8059 = vst [vmem:[#allocation26_spill] sm:$0xff] %v7784_v0  ;;  %v7786_v25 = vpop.f32.mrb[222].mxu1  ;;  %v3321_v46 = vmax.f32 %v7782_v17, %v7784_v0 }
 0xab7   :  { %8060 = vst [vmem:[#allocation27_spill] sm:$0xff] %v7786_v25  ;;  %v7790_v53 = vpop.f32.mrb[223].mxu1 }
 0xab8   :  { %8061 = vst [vmem:[#allocation28_spill] sm:$0xff] %v7790_v53  ;;  %3322 = vmax.xlane.f32.xlu0 %v3321_v46  ;;  %v3324_v3 = vmax.f32 %v7786_v25, %v7790_v53 }
 0xaba   :  { %3325 = vmax.xlane.f32.xlu1 %v3324_v3 }
 0xabc   :  { %v7794_v16 = vpop.f32.mrb[224].mxu1 }
 0xabd   :  { %8062 = vst [vmem:[#allocation29_spill] sm:$0xff] %v7794_v16  ;;  %v7796_v19 = vpop.f32.mrb[225].mxu1 }
 0xabe   :  { %8063 = vst [vmem:[#allocation30_spill] sm:$0xff] %v7796_v19  ;;  %v7798_v32 = vpop.f32.mrb[226].mxu1  ;;  %v3327_v39 = vmax.f32 %v7794_v16, %v7796_v19 }
 0xabf   :  { %v7802_v1 = vpop.f32.mrb[227].mxu1 }
 0xac0   :  { %8064 = vst [vmem:[#allocation31_spill] sm:$0xff] %v7802_v1  ;;  %3328 = vmax.xlane.f32.xlu0 %v3327_v39  ;;  %v3330_v0 = vmax.f32 %v7798_v32, %v7802_v1 }
 0xac2   :  { %3331 = vmax.xlane.f32.xlu1 %v3330_v0 }
 0xad5   :  { %v3239_v46 = vpop.xlane.xlu0 %3238 }
 0xad6   :  { %v3333_v53 = vsub.f32 %v7614_v36, %v3239_v46  ;;  %v3334_v3 = vsub.f32 %v7616_v28, %v3239_v46 }
 0xad7   :  { %v3242_v25 = vpop.xlane.xlu1 %3241 }
 0xad8   :  { %v3397_v17 = vmul.f32 1.442695, %v3333_v53  ;;  %v3399_v8 = vmul.f32 1.442695, %v3334_v3  ;;  %v3335_v2 = vsub.f32 %v7618_v48, %v3242_v25  ;;  %v3336_v30 = vsub.f32 %v7622_v26, %v3242_v25 }
 0xada   :  { %5336 = vpow2.f32 %v3397_v17  ;;  %v3401_v19 = vmul.f32 1.442695, %v3335_v2  ;;  %v3403_v16 = vmul.f32 1.442695, %v3336_v30 }
 0xadb   :  { %5338 = vpow2.f32 %v3399_v8 }
 0xadc   :  { %5340 = vpow2.f32 %v3401_v19 }
 0xadd   :  { %5342 = vpow2.f32 %v3403_v16  ;;  %v3245_v39 = vpop.xlane.xlu0 %3244 }
 0xade   :  { %v3337_v0 = vsub.f32 %v7626_v9, %v3245_v39  ;;  %v3338_v36 = vsub.f32 %v7628_v11, %v3245_v39 }
 0xadf   :  { %v3248_v1 = vpop.xlane.xlu1 %3247 }
 0xae0   :  { %v3405_v28 = vmul.f32 1.442695, %v3337_v0  ;;  %v3407_v46 = vmul.f32 1.442695, %v3338_v36  ;;  %v3339_v53 = vsub.f32 %v7630_v20, %v3248_v1  ;;  %v3340_v48 = vsub.f32 %v7634_v24, %v3248_v1 }
 0xae2   :  { %5344 = vpow2.f32 %v3405_v28  ;;  %v3409_v26 = vmul.f32 1.442695, %v3339_v53  ;;  %v3411_v17 = vmul.f32 1.442695, %v3340_v48 }
 0xae3   :  { %5346 = vpow2.f32 %v3407_v46 }
 0xae4   :  { %v5337_v30 = vpop.eup %5336  ;;  %5348 = vpow2.f32 %v3409_v26 }
 0xae5   :  { %v5339_v2 = vpop.eup %5338  ;;  %5350 = vpow2.f32 %v3411_v17  ;;  %v3251_v8 = vpop.xlane.xlu0 %3250 }
 0xae6   :  { %v5341_v19 = vpop.eup %5340  ;;  %v3341_v9 = vsub.f32 %v7638_v38, %v3251_v8  ;;  %v3342_v11 = vsub.f32 %v7640_v7, %v3251_v8  ;;  %v3525_v25 = vadd.f32 %v5339_v2, %v5337_v30 }
 0xae7   :  { %v5343_v16 = vpop.eup %5342  ;;  %v3254_v3 = vpop.xlane.xlu1 %3253  ;;  %v3621_v20 = vpack.c.bf16 %v5341_v19, %v5337_v30 }
 0xae8   :  { %v3413_v39 = vmul.f32 1.442695, %v3341_v9  ;;  %v3415_v24 = vmul.f32 1.442695, %v3342_v11  ;;  %v3343_v1 = vsub.f32 %v7642_v27, %v3254_v3  ;;  %v3344_v0 = vsub.f32 %v7646_v60, %v3254_v3  ;;  %3526 = vadd.xlane.f32.xlu0 %v3525_v25 }
 0xae9   :  { %v3622_v36 = vpack.c.bf16 %v5343_v16, %v5339_v2  ;;  %v3528_v28 = vadd.f32 %v5343_v16, %v5341_v19 }
 0xaea   :  { %5352 = vpow2.f32 %v3413_v39  ;;  %v3417_v46 = vmul.f32 1.442695, %v3343_v1  ;;  %v3419_v53 = vmul.f32 1.442695, %v3344_v0 }
 0xaeb   :  { %5354 = vpow2.f32 %v3415_v24  ;;  %3685 = vmatprep.mubr.bf16.mxu0 %v3622_v36  ;;  %3529 = vadd.xlane.f32.xlu1 %v3528_v28 }
 0xaec   :  { %v5345_v38 = vpop.eup %5344  ;;  %5356 = vpow2.f32 %v3417_v46  ;;  %3686 = vmatmul.mubr.bf16.vlgmr.msra.gmra.mrb[196].mxu0 %v3621_v20 }
 0xaed   :  { %v5347_v7 = vpop.eup %5346  ;;  %5358 = vpow2.f32 %v3419_v53  ;;  %v3257_v48 = vpop.xlane.xlu0 %3256 }
 0xaee   :  { %v5349_v26 = vpop.eup %5348  ;;  %v3345_v27 = vsub.f32 %v7650_v14, %v3257_v48  ;;  %v3346_v60 = vsub.f32 %v7652_v51, %v3257_v48  ;;  %v3531_v17 = vadd.f32 %v5347_v7, %v5345_v38 }
 0xaef   :  { %v5351_v30 = vpop.eup %5350  ;;  %v3260_v2 = vpop.xlane.xlu1 %3259  ;;  %v3623_v8 = vpack.c.bf16 %v5349_v26, %v5345_v38 }
 0xaf0   :  { %v3421_v19 = vmul.f32 1.442695, %v3345_v27  ;;  %v3423_v9 = vmul.f32 1.442695, %v3346_v60  ;;  %v3347_v11 = vsub.f32 %v7654_v29, %v3260_v2  ;;  %v3348_v25 = vsub.f32 %v7658_v41, %v3260_v2  ;;  %3532 = vadd.xlane.f32.xlu0 %v3531_v17 }
 0xaf1   :  { %v3534_v16 = vadd.f32 %v5351_v30, %v5349_v26  ;;  %v3624_v3 = vpack.c.bf16 %v5351_v30, %v5347_v7 }
 0xaf2   :  { %5360 = vpow2.f32 %v3421_v19  ;;  %v3425_v20 = vmul.f32 1.442695, %v3347_v11  ;;  %v3427_v39 = vmul.f32 1.442695, %v3348_v25 }
 0xaf3   :  { %5362 = vpow2.f32 %v3423_v9  ;;  %3535 = vadd.xlane.f32.xlu1 %v3534_v16  ;;  %3693 = vmatprep.mubr.bf16.mxu0 %v3624_v3 }
 0xaf4   :  { %v5353_v14 = vpop.eup %5352  ;;  %5364 = vpow2.f32 %v3425_v20  ;;  %3694 = vmatmul.mubr.bf16.gmra.mrb[200].mxu0 %v3623_v8 }
 0xaf5   :  { %v5355_v51 = vpop.eup %5354  ;;  %5366 = vpow2.f32 %v3427_v39  ;;  %v3263_v24 = vpop.xlane.xlu0 %3262 }
 0xaf6   :  { %v5357_v1 = vpop.eup %5356  ;;  %v3349_v29 = vsub.f32 %v7662_v22, %v3263_v24  ;;  %v3350_v41 = vsub.f32 %v7664_v50, %v3263_v24  ;;  %v3537_v0 = vadd.f32 %v5355_v51, %v5353_v14 }
 0xaf7   :  { %v5359_v36 = vpop.eup %5358  ;;  %v3266_v28 = vpop.xlane.xlu1 %3265  ;;  %v3625_v46 = vpack.c.bf16 %v5357_v1, %v5353_v14 }
 0xaf8   :  { %v3429_v53 = vmul.f32 1.442695, %v3349_v29  ;;  %v3431_v38 = vmul.f32 1.442695, %v3350_v41  ;;  %v3351_v7 = vsub.f32 %v7666_v49, %v3266_v28  ;;  %v3352_v48 = vsub.f32 %v7670_v6, %v3266_v28  ;;  %3538 = vadd.xlane.f32.xlu0 %v3537_v0 }
 0xaf9   :  { %v3540_v26 = vadd.f32 %v5359_v36, %v5357_v1  ;;  %v3626_v27 = vpack.c.bf16 %v5359_v36, %v5355_v51 }
 0xafa   :  { %5368 = vpow2.f32 %v3429_v53  ;;  %v3433_v60 = vmul.f32 1.442695, %v3351_v7  ;;  %v3435_v17 = vmul.f32 1.442695, %v3352_v48 }
 0xafb   :  { %5370 = vpow2.f32 %v3431_v38  ;;  %3541 = vadd.xlane.f32.xlu1 %v3540_v26  ;;  %3701 = vmatprep.mubr.bf16.mxu0 %v3626_v27 }
 0xafc   :  { %v5361_v22 = vpop.eup %5360  ;;  %5372 = vpow2.f32 %v3433_v60  ;;  %3702 = vmatmul.mubr.bf16.gmra.mrb[204].mxu0 %v3625_v46 }
 0xafd   :  { %v5363_v50 = vpop.eup %5362  ;;  %5374 = vpow2.f32 %v3435_v17  ;;  %v3269_v30 = vpop.xlane.xlu0 %3268 }
 0xafe   :  { %v5365_v2 = vpop.eup %5364  ;;  %v3353_v49 = vsub.f32 %v7674_v12, %v3269_v30  ;;  %v3354_v6 = vsub.f32 %v7676_v47, %v3269_v30  ;;  %v3543_v8 = vadd.f32 %v5363_v50, %v5361_v22 }
 0xaff   :  { %v5367_v19 = vpop.eup %5366  ;;  %v3272_v9 = vpop.xlane.xlu1 %3271  ;;  %v3627_v11 = vpack.c.bf16 %v5365_v2, %v5361_v22 }
 0xb00   :  { %v3437_v25 = vmul.f32 1.442695, %v3353_v49  ;;  %v3439_v16 = vmul.f32 1.442695, %v3354_v6  ;;  %v3355_v3 = vsub.f32 %v7678_v57, %v3272_v9  ;;  %v3356_v20 = vsub.f32 %v7682_v58, %v3272_v9  ;;  %3544 = vadd.xlane.f32.xlu0 %v3543_v8 }
 0xb01   :  { %v3546_v39 = vadd.f32 %v5367_v19, %v5365_v2  ;;  %v3628_v14 = vpack.c.bf16 %v5367_v19, %v5363_v50 }
 0xb02   :  { %5376 = vpow2.f32 %v3437_v25  ;;  %v3441_v51 = vmul.f32 1.442695, %v3355_v3  ;;  %v3443_v24 = vmul.f32 1.442695, %v3356_v20 }
 0xb03   :  { %5378 = vpow2.f32 %v3439_v16  ;;  %3547 = vadd.xlane.f32.xlu1 %v3546_v39  ;;  %3709 = vmatprep.mubr.bf16.mxu0 %v3628_v14 }
 0xb04   :  { %v5369_v12 = vpop.eup %5368  ;;  %5380 = vpow2.f32 %v3441_v51  ;;  %3710 = vmatmul.mubr.bf16.gmra.mrb[208].mxu0 %v3627_v11 }
 0xb05   :  { %v5371_v47 = vpop.eup %5370  ;;  %5382 = vpow2.f32 %v3443_v24  ;;  %v3275_v1 = vpop.xlane.xlu0 %3274 }
 0xb06   :  { %v5373_v29 = vpop.eup %5372  ;;  %v3357_v57 = vsub.f32 %v7686_v10, %v3275_v1  ;;  %v3358_v58 = vsub.f32 %v7688_v15, %v3275_v1  ;;  %v3549_v41 = vadd.f32 %v5371_v47, %v5369_v12 }
 0xb07   :  { %v5375_v0 = vpop.eup %5374  ;;  %v3278_v36 = vpop.xlane.xlu1 %3277  ;;  %v3629_v28 = vpack.c.bf16 %v5373_v29, %v5369_v12 }
 0xb08   :  { %v3445_v46 = vmul.f32 1.442695, %v3357_v57  ;;  %v3447_v53 = vmul.f32 1.442695, %v3358_v58  ;;  %v3359_v38 = vsub.f32 %v7690_v63, %v3278_v36  ;;  %v3360_v7 = vsub.f32 %v7694_v34, %v3278_v36  ;;  %3550 = vadd.xlane.f32.xlu0 %v3549_v41 }
 0xb09   :  { %v3552_v48 = vadd.f32 %v5375_v0, %v5373_v29  ;;  %v3630_v26 = vpack.c.bf16 %v5375_v0, %v5371_v47 }
 0xb0a   :  { %5384 = vpow2.f32 %v3445_v46  ;;  %v3449_v27 = vmul.f32 1.442695, %v3359_v38  ;;  %v3451_v60 = vmul.f32 1.442695, %v3360_v7 }
 0xb0b   :  { %5386 = vpow2.f32 %v3447_v53  ;;  %3553 = vadd.xlane.f32.xlu1 %v3552_v48  ;;  %3717 = vmatprep.mubr.bf16.mxu0 %v3630_v26 }
 0xb0c   :  { %v5377_v10 = vpop.eup %5376  ;;  %5388 = vpow2.f32 %v3449_v27  ;;  %3718 = vmatmul.mubr.bf16.gmra.mrb[212].mxu0 %v3629_v28 }
 0xb0d   :  { %v5379_v15 = vpop.eup %5378  ;;  %5390 = vpow2.f32 %v3451_v60  ;;  %v3281_v17 = vpop.xlane.xlu0 %3280 }
 0xb0e   :  { %v5381_v22 = vpop.eup %5380  ;;  %v3361_v63 = vsub.f32 %v7698_v52, %v3281_v17  ;;  %v3362_v34 = vsub.f32 %v7700_v18, %v3281_v17  ;;  %v3555_v50 = vadd.f32 %v5379_v15, %v5377_v10 }
 0xb0f   :  { %v5383_v30 = vpop.eup %5382  ;;  %v3284_v2 = vpop.xlane.xlu1 %3283  ;;  %v3631_v49 = vpack.c.bf16 %v5381_v22, %v5377_v10 }
 0xb10   :  { %v3453_v6 = vmul.f32 1.442695, %v3361_v63  ;;  %v3455_v8 = vmul.f32 1.442695, %v3362_v34  ;;  %v3363_v19 = vsub.f32 %v7702_v23, %v3284_v2  ;;  %v3364_v9 = vsub.f32 %v7706_v13, %v3284_v2  ;;  %3556 = vadd.xlane.f32.xlu0 %v3555_v50 }
 0xb11   :  { %v3558_v11 = vadd.f32 %v5383_v30, %v5381_v22  ;;  %v3632_v25 = vpack.c.bf16 %v5383_v30, %v5379_v15 }
 0xb12   :  { %5392 = vpow2.f32 %v3453_v6  ;;  %v3457_v16 = vmul.f32 1.442695, %v3363_v19  ;;  %v3459_v3 = vmul.f32 1.442695, %v3364_v9 }
 0xb13   :  { %5394 = vpow2.f32 %v3455_v8  ;;  %3559 = vadd.xlane.f32.xlu1 %v3558_v11  ;;  %3725 = vmatprep.mubr.bf16.mxu0 %v3632_v25 }
 0xb14   :  { %v5385_v52 = vpop.eup %5384  ;;  %5396 = vpow2.f32 %v3457_v16  ;;  %3726 = vmatmul.mubr.bf16.gmra.mrb[216].mxu0 %v3631_v49 }
 0xb15   :  { %v5387_v18 = vpop.eup %5386  ;;  %5398 = vpow2.f32 %v3459_v3  ;;  %v3287_v20 = vpop.xlane.xlu0 %3286 }
 0xb16   :  { %v5389_v39 = vpop.eup %5388  ;;  %v3365_v23 = vsub.f32 %v7710_v55, %v3287_v20  ;;  %v3366_v13 = vsub.f32 %v7712_v40, %v3287_v20  ;;  %v3561_v14 = vadd.f32 %v5387_v18, %v5385_v52 }
 0xb17   :  { %v5391_v51 = vpop.eup %5390  ;;  %v3290_v24 = vpop.xlane.xlu1 %3289  ;;  %v3633_v12 = vpack.c.bf16 %v5389_v39, %v5385_v52 }
 0xb18   :  { %v3461_v47 = vmul.f32 1.442695, %v3365_v23  ;;  %v3463_v1 = vmul.f32 1.442695, %v3366_v13  ;;  %v3367_v29 = vsub.f32 %v7714_v4, %v3290_v24  ;;  %v3368_v57 = vsub.f32 %v7718_v21, %v3290_v24  ;;  %3562 = vadd.xlane.f32.xlu0 %v3561_v14 }
 0xb19   :  { %v3564_v58 = vadd.f32 %v5391_v51, %v5389_v39  ;;  %v3634_v41 = vpack.c.bf16 %v5391_v51, %v5387_v18 }
 0xb1a   :  { %5400 = vpow2.f32 %v3461_v47  ;;  %v3465_v0 = vmul.f32 1.442695, %v3367_v29  ;;  %v3467_v36 = vmul.f32 1.442695, %v3368_v57 }
 0xb1b   :  { %5402 = vpow2.f32 %v3463_v1  ;;  %3565 = vadd.xlane.f32.xlu1 %v3564_v58  ;;  %3733 = vmatprep.mubr.bf16.mxu0 %v3634_v41 }
 0xb1c   :  { %v5393_v55 = vpop.eup %5392  ;;  %5404 = vpow2.f32 %v3465_v0  ;;  %3734 = vmatmul.mubr.bf16.gmra.mrb[220].mxu0 %v3633_v12 }
 0xb1d   :  { %v5395_v40 = vpop.eup %5394  ;;  %5406 = vpow2.f32 %v3467_v36  ;;  %v3293_v28 = vpop.xlane.xlu0 %3292 }
 0xb1e   :  { %v5397_v46 = vpop.eup %5396  ;;  %v3369_v4 = vsub.f32 %v7722_v5, %v3293_v28  ;;  %v3370_v21 = vsub.f32 %v7724_v59, %v3293_v28  ;;  %v3567_v53 = vadd.f32 %v5395_v40, %v5393_v55 }
 0xb1f   :  { %v5399_v38 = vpop.eup %5398  ;;  %v3296_v7 = vpop.xlane.xlu1 %3295  ;;  %v3635_v48 = vpack.c.bf16 %v5397_v46, %v5393_v55 }
 0xb20   :  { %v3469_v26 = vmul.f32 1.442695, %v3369_v4  ;;  %v3471_v27 = vmul.f32 1.442695, %v3370_v21  ;;  %v3371_v60 = vsub.f32 %v7726_v44, %v3296_v7  ;;  %v3372_v10 = vsub.f32 %v7730_v42, %v3296_v7  ;;  %3568 = vadd.xlane.f32.xlu0 %v3567_v53  ;;  %v8065_v21 = vld [vmem:[#allocation19_spill] sm:$0xff] }
 0xb21   :  { %v3570_v15 = vadd.f32 %v5399_v38, %v5397_v46  ;;  %v3636_v17 = vpack.c.bf16 %v5399_v38, %v5395_v40  ;;  %v8066_v38 = vld [vmem:[#allocation20_spill] sm:$0xff] }
 0xb22   :  { %5408 = vpow2.f32 %v3469_v26  ;;  %v3473_v22 = vmul.f32 1.442695, %v3371_v60  ;;  %v3475_v63 = vmul.f32 1.442695, %v3372_v10 }
 0xb23   :  { %5410 = vpow2.f32 %v3471_v27  ;;  %3571 = vadd.xlane.f32.xlu1 %v3570_v15  ;;  %3741 = vmatprep.mubr.bf16.mxu0 %v3636_v17  ;;  %v8067_v17 = vld [vmem:[#allocation21_spill] sm:$0xff] }
 0xb24   :  { %v5401_v5 = vpop.eup %5400  ;;  %5412 = vpow2.f32 %v3473_v22  ;;  %3742 = vmatmul.mubr.bf16.gmra.mrb[224].mxu0 %v3635_v48 }
 0xb25   :  { %v5403_v59 = vpop.eup %5402  ;;  %5414 = vpow2.f32 %v3475_v63  ;;  %v3299_v34 = vpop.xlane.xlu0 %3298  ;;  %v8068_v63 = vld [vmem:[#allocation22_spill] sm:$0xff] }
 0xb26   :  { %v5405_v50 = vpop.eup %5404  ;;  %v3373_v44 = vsub.f32 %v7734_v62, %v3299_v34  ;;  %v3374_v42 = vsub.f32 %v7736_v45, %v3299_v34  ;;  %v3573_v30 = vadd.f32 %v5403_v59, %v5401_v5 }
 0xb27   :  { %v5407_v2 = vpop.eup %5406  ;;  %v3302_v49 = vpop.xlane.xlu1 %3301  ;;  %v3637_v6 = vpack.c.bf16 %v5405_v50, %v5401_v5 }
 0xb28   :  { %v3477_v8 = vmul.f32 1.442695, %v3373_v44  ;;  %v3479_v19 = vmul.f32 1.442695, %v3374_v42  ;;  %v3375_v9 = vsub.f32 %v7738_v37, %v3302_v49  ;;  %v3376_v11 = vsub.f32 %v7742_v56, %v3302_v49  ;;  %3574 = vadd.xlane.f32.xlu0 %v3573_v30 }
 0xb29   :  { %v3576_v25 = vadd.f32 %v5407_v2, %v5405_v50  ;;  %v3638_v16 = vpack.c.bf16 %v5407_v2, %v5403_v59  ;;  %v8069_v2 = vld [vmem:[#allocation23_spill] sm:$0xff] }
 0xb2a   :  { %5416 = vpow2.f32 %v3477_v8  ;;  %v3481_v3 = vmul.f32 1.442695, %v3375_v9  ;;  %v3483_v52 = vmul.f32 1.442695, %v3376_v11 }
 0xb2b   :  { %5418 = vpow2.f32 %v3479_v19  ;;  %3577 = vadd.xlane.f32.xlu1 %v3576_v25  ;;  %3749 = vmatprep.mubr.bf16.mxu0 %v3638_v16 }
 0xb2c   :  { %v5409_v62 = vpop.eup %5408  ;;  %5420 = vpow2.f32 %v3481_v3  ;;  %3750 = vmatmul.mubr.bf16.gmra.mrb[228].mxu0 %v3637_v6  ;;  %v8070_v6 = vld [vmem:[#allocation24_spill] sm:$0xff] }
 0xb2d   :  { %v5411_v45 = vpop.eup %5410  ;;  %5422 = vpow2.f32 %v3483_v52  ;;  %v3305_v18 = vpop.xlane.xlu0 %3304 }
 0xb2e   :  { %v5413_v20 = vpop.eup %5412  ;;  %v3377_v37 = vsub.f32 %v7746_v35, %v3305_v18  ;;  %v3378_v56 = vsub.f32 %v7748_v33, %v3305_v18  ;;  %v3579_v39 = vadd.f32 %v5411_v45, %v5409_v62 }
 0xb2f   :  { %v5415_v23 = vpop.eup %5414  ;;  %v3308_v13 = vpop.xlane.xlu1 %3307  ;;  %v3639_v14 = vpack.c.bf16 %v5413_v20, %v5409_v62 }
 0xb30   :  { %v3485_v51 = vmul.f32 1.442695, %v3377_v37  ;;  %v3487_v24 = vmul.f32 1.442695, %v3378_v56  ;;  %v3379_v12 = vsub.f32 %v7750_v43, %v3308_v13  ;;  %v3380_v47 = vsub.f32 %v7754_v61, %v3308_v13  ;;  %3580 = vadd.xlane.f32.xlu0 %v3579_v39 }
 0xb31   :  { %v3582_v1 = vadd.f32 %v5415_v23, %v5413_v20  ;;  %v3640_v29 = vpack.c.bf16 %v5415_v23, %v5411_v45  ;;  %v8071_v45 = vld [vmem:[#allocation25_spill] sm:$0xff]  ;;  %v8072_v20 = vld [vmem:[#allocation26_spill] sm:$0xff] }
 0xb32   :  { %5424 = vpow2.f32 %v3485_v51  ;;  %v3489_v57 = vmul.f32 1.442695, %v3379_v12  ;;  %v3491_v58 = vmul.f32 1.442695, %v3380_v47  ;;  %v8074_v47 = vld [vmem:[#allocation28_spill] sm:$0xff] }
 0xb33   :  { %5426 = vpow2.f32 %v3487_v24  ;;  %3583 = vadd.xlane.f32.xlu1 %v3582_v1  ;;  %3757 = vmatprep.mubr.bf16.mxu0 %v3640_v29  ;;  %v8073_v24 = vld [vmem:[#allocation27_spill] sm:$0xff] }
 0xb34   :  { %v5417_v35 = vpop.eup %5416  ;;  %5428 = vpow2.f32 %v3489_v57  ;;  %3758 = vmatmul.mubr.bf16.gmra.mrb[232].mxu0 %v3639_v14 }
 0xb35   :  { %v5419_v33 = vpop.eup %5418  ;;  %5430 = vpow2.f32 %v3491_v58  ;;  %v3311_v41 = vpop.xlane.xlu0 %3310 }
 0xb36   :  { %v5421_v0 = vpop.eup %5420  ;;  %v3381_v43 = vsub.f32 %v7758_v54, %v3311_v41  ;;  %v3382_v61 = vsub.f32 %v7760_v31, %v3311_v41  ;;  %v3585_v36 = vadd.f32 %v5419_v33, %v5417_v35 }
 0xb37   :  { %v5423_v55 = vpop.eup %5422  ;;  %v3314_v40 = vpop.xlane.xlu1 %3313  ;;  %v3641_v28 = vpack.c.bf16 %v5421_v0, %v5417_v35 }
 0xb38   :  { %v3493_v46 = vmul.f32 1.442695, %v3381_v43  ;;  %v3495_v4 = vmul.f32 1.442695, %v3382_v61  ;;  %v3383_v53 = vsub.f32 %v8065_v21, %v3314_v40  ;;  %v3384_v7 = vsub.f32 %v8066_v38, %v3314_v40  ;;  %3586 = vadd.xlane.f32.xlu0 %v3585_v36  ;;  %v8075_v61 = vld [vmem:[#allocation29_spill] sm:$0xff] }
 0xb39   :  { %v3588_v48 = vadd.f32 %v5423_v55, %v5421_v0  ;;  %v3642_v26 = vpack.c.bf16 %v5423_v55, %v5419_v33  ;;  %v8076_v55 = vld [vmem:[#allocation30_spill] sm:$0xff] }
 0xb3a   :  { %5432 = vpow2.f32 %v3493_v46  ;;  %v3497_v27 = vmul.f32 1.442695, %v3383_v53  ;;  %v3499_v60 = vmul.f32 1.442695, %v3384_v7 }
 0xb3b   :  { %5434 = vpow2.f32 %v3495_v4  ;;  %3589 = vadd.xlane.f32.xlu1 %v3588_v48  ;;  %3765 = vmatprep.mubr.bf16.mxu0 %v3642_v26  ;;  %v8077_v48 = vld [vmem:[#allocation31_spill] sm:$0xff] }
 0xb3c   :  { %v5425_v54 = vpop.eup %5424  ;;  %5436 = vpow2.f32 %v3497_v27  ;;  %3766 = vmatmul.mubr.bf16.gmra.mrb[236].mxu0 %v3641_v28 }
 0xb3d   :  { %v5427_v31 = vpop.eup %5426  ;;  %5438 = vpow2.f32 %v3499_v60  ;;  %v3317_v10 = vpop.xlane.xlu0 %3316 }
 0xb3e   :  { %v5429_v15 = vpop.eup %5428  ;;  %v3385_v22 = vsub.f32 %v8067_v17, %v3317_v10  ;;  %v3386_v5 = vsub.f32 %v8068_v63, %v3317_v10  ;;  %v3591_v59 = vadd.f32 %v5427_v31, %v5425_v54 }
 0xb3f   :  { %v5431_v34 = vpop.eup %5430  ;;  %v3320_v50 = vpop.xlane.xlu1 %3319  ;;  %v3643_v44 = vpack.c.bf16 %v5429_v15, %v5425_v54 }
 0xb40   :  { %v3501_v42 = vmul.f32 1.442695, %v3385_v22  ;;  %v3503_v30 = vmul.f32 1.442695, %v3386_v5  ;;  %v3387_v49 = vsub.f32 %v8069_v2, %v3320_v50  ;;  %v3388_v8 = vsub.f32 %v8070_v6, %v3320_v50  ;;  %3592 = vadd.xlane.f32.xlu0 %v3591_v59 }
 0xb41   :  { %v3594_v19 = vadd.f32 %v5431_v34, %v5429_v15  ;;  %v3644_v9 = vpack.c.bf16 %v5431_v34, %v5427_v31 }
 0xb42   :  { %5440 = vpow2.f32 %v3501_v42  ;;  %v3505_v11 = vmul.f32 1.442695, %v3387_v49  ;;  %v3507_v25 = vmul.f32 1.442695, %v3388_v8 }
 0xb43   :  { %5442 = vpow2.f32 %v3503_v30  ;;  %3595 = vadd.xlane.f32.xlu1 %v3594_v19  ;;  %3773 = vmatprep.mubr.bf16.mxu0 %v3644_v9 }
 0xb44   :  { %v5433_v16 = vpop.eup %5432  ;;  %5444 = vpow2.f32 %v3505_v11  ;;  %3774 = vmatmul.mubr.bf16.gmra.mrb[240].mxu0 %v3643_v44 }
 0xb45   :  { %v5435_v3 = vpop.eup %5434  ;;  %5446 = vpow2.f32 %v3507_v25  ;;  %v3323_v52 = vpop.xlane.xlu0 %3322 }
 0xb46   :  { %v5437_v62 = vpop.eup %5436  ;;  %v3389_v18 = vsub.f32 %v8071_v45, %v3323_v52  ;;  %v3390_v37 = vsub.f32 %v8072_v20, %v3323_v52  ;;  %v3597_v56 = vadd.f32 %v5435_v3, %v5433_v16 }
 0xb47   :  { %v5439_v39 = vpop.eup %5438  ;;  %v3326_v23 = vpop.xlane.xlu1 %3325  ;;  %v3645_v13 = vpack.c.bf16 %v5437_v62, %v5433_v16 }
 0xb48   :  { %v3509_v14 = vmul.f32 1.442695, %v3389_v18  ;;  %v3511_v51 = vmul.f32 1.442695, %v3390_v37  ;;  %v3391_v12 = vsub.f32 %v8073_v24, %v3326_v23  ;;  %v3392_v1 = vsub.f32 %v8074_v47, %v3326_v23  ;;  %3598 = vadd.xlane.f32.xlu0 %v3597_v56 }
 0xb49   :  { %v3600_v29 = vadd.f32 %v5439_v39, %v5437_v62  ;;  %v3646_v57 = vpack.c.bf16 %v5439_v39, %v5435_v3 }
 0xb4a   :  { %5448 = vpow2.f32 %v3509_v14  ;;  %v3513_v58 = vmul.f32 1.442695, %v3391_v12  ;;  %v3515_v35 = vmul.f32 1.442695, %v3392_v1 }
 0xb4b   :  { %5450 = vpow2.f32 %v3511_v51  ;;  %3601 = vadd.xlane.f32.xlu1 %v3600_v29  ;;  %3781 = vmatprep.mubr.bf16.mxu0 %v3646_v57 }
 0xb4c   :  { %v5441_v33 = vpop.eup %5440  ;;  %5452 = vpow2.f32 %v3513_v58  ;;  %3782 = vmatmul.mubr.bf16.gmra.mrb[244].mxu0 %v3645_v13 }
 0xb4d   :  { %v5443_v41 = vpop.eup %5442  ;;  %5454 = vpow2.f32 %v3515_v35  ;;  %v3329_v0 = vpop.xlane.xlu0 %3328 }
 0xb4e   :  { %v5445_v43 = vpop.eup %5444  ;;  %v3393_v36 = vsub.f32 %v8075_v61, %v3329_v0  ;;  %v3394_v40 = vsub.f32 %v8076_v55, %v3329_v0  ;;  %v3603_v28 = vadd.f32 %v5443_v41, %v5441_v33 }
 0xb4f   :  { %v5447_v46 = vpop.eup %5446  ;;  %v3332_v4 = vpop.xlane.xlu1 %3331  ;;  %v3647_v21 = vpack.c.bf16 %v5445_v43, %v5441_v33 }
 0xb50   :  { %v3517_v53 = vmul.f32 1.442695, %v3393_v36  ;;  %v3519_v38 = vmul.f32 1.442695, %v3394_v40  ;;  %3604 = vadd.xlane.f32.xlu0 %v3603_v28  ;;  %v3395_v7 = vsub.f32 %v7798_v32, %v3332_v4  ;;  %v3396_v26 = vsub.f32 %v8077_v48, %v3332_v4 }
 0xb51   :  { %v3606_v27 = vadd.f32 %v5447_v46, %v5445_v43  ;;  %v3648_v60 = vpack.c.bf16 %v5447_v46, %v5443_v41 }
 0xb52   :  { %5456 = vpow2.f32 %v3517_v53  ;;  %v3521_v54 = vmul.f32 1.442695, %v3395_v7  ;;  %v3523_v31 = vmul.f32 1.442695, %v3396_v26 }
 0xb53   :  { %5458 = vpow2.f32 %v3519_v38  ;;  %3607 = vadd.xlane.f32.xlu1 %v3606_v27  ;;  %3789 = vmatprep.mubr.bf16.mxu0 %v3648_v60 }
 0xb54   :  { %v5449_v10 = vpop.eup %5448  ;;  %5460 = vpow2.f32 %v3521_v54  ;;  %3790 = vmatmul.mubr.bf16.gmra.mrb[248].mxu0 %v3647_v21 }
 0xb55   :  { %v5451_v15 = vpop.eup %5450  ;;  %5462 = vpow2.f32 %v3523_v31 }
 0xb56   :  { %v5453_v17 = vpop.eup %5452  ;;  %v3609_v22 = vadd.f32 %v5451_v15, %v5449_v10 }
 0xb57   :  { %v5455_v63 = vpop.eup %5454  ;;  %v3649_v5 = vpack.c.bf16 %v5453_v17, %v5449_v10 }
 0xb58   :  { %3610 = vadd.xlane.f32.xlu0 %v3609_v22  ;;  %v3612_v32 = vadd.f32 %v5455_v63, %v5453_v17  ;;  %v3650_v59 = vpack.c.bf16 %v5455_v63, %v5451_v15 }
 0xb5a   :  { %3613 = vadd.xlane.f32.xlu1 %v3612_v32  ;;  %3797 = vmatprep.mubr.bf16.mxu0 %v3650_v59 }
 0xb5c   :  { %v5457_v34 = vpop.eup %5456  ;;  %3798 = vmatmul.mubr.bf16.gmra.mrb[252].mxu0 %v3649_v5 }
 0xb5d   :  { %v5459_v50 = vpop.eup %5458 }
 0xb5e   :  { %v5461_v44 = vpop.eup %5460  ;;  %v3615_v42 = vadd.f32 %v5459_v50, %v5457_v34 }
 0xb5f   :  { %v5463_v30 = vpop.eup %5462  ;;  %v3651_v2 = vpack.c.bf16 %v5461_v44, %v5457_v34 }
 0xb60   :  { %3616 = vadd.xlane.f32.xlu0 %v3615_v42  ;;  %v3618_v49 = vadd.f32 %v5463_v30, %v5461_v44  ;;  %v3652_v6 = vpack.c.bf16 %v5463_v30, %v5459_v50 }
 0xb62   :  { %3619 = vadd.xlane.f32.xlu1 %v3618_v49  ;;  %3805 = vmatprep.mubr.bf16.mxu0 %v3652_v6 }
 0xb64   :  { %3806 = vmatmul.mubr.bf16.gmra.mrb[4].mxu0 %v3651_v2 }
 0xb75   :  { %v3527_v8 = vpop.xlane.xlu0 %3526 }
 0xb76   :  { %5464 = vrcp.f32 %v3527_v8 }
 0xb78   :  { %v3530_v19 = vpop.xlane.xlu1 %3529 }
 0xb79   :  { %5466 = vrcp.f32 %v3530_v19 }
 0xb7d   :  { %v3533_v9 = vpop.xlane.xlu0 %3532 }
 0xb7e   :  { %5468 = vrcp.f32 %v3533_v9 }
 0xb80   :  { %v3536_v11 = vpop.xlane.xlu1 %3535  ;;  %v5465_v45 = vpop.eup %5464 }
 0xb81   :  { %5470 = vrcp.f32 %v3536_v11 }
 0xb83   :  { %v5467_v20 = vpop.eup %5466 }
 0xb85   :  { %v3539_v39 = vpop.xlane.xlu0 %3538 }
 0xb86   :  { %5472 = vrcp.f32 %v3539_v39 }
 0xb88   :  { %v3542_v23 = vpop.xlane.xlu1 %3541  ;;  %v5469_v1 = vpop.eup %5468 }
 0xb89   :  { %5474 = vrcp.f32 %v3542_v23 }
 0xb8b   :  { %v5471_v57 = vpop.eup %5470 }
 0xb8d   :  { %v3545_v33 = vpop.xlane.xlu0 %3544 }
 0xb8e   :  { %5476 = vrcp.f32 %v3545_v33 }
 0xb90   :  { %v3548_v41 = vpop.xlane.xlu1 %3547  ;;  %v5473_v28 = vpop.eup %5472 }
 0xb91   :  { %5478 = vrcp.f32 %v3548_v41 }
 0xb93   :  { %v5475_v4 = vpop.eup %5474 }
 0xb95   :  { %v3551_v38 = vpop.xlane.xlu0 %3550 }
 0xb96   :  { %5480 = vrcp.f32 %v3551_v38 }
 0xb98   :  { %v3554_v7 = vpop.xlane.xlu1 %3553  ;;  %v5477_v10 = vpop.eup %5476 }
 0xb99   :  { %5482 = vrcp.f32 %v3554_v7 }
 0xb9b   :  { %v5479_v17 = vpop.eup %5478 }
 0xb9d   :  { %v3557_v5 = vpop.xlane.xlu0 %3556 }
 0xb9e   :  { %5484 = vrcp.f32 %v3557_v5 }
 0xba0   :  { %v3560_v32 = vpop.xlane.xlu1 %3559  ;;  %v5481_v2 = vpop.eup %5480 }
 0xba1   :  { %5486 = vrcp.f32 %v3560_v32 }
 0xba3   :  { %v5483_v6 = vpop.eup %5482 }
 0xba5   :  { %v3563_v9 = vpop.xlane.xlu0 %3562 }
 0xba6   :  { %5488 = vrcp.f32 %v3563_v9 }
 0xba8   :  { %v3566_v11 = vpop.xlane.xlu1 %3565 }
 0xba9   :  { %5490 = vrcp.f32 %v3566_v11 }
 0xbad   :  { %v3569_v23 = vpop.xlane.xlu0 %3568 }
 0xbae   :  { %5492 = vrcp.f32 %v3569_v23 }
 0xbb5   :  { %v3575_v41 = vpop.xlane.xlu0 %3574 }
 0xbbd   :  { %v3581_v7 = vpop.xlane.xlu0 %3580 }
 0xbbf   :  { %v4537_v25 = vpop.f32.mrb[196].mxu0 }
 0xbc0   :  { %v4538_v16 = vpop.f32.mrb[197].mxu0 }
 0xbc1   :  { %v4539_v3 = vadd.f32 %v4538_v16, %v4537_v25  ;;  %v4540_v52 = vpop.f32.mrb[198].mxu0 }
 0xbc2   :  { %v4541_v62 = vpop.f32.mrb[199].mxu0 }
 0xbc3   :  { %v4542_v18 = vadd.f32 %v4541_v62, %v4540_v52  ;;  %v3846_v37 = vmul.f32 %v5465_v45, %v4539_v3 }
 0xbc5   :  { %v3847_v56 = vmul.f32 %v5467_v20, %v4542_v18  ;;  %v5485_v18 = vpop.eup %5484  ;;  %v3587_v32 = vpop.xlane.xlu0 %3586 }
 0xbc7   :  { %v4543_v13 = vpop.f32.mrb[200].mxu0  ;;  %v3878_v14 = vpack.c.bf16 %v3847_v56, %v3846_v37  ;;  %v5487_v37 = vpop.eup %5486 }
 0xbc8   :  { %v4544_v51 = vpop.f32.mrb[201].mxu0 }
 0xbc9   :  { %v4545_v24 = vadd.f32 %v4544_v51, %v4543_v13  ;;  %v4546_v12 = vpop.f32.mrb[202].mxu0  ;;  %4957 = vmatprep.mubr.bf16.mxu1 %v3878_v14  ;;  %v3572_v13 = vpop.xlane.xlu1 %3571 }
 0xbca   :  { %v4547_v47 = vpop.f32.mrb[203].mxu0  ;;  %5494 = vrcp.f32 %v3572_v13 }
 0xbcb   :  { %v4548_v29 = vadd.f32 %v4547_v47, %v4546_v12  ;;  %v3848_v58 = vmul.f32 %v5469_v1, %v4545_v24  ;;  %5496 = vrcp.f32 %v3575_v41 }
 0xbcd   :  { %v3849_v35 = vmul.f32 %v5471_v57, %v4548_v29  ;;  %v5489_v29 = vpop.eup %5488  ;;  %v3593_v11 = vpop.xlane.xlu0 %3592 }
 0xbcf   :  { %v3879_v0 = vpack.c.bf16 %v3849_v35, %v3848_v58  ;;  %v4549_v43 = vpop.f32.mrb[204].mxu0  ;;  %v5491_v58 = vpop.eup %5490 }
 0xbd0   :  { %v4550_v61 = vpop.f32.mrb[205].mxu0 }
 0xbd1   :  { %v4551_v36 = vadd.f32 %v4550_v61, %v4549_v43  ;;  %v4552_v55 = vpop.f32.mrb[206].mxu0  ;;  %4958 = vmatmul.mubr.bf16.vlgmr.msra.gmra.mrb[228].mxu1 %v3879_v0  ;;  %v3578_v0 = vpop.xlane.xlu1 %3577 }
 0xbd2   :  { %v4553_v40 = vpop.f32.mrb[207].mxu0  ;;  %5498 = vrcp.f32 %v3578_v0 }
 0xbd3   :  { %v4554_v46 = vadd.f32 %v4553_v40, %v4552_v55  ;;  %v3850_v21 = vmul.f32 %v5473_v28, %v4551_v36  ;;  %5500 = vrcp.f32 %v3581_v7 }
 0xbd5   :  { %v3851_v53 = vmul.f32 %v5475_v4, %v4554_v46  ;;  %v5493_v46 = vpop.eup %5492  ;;  %v3599_v13 = vpop.xlane.xlu0 %3598 }
 0xbd7   :  { %v4555_v48 = vpop.f32.mrb[208].mxu0  ;;  %v3880_v26 = vpack.c.bf16 %v3851_v53, %v3850_v21  ;;  %v5495_v21 = vpop.eup %5494 }
 0xbd8   :  { %v4556_v27 = vpop.f32.mrb[209].mxu0 }
 0xbd9   :  { %v4557_v60 = vadd.f32 %v4556_v27, %v4555_v48  ;;  %v4558_v54 = vpop.f32.mrb[210].mxu0  ;;  %4961 = vmatprep.mubr.bf16.mxu1 %v3880_v26  ;;  %v3584_v48 = vpop.xlane.xlu1 %3583 }
 0xbda   :  { %v4559_v31 = vpop.f32.mrb[211].mxu0  ;;  %5502 = vrcp.f32 %v3584_v48 }
 0xbdb   :  { %v4560_v15 = vadd.f32 %v4559_v31, %v4558_v54  ;;  %v3852_v22 = vmul.f32 %v5477_v10, %v4557_v60  ;;  %5504 = vrcp.f32 %v3587_v32 }
 0xbdd   :  { %v3853_v63 = vmul.f32 %v5479_v17, %v4560_v15  ;;  %v5497_v15 = vpop.eup %5496  ;;  %v3605_v0 = vpop.xlane.xlu0 %3604 }
 0xbdf   :  { %v4561_v59 = vpop.f32.mrb[212].mxu0  ;;  %v3881_v34 = vpack.c.bf16 %v3853_v63, %v3852_v22  ;;  %v5499_v22 = vpop.eup %5498 }
 0xbe0   :  { %v4562_v50 = vpop.f32.mrb[213].mxu0 }
 0xbe1   :  { %v4563_v44 = vadd.f32 %v4562_v50, %v4561_v59  ;;  %v4564_v42 = vpop.f32.mrb[214].mxu0  ;;  %4962 = vmatmul.mubr.bf16.gmra.mrb[232].mxu1 %v3881_v34  ;;  %v3590_v59 = vpop.xlane.xlu1 %3589 }
 0xbe2   :  { %v4565_v30 = vpop.f32.mrb[215].mxu0  ;;  %5506 = vrcp.f32 %v3590_v59 }
 0xbe3   :  { %v4566_v49 = vadd.f32 %v4565_v30, %v4564_v42  ;;  %v3854_v8 = vmul.f32 %v5481_v2, %v4563_v44  ;;  %5508 = vrcp.f32 %v3593_v11 }
 0xbe5   :  { %v3855_v19 = vmul.f32 %v5483_v6, %v4566_v49  ;;  %v5501_v49 = vpop.eup %5500  ;;  %v3611_v48 = vpop.xlane.xlu0 %3610 }
 0xbe7   :  { %v4567_v25 = vpop.f32.mrb[216].mxu0  ;;  %v3882_v16 = vpack.c.bf16 %v3855_v19, %v3854_v8  ;;  %v5503_v8 = vpop.eup %5502 }
 0xbe8   :  { %v4568_v3 = vpop.f32.mrb[217].mxu0 }
 0xbe9   :  { %v4569_v52 = vadd.f32 %v4568_v3, %v4567_v25  ;;  %v4570_v62 = vpop.f32.mrb[218].mxu0  ;;  %4965 = vmatprep.mubr.bf16.mxu1 %v3882_v16  ;;  %v3596_v25 = vpop.xlane.xlu1 %3595 }
 0xbea   :  { %v4571_v45 = vpop.f32.mrb[219].mxu0  ;;  %5510 = vrcp.f32 %v3596_v25 }
 0xbeb   :  { %v4572_v20 = vadd.f32 %v4571_v45, %v4570_v62  ;;  %v3856_v56 = vmul.f32 %v5485_v18, %v4569_v52  ;;  %5512 = vrcp.f32 %v3599_v13 }
 0xbed   :  { %v3857_v39 = vmul.f32 %v5487_v37, %v4572_v20  ;;  %v5505_v20 = vpop.eup %5504  ;;  %v3617_v59 = vpop.xlane.xlu0 %3616 }
 0xbef   :  { %v4573_v14 = vpop.f32.mrb[220].mxu0  ;;  %v3883_v51 = vpack.c.bf16 %v3857_v39, %v3856_v56  ;;  %v5507_v56 = vpop.eup %5506 }
 0xbf0   :  { %v4574_v24 = vpop.f32.mrb[221].mxu0 }
 0xbf1   :  { %v4575_v12 = vadd.f32 %v4574_v24, %v4573_v14  ;;  %v4576_v47 = vpop.f32.mrb[222].mxu0  ;;  %4966 = vmatmul.mubr.bf16.gmra.mrb[236].mxu1 %v3883_v51  ;;  %v3602_v14 = vpop.xlane.xlu1 %3601 }
 0xbf2   :  { %v4577_v1 = vpop.f32.mrb[223].mxu0  ;;  %5514 = vrcp.f32 %v3602_v14  ;;  %v7873_v14 = vld [vmem:[%s7929_s7] ss:$0 sm:$0xff]  ;;  %s5785_s7 = smov [#allocation10]  }
 0xbf3   :  { %v4578_v57 = vadd.f32 %v4577_v1, %v4576_v47  ;;  %v3858_v35 = vmul.f32 %v5489_v29, %v4575_v12  ;;  %5516 = vrcp.f32 %v3605_v0  ;;  %v5623_v0 = vld [vmem:[#allocation2 + $0x118] sm:$0xff]  ;;  %s4125_s24 = sshll.u32 %s5785_s7, 4  ;;  %s4126_s24 = int_to_ptr.vmem [resolvable:$true] %s4125_s24 }
 0xbf4   :  { %s5741_s25 = scalar_lea.vmem %s4126_s24, 8192  ;;  %p5746_p5 = scmp.lt.s32.totalorder %s4126_s24, %s4126_s24 }
 0xbf5   :  { %v3859_v33 = vmul.f32 %v5491_v58, %v4578_v57  ;;  %v5509_v57 = vpop.eup %5508  ;;  %p5742_p4 = scmp.ne.s32.totalorder %s4126_s24, %s5741_s25  ;;  %p5747_p6 = scmp.lt.s32.totalorder %s5741_s25, %s5741_s25 }
 0xbf7   :  { %v4579_v43 = vpop.f32.mrb[224].mxu0  ;;  %v3884_v61 = vpack.c.bf16 %v3859_v33, %v3858_v35  ;;  %v5511_v35 = vpop.eup %5510  ;;  %p5748_p7 = por %p5747_p6, %p5746_p5 }
 0xbf8   :  { %v4580_v36 = vpop.f32.mrb[225].mxu0 }
 0xbf9   :  { %v4581_v55 = vadd.f32 %v4580_v36, %v4579_v43  ;;  %v4582_v40 = vpop.f32.mrb[226].mxu0  ;;  %4969 = vmatprep.mubr.bf16.mxu1 %v3884_v61  ;;  %v3608_v43 = vpop.xlane.xlu1 %3607  ;;  %p5749_p8 = pnand %p5748_p7, %p5742_p4 }
 0xbfa   :  { %v4583_v28 = vpop.f32.mrb[227].mxu0  ;;  %5518 = vrcp.f32 %v3608_v43 }
 0xbfb   :  { %v4584_v4 = vadd.f32 %v4583_v28, %v4582_v40  ;;  %v3860_v53 = vmul.f32 %v5493_v46, %v4581_v55  ;;  %5520 = vrcp.f32 %v3611_v48  ;;  %v5626_v48 = vld [vmem:[#allocation2 + $0x120] sm:$0xff] }
 0xbfd   :  { %v3861_v38 = vmul.f32 %v5495_v21, %v4584_v4  ;;  %v5513_v4 = vpop.eup %5512 }
 0xbff   :  { %v4585_v26 = vpop.f32.mrb[228].mxu0  ;;  %v3885_v27 = vpack.c.bf16 %v3861_v38, %v3860_v53  ;;  %v5515_v53 = vpop.eup %5514 }
 0xc00   :  { %v4586_v60 = vpop.f32.mrb[229].mxu0 }
 0xc01   :  { %v4587_v54 = vadd.f32 %v4586_v60, %v4585_v26  ;;  %v4588_v31 = vpop.f32.mrb[230].mxu0  ;;  %4970 = vmatmul.mubr.bf16.gmra.mrb[240].mxu1 %v3885_v27  ;;  %v3614_v26 = vpop.xlane.xlu1 %3613 }
 0xc02   :  { %v4589_v10 = vpop.f32.mrb[231].mxu0  ;;  %5522 = vrcp.f32 %v3614_v26 }
 0xc03   :  { %v4590_v17 = vadd.f32 %v4589_v10, %v4588_v31  ;;  %v3862_v63 = vmul.f32 %v5497_v15, %v4587_v54  ;;  %5524 = vrcp.f32 %v3617_v59 }
 0xc05   :  { %v3863_v5 = vmul.f32 %v5499_v22, %v4590_v17  ;;  %v5517_v17 = vpop.eup %5516 }
 0xc07   :  { %v4591_v34 = vpop.f32.mrb[232].mxu0  ;;  %v3886_v50 = vpack.c.bf16 %v3863_v5, %v3862_v63  ;;  %v5519_v63 = vpop.eup %5518 }
 0xc08   :  { %v4592_v44 = vpop.f32.mrb[233].mxu0 }
 0xc09   :  { %v4593_v42 = vadd.f32 %v4592_v44, %v4591_v34  ;;  %v4594_v30 = vpop.f32.mrb[234].mxu0  ;;  %4973 = vmatprep.mubr.bf16.mxu1 %v3886_v50  ;;  %v3620_v34 = vpop.xlane.xlu1 %3619 }
 0xc0a   :  { %v4595_v2 = vpop.f32.mrb[235].mxu0  ;;  %5526 = vrcp.f32 %v3620_v34 }
 0xc0b   :  { %v4596_v6 = vadd.f32 %v4595_v2, %v4594_v30  ;;  %v3864_v19 = vmul.f32 %v5501_v49, %v4593_v42 }
 0xc0d   :  { %v3865_v9 = vmul.f32 %v5503_v8, %v4596_v6  ;;  %v5521_v6 = vpop.eup %5520 }
 0xc0f   :  { %v4597_v16 = vpop.f32.mrb[236].mxu0  ;;  %v3887_v3 = vpack.c.bf16 %v3865_v9, %v3864_v19  ;;  %v5523_v19 = vpop.eup %5522 }
 0xc10   :  { %v4598_v52 = vpop.f32.mrb[237].mxu0 }
 0xc11   :  { %v4599_v62 = vadd.f32 %v4598_v52, %v4597_v16  ;;  %v4600_v45 = vpop.f32.mrb[238].mxu0  ;;  %4974 = vmatmul.mubr.bf16.gmra.mrb[244].mxu1 %v3887_v3 }
 0xc12   :  { %v4601_v18 = vpop.f32.mrb[239].mxu0 }
 0xc13   :  { %v4602_v37 = vadd.f32 %v4601_v18, %v4600_v45  ;;  %v3866_v39 = vmul.f32 %v5505_v20, %v4599_v62  ;;  %v5525_v18 = vpop.eup %5524 }
 0xc15   :  { %v3867_v23 = vmul.f32 %v5507_v56, %v4602_v37  ;;  %v5527_v37 = vpop.eup %5526 }
 0xc17   :  { %v4603_v51 = vpop.f32.mrb[240].mxu0  ;;  %v3888_v24 = vpack.c.bf16 %v3867_v23, %v3866_v39 }
 0xc18   :  { %v4604_v12 = vpop.f32.mrb[241].mxu0 }
 0xc19   :  { %v4605_v47 = vadd.f32 %v4604_v12, %v4603_v51  ;;  %v4606_v1 = vpop.f32.mrb[242].mxu0  ;;  %4977 = vmatprep.mubr.bf16.mxu1 %v3888_v24 }
 0xc1a   :  { %v4607_v29 = vpop.f32.mrb[243].mxu0 }
 0xc1b   :  { %v4608_v58 = vadd.f32 %v4607_v29, %v4606_v1  ;;  %v3868_v33 = vmul.f32 %v5509_v57, %v4605_v47  ;;  %v5621_v1 = vld [vmem:[#allocation2 + $0x110] sm:$0xff] }
 0xc1d   :  { %v3869_v41 = vmul.f32 %v5511_v35, %v4608_v58  ;;  %v5622_v35 = vld [vmem:[#allocation2 + $0x100] sm:$0xff] }
 0xc1f   :  { %v4609_v61 = vpop.f32.mrb[244].mxu0  ;;  %v3889_v36 = vpack.c.bf16 %v3869_v41, %v3868_v33 }
 0xc20   :  { %v4610_v55 = vpop.f32.mrb[245].mxu0 }
 0xc21   :  { %v4611_v40 = vadd.f32 %v4610_v55, %v4609_v61  ;;  %v4612_v28 = vpop.f32.mrb[246].mxu0  ;;  %4978 = vmatmul.mubr.bf16.gmra.mrb[248].mxu1 %v3889_v36  ;;  %v5624_v61 = vld [vmem:[#allocation2 + $0x108] sm:$0xff] }
 0xc22   :  { %v4613_v46 = vpop.f32.mrb[247].mxu0 }
 0xc23   :  { %v4614_v21 = vadd.f32 %v4613_v46, %v4612_v28  ;;  %v3870_v38 = vmul.f32 %v5513_v4, %v4611_v40 }
 0xc25   :  { %v3871_v7 = vmul.f32 %v5515_v53, %v4614_v21  ;;  %v5625_v21 = vld [vmem:[#allocation2 + $0x130] sm:$0xff] }
 0xc27   :  { %v4615_v27 = vpop.f32.mrb[248].mxu0  ;;  %v3890_v60 = vpack.c.bf16 %v3871_v7, %v3870_v38 }
 0xc28   :  { %v4616_v54 = vpop.f32.mrb[249].mxu0 }
 0xc29   :  { %v4617_v31 = vadd.f32 %v4616_v54, %v4615_v27  ;;  %v4618_v10 = vpop.f32.mrb[250].mxu0  ;;  %4981 = vmatprep.mubr.bf16.mxu1 %v3890_v60  ;;  %v5627_v60 = vld [vmem:[#allocation2 + $0x138] sm:$0xff] }
 0xc2a   :  { %v4619_v15 = vpop.f32.mrb[251].mxu0 }
 0xc2b   :  { %v4620_v22 = vadd.f32 %v4619_v15, %v4618_v10  ;;  %v3872_v5 = vmul.f32 %v5517_v17, %v4617_v31  ;;  %v5628_v31 = vld [vmem:[#allocation2 + $0x128] sm:$0xff] }
 0xc2d   :  { %v3873_v32 = vmul.f32 %v5519_v63, %v4620_v22 }
 0xc2f   :  { %v4621_v50 = vpop.f32.mrb[252].mxu0  ;;  %v3891_v44 = vpack.c.bf16 %v3873_v32, %v3872_v5  ;;  %v5629_v32 = vld [vmem:[#allocation2 + $0x150] sm:$0xff] }
 0xc30   :  { %v4622_v42 = vpop.f32.mrb[253].mxu0 }
 0xc31   :  { %v4623_v30 = vadd.f32 %v4622_v42, %v4621_v50  ;;  %v4624_v2 = vpop.f32.mrb[254].mxu0  ;;  %4982 = vmatmul.mubr.bf16.gmra.mrb[252].mxu1 %v3891_v44  ;;  %v5630_v44 = vld [vmem:[#allocation2 + $0x140] sm:$0xff] }
 0xc32   :  { %v4625_v49 = vpop.f32.mrb[255].mxu0 }
 0xc33   :  { %v4626_v8 = vadd.f32 %v4625_v49, %v4624_v2  ;;  %v3874_v9 = vmul.f32 %v5521_v6, %v4623_v30  ;;  %v5631_v2 = vld [vmem:[#allocation2 + $0x158] sm:$0xff]  ;;  %v5632_v6 = vld [vmem:[#allocation2 + $0x148] sm:$0xff] }
 0xc35   :  { %v3875_v11 = vmul.f32 %v5523_v19, %v4626_v8 }
 0xc37   :  { %v4627_v25 = vpop.f32.mrb[4].mxu0  ;;  %v3892_v16 = vpack.c.bf16 %v3875_v11, %v3874_v9 }
 0xc38   :  { %v4628_v3 = vpop.f32.mrb[5].mxu0 }
 0xc39   :  { %v4629_v52 = vadd.f32 %v4628_v3, %v4627_v25  ;;  %v4630_v62 = vpop.f32.mrb[6].mxu0  ;;  %4985 = vmatprep.mubr.bf16.mxu1 %v3892_v16  ;;  %v5633_v3 = vld [vmem:[#allocation2 + $0x170] sm:$0xff] }
 0xc3a   :  { %v4631_v45 = vpop.f32.mrb[7].mxu0 }
 0xc3b   :  { %v4632_v20 = vadd.f32 %v4631_v45, %v4630_v62  ;;  %v3876_v56 = vmul.f32 %v5525_v18, %v4629_v52  ;;  %v5634_v18 = vld [vmem:[#allocation2 + $0x160] sm:$0xff] }
 0xc3d   :  { %v3877_v39 = vmul.f32 %v5527_v37, %v4632_v20 }
 0xc3f   :  { %v3893_v23 = vpack.c.bf16 %v3877_v39, %v3876_v56  ;;  %v5635_v56 = vld [vmem:[#allocation2 + $0x178] sm:$0xff] }
 0xc41   :  { %4986 = vmatmul.mubr.bf16.gmra.mrb[4].mxu1 %v3893_v23  ;;  %v5636_v23 = vld [vmem:[#allocation2 + $0x168] sm:$0xff] }
 0xca4   :  { %v4959_v13 = vpop.f32.mrb[228].mxu1 }
 0xca5   :  { %v3937_v51 = vadd.f32 %v7873_v14, %v4959_v13  ;;  %v3928_v24 = vpop.f32.mrb[229].mxu1 }
 0xca6   :  { %v3929_v12 = vadd.f32 %v7873_v14, %v3928_v24  ;;  %v4960_v47 = vpop.f32.mrb[230].mxu1 }
 0xca7   :  { %v4057_v29 = vadd.f32 %v5621_v1, %v3937_v51  ;;  %v3940_v57 = vadd.f32 %v7873_v14, %v4960_v47  ;;  %v3931_v58 = vpop.f32.mrb[231].mxu1 }
 0xca8   :  { %v4055_v33 = vadd.f32 %v5622_v35, %v3929_v12  ;;  %v3932_v41 = vadd.f32 %v7873_v14, %v3931_v58 }
 0xca9   :  { %4090 = vst [vmem:[#allocation10 + $0x110] sm:$0xff] %v4057_v29  ;;  %v4058_v43 = vadd.f32 %v5623_v0, %v3940_v57  ;;  %v5637_v29 = vld [vmem:[#allocation2 + $0x190] sm:$0xff] }
 0xcaa   :  { %4088 = vst [vmem:[#allocation10 + $0x100] sm:$0xff] %v4055_v33  ;;  %v4056_v36 = vadd.f32 %v5624_v61, %v3932_v41  ;;  %v5638_v33 = vld [vmem:[#allocation2 + $0x180] sm:$0xff] }
 0xcab   :  { %4091 = vst [vmem:[#allocation10 + $0x118] sm:$0xff] %v4058_v43  ;;  %v5639_v43 = vld [vmem:[#allocation2 + $0x198] sm:$0xff] }
 0xcac   :  { %4089 = vst [vmem:[#allocation10 + $0x108] sm:$0xff] %v4056_v36  ;;  %v5640_v36 = vld [vmem:[#allocation2 + $0x188] sm:$0xff] }
 0xcb4   :  { %v4963_v55 = vpop.f32.mrb[232].mxu1 }
 0xcb5   :  { %v3953_v40 = vadd.f32 %v7873_v14, %v4963_v55  ;;  %v3944_v28 = vpop.f32.mrb[233].mxu1 }
 0xcb6   :  { %v3945_v46 = vadd.f32 %v7873_v14, %v3944_v28  ;;  %v4964_v4 = vpop.f32.mrb[234].mxu1 }
 0xcb7   :  { %v4061_v53 = vadd.f32 %v5625_v21, %v3953_v40  ;;  %v3956_v38 = vadd.f32 %v7873_v14, %v4964_v4  ;;  %v3947_v7 = vpop.f32.mrb[235].mxu1 }
 0xcb8   :  { %v4059_v26 = vadd.f32 %v5626_v48, %v3945_v46  ;;  %v3948_v27 = vadd.f32 %v7873_v14, %v3947_v7 }
 0xcb9   :  { %4094 = vst [vmem:[#allocation10 + $0x130] sm:$0xff] %v4061_v53  ;;  %v4062_v54 = vadd.f32 %v5627_v60, %v3956_v38  ;;  %v5641_v53 = vld [vmem:[#allocation2 + $0x1b0] sm:$0xff] }
 0xcba   :  { %4092 = vst [vmem:[#allocation10 + $0x120] sm:$0xff] %v4059_v26  ;;  %v4060_v10 = vadd.f32 %v5628_v31, %v3948_v27  ;;  %v5642_v26 = vld [vmem:[#allocation2 + $0x1a0] sm:$0xff] }
 0xcbb   :  { %4095 = vst [vmem:[#allocation10 + $0x138] sm:$0xff] %v4062_v54  ;;  %v5643_v54 = vld [vmem:[#allocation2 + $0x1b8] sm:$0xff] }
 0xcbc   :  { %4093 = vst [vmem:[#allocation10 + $0x128] sm:$0xff] %v4060_v10  ;;  %v5644_v10 = vld [vmem:[#allocation2 + $0x1a8] sm:$0xff] }
 0xcc4   :  { %v4967_v15 = vpop.f32.mrb[236].mxu1 }
 0xcc5   :  { %v3969_v17 = vadd.f32 %v7873_v14, %v4967_v15  ;;  %v3960_v22 = vpop.f32.mrb[237].mxu1 }
 0xcc6   :  { %v3961_v63 = vadd.f32 %v7873_v14, %v3960_v22  ;;  %v4968_v5 = vpop.f32.mrb[238].mxu1 }
 0xcc7   :  { %v4065_v59 = vadd.f32 %v5629_v32, %v3969_v17  ;;  %v3972_v34 = vadd.f32 %v7873_v14, %v4968_v5  ;;  %v3963_v50 = vpop.f32.mrb[239].mxu1 }
 0xcc8   :  { %v4063_v42 = vadd.f32 %v5630_v44, %v3961_v63  ;;  %v3964_v30 = vadd.f32 %v7873_v14, %v3963_v50 }
 0xcc9   :  { %4098 = vst [vmem:[#allocation10 + $0x150] sm:$0xff] %v4065_v59  ;;  %v4066_v49 = vadd.f32 %v5631_v2, %v3972_v34  ;;  %v5645_v59 = vld [vmem:[#allocation2 + $0x1d0] sm:$0xff] }
 0xcca   :  { %4096 = vst [vmem:[#allocation10 + $0x140] sm:$0xff] %v4063_v42  ;;  %v4064_v8 = vadd.f32 %v5632_v6, %v3964_v30  ;;  %v5646_v42 = vld [vmem:[#allocation2 + $0x1c0] sm:$0xff] }
 0xccb   :  { %4099 = vst [vmem:[#allocation10 + $0x158] sm:$0xff] %v4066_v49  ;;  %v5647_v49 = vld [vmem:[#allocation2 + $0x1d8] sm:$0xff] }
 0xccc   :  { %4097 = vst [vmem:[#allocation10 + $0x148] sm:$0xff] %v4064_v8  ;;  %v5648_v8 = vld [vmem:[#allocation2 + $0x1c8] sm:$0xff] }
 0xcd4   :  { %v4971_v19 = vpop.f32.mrb[240].mxu1 }
 0xcd5   :  { %v3985_v9 = vadd.f32 %v7873_v14, %v4971_v19  ;;  %v3976_v11 = vpop.f32.mrb[241].mxu1 }
 0xcd6   :  { %v3977_v25 = vadd.f32 %v7873_v14, %v3976_v11  ;;  %v4972_v16 = vpop.f32.mrb[242].mxu1 }
 0xcd7   :  { %v4069_v52 = vadd.f32 %v5633_v3, %v3985_v9  ;;  %v3988_v62 = vadd.f32 %v7873_v14, %v4972_v16  ;;  %v3979_v45 = vpop.f32.mrb[243].mxu1 }
 0xcd8   :  { %v4067_v20 = vadd.f32 %v5634_v18, %v3977_v25  ;;  %v3980_v37 = vadd.f32 %v7873_v14, %v3979_v45 }
 0xcd9   :  { %4102 = vst [vmem:[#allocation10 + $0x170] sm:$0xff] %v4069_v52  ;;  %v4070_v39 = vadd.f32 %v5635_v56, %v3988_v62  ;;  %v5649_v52 = vld [vmem:[#allocation2 + $0x1f0] sm:$0xff] }
 0xcda   :  { %4100 = vst [vmem:[#allocation10 + $0x160] sm:$0xff] %v4067_v20  ;;  %v4068_v13 = vadd.f32 %v5636_v23, %v3980_v37  ;;  %v5650_v20 = vld [vmem:[#allocation2 + $0x1e0] sm:$0xff] }
 0xcdb   :  { %4103 = vst [vmem:[#allocation10 + $0x178] sm:$0xff] %v4070_v39  ;;  %v5651_v39 = vld [vmem:[#allocation2 + $0x1f8] sm:$0xff] }
 0xcdc   :  { %4101 = vst [vmem:[#allocation10 + $0x168] sm:$0xff] %v4068_v13  ;;  %v5652_v13 = vld [vmem:[#allocation2 + $0x1e8] sm:$0xff] }
 0xce4   :  { %v4975_v51 = vpop.f32.mrb[244].mxu1 }
 0xce5   :  { %v4001_v24 = vadd.f32 %v7873_v14, %v4975_v51  ;;  %v3992_v12 = vpop.f32.mrb[245].mxu1 }
 0xce6   :  { %v3993_v47 = vadd.f32 %v7873_v14, %v3992_v12  ;;  %v4976_v1 = vpop.f32.mrb[246].mxu1 }
 0xce7   :  { %v4073_v57 = vadd.f32 %v5637_v29, %v4001_v24  ;;  %v4004_v58 = vadd.f32 %v7873_v14, %v4976_v1  ;;  %v3995_v35 = vpop.f32.mrb[247].mxu1 }
 0xce8   :  { %v4071_v41 = vadd.f32 %v5638_v33, %v3993_v47  ;;  %v3996_v0 = vadd.f32 %v7873_v14, %v3995_v35 }
 0xce9   :  { %4106 = vst [vmem:[#allocation10 + $0x190] sm:$0xff] %v4073_v57  ;;  %v4074_v61 = vadd.f32 %v5639_v43, %v4004_v58 }
 0xcea   :  { %4104 = vst [vmem:[#allocation10 + $0x180] sm:$0xff] %v4071_v41  ;;  %v4072_v55 = vadd.f32 %v5640_v36, %v3996_v0 }
 0xceb   :  { %4107 = vst [vmem:[#allocation10 + $0x198] sm:$0xff] %v4074_v61 }
 0xcec   :  { %4105 = vst [vmem:[#allocation10 + $0x188] sm:$0xff] %v4072_v55 }
 0xcf4   :  { %v4979_v40 = vpop.f32.mrb[248].mxu1 }
 0xcf5   :  { %v4017_v28 = vadd.f32 %v7873_v14, %v4979_v40  ;;  %v4008_v46 = vpop.f32.mrb[249].mxu1 }
 0xcf6   :  { %v4009_v4 = vadd.f32 %v7873_v14, %v4008_v46  ;;  %v4980_v21 = vpop.f32.mrb[250].mxu1 }
 0xcf7   :  { %v4077_v38 = vadd.f32 %v5641_v53, %v4017_v28  ;;  %v4020_v7 = vadd.f32 %v7873_v14, %v4980_v21  ;;  %v4011_v48 = vpop.f32.mrb[251].mxu1 }
 0xcf8   :  { %v4075_v27 = vadd.f32 %v5642_v26, %v4009_v4  ;;  %v4012_v60 = vadd.f32 %v7873_v14, %v4011_v48 }
 0xcf9   :  { %4110 = vst [vmem:[#allocation10 + $0x1b0] sm:$0xff] %v4077_v38  ;;  %v4078_v31 = vadd.f32 %v5643_v54, %v4020_v7 }
 0xcfa   :  { %4108 = vst [vmem:[#allocation10 + $0x1a0] sm:$0xff] %v4075_v27  ;;  %v4076_v15 = vadd.f32 %v5644_v10, %v4012_v60 }
 0xcfb   :  { %4111 = vst [vmem:[#allocation10 + $0x1b8] sm:$0xff] %v4078_v31 }
 0xcfc   :  { %4109 = vst [vmem:[#allocation10 + $0x1a8] sm:$0xff] %v4076_v15 }
 0xd04   :  { %v4983_v17 = vpop.f32.mrb[252].mxu1 }
 0xd05   :  { %v4033_v22 = vadd.f32 %v7873_v14, %v4983_v17  ;;  %v4024_v63 = vpop.f32.mrb[253].mxu1 }
 0xd06   :  { %v4025_v5 = vadd.f32 %v7873_v14, %v4024_v63  ;;  %v4984_v32 = vpop.f32.mrb[254].mxu1 }
 0xd07   :  { %v4081_v34 = vadd.f32 %v5645_v59, %v4033_v22  ;;  %v4036_v50 = vadd.f32 %v7873_v14, %v4984_v32  ;;  %v4027_v44 = vpop.f32.mrb[255].mxu1 }
 0xd08   :  { %v4079_v30 = vadd.f32 %v5646_v42, %v4025_v5  ;;  %v4028_v2 = vadd.f32 %v7873_v14, %v4027_v44 }
 0xd09   :  { %4114 = vst [vmem:[#allocation10 + $0x1d0] sm:$0xff] %v4081_v34  ;;  %v4082_v6 = vadd.f32 %v5647_v49, %v4036_v50 }
 0xd0a   :  { %4112 = vst [vmem:[#allocation10 + $0x1c0] sm:$0xff] %v4079_v30  ;;  %v4080_v19 = vadd.f32 %v5648_v8, %v4028_v2 }
 0xd0b   :  { %4115 = vst [vmem:[#allocation10 + $0x1d8] sm:$0xff] %v4082_v6 }
 0xd0c   :  { %4113 = vst [vmem:[#allocation10 + $0x1c8] sm:$0xff] %v4080_v19 }
 0xd14   :  { %v4987_v9 = vpop.f32.mrb[4].mxu1 }
 0xd15   :  { %v4049_v11 = vadd.f32 %v7873_v14, %v4987_v9  ;;  %v4040_v25 = vpop.f32.mrb[5].mxu1 }
 0xd16   :  { %v4041_v16 = vadd.f32 %v7873_v14, %v4040_v25  ;;  %v4988_v3 = vpop.f32.mrb[6].mxu1 }
 0xd17   :  { %v4085_v62 = vadd.f32 %v5649_v52, %v4049_v11  ;;  %v4052_v45 = vadd.f32 %v7873_v14, %v4988_v3  ;;  %v4043_v18 = vpop.f32.mrb[7].mxu1 }
 0xd18   :  { %v4083_v37 = vadd.f32 %v5650_v20, %v4041_v16  ;;  %v4044_v56 = vadd.f32 %v7873_v14, %v4043_v18 }
 0xd19   :  { %4118 = vst [vmem:[#allocation10 + $0x1f0] sm:$0xff] %v4085_v62  ;;  %v4086_v23 = vadd.f32 %v5651_v39, %v4052_v45 }
 0xd1a   :  { %4116 = vst [vmem:[#allocation10 + $0x1e0] sm:$0xff] %v4083_v37  ;;  %v4084_v51 = vadd.f32 %v5652_v13, %v4044_v56 }
 0xd1b   :  { %4119 = vst [vmem:[#allocation10 + $0x1f8] sm:$0xff] %v4086_v23 }
 0xd1c   :  { %4117 = vst [vmem:[#allocation10 + $0x1e8] sm:$0xff] %v4084_v51 }
 0xd1d   :  { %5752 = shalt.err (!%p5749_p8)
}
 0xd1e   :  { %s5753_s29 = scalar_lea.hbm %s7930_s8, 8192 }
 0xd1f   :  { %p5754_p9 = scmp.ne.s32.totalorder %s7930_s8, %s5753_s29  ;;  %p5757_p10 = scmp.lt.u32.totalorder %s5753_s29, %s7930_s8 }
 0xd21   :  { %p5759_p11 = pnand %p5757_p10, %p5754_p9 }
 0xd23   :  { %5762 = shalt.err (!%p5759_p11)
}
 0xd24   :  { %4131 = dma.vmem_to_hbm [thread:$0]  %s4126_s24, 8192, %s7930_s8, [#allocation4], %s5773_s17, %s5773_s17, %s5774_s18  }
 0xd25   :  { %5769 = dma.done.wait [#allocation4], 8192  }
 0xd26   :  { %5770 = vsyncadd [#allocation4], 4294959104 }
 0xd27   :  { %4135 = vsyncpa [#allocation3], 1 }
 0xd28   :  { %4136 = vsyncpa [#allocation6], 1 }
 0xd29   :  { %4137 = vsyncpa [#allocation9], 1 }
 0xd2a   :  { %4138 = vsyncpa [#allocation4], 1 }

</bundles_post_ra>
